<compile_context>
chip_gen: v5e
topology: v5e:2x2
jax: 0.10.0
libtpu: 0.0.40
codegen_flags: <defaults>
</compile_context>

<pallas_src>
import math
import functools
import numpy as np

import jax
import jax.numpy as jnp
from jax.experimental import pallas as pl
from jax.experimental.pallas import tpu as pltpu  # noqa: F401  (imported per convention)

EPSILON = 1e-10


# ----------------------------------------------------------------------------
# Pallas kernels (3 launches for the whole forward pass)
# ----------------------------------------------------------------------------

def _logmel_kernel(frames_ref, wbasis_ref, melfb2_ref, o_ref):
    """frames:(B*T, n_fft) @ windowed-[cos|sin]:(n_fft, 2F) -> power -> mel -> log.

    melfb2 = [fb; fb] stacked on the frequency axis, so (re^2 || im^2) @ melfb2
    equals (re^2 + im^2) @ fb without any lane slicing.
    """
    ri = jnp.dot(frames_ref[...], wbasis_ref[...], preferred_element_type=jnp.float32)
    mel = jnp.dot(ri * ri, melfb2_ref[...], preferred_element_type=jnp.float32)
    o_ref[...] = jnp.log(mel + EPSILON)


def logmel_pallas(frames2d, wbasis, melfb2):
    M = frames2d.shape[0]
    n_mels = melfb2.shape[1]
    return pl.pallas_call(
        _logmel_kernel,
        out_shape=jax.ShapeDtypeStruct((M, n_mels), jnp.float32),
    )(frames2d, wbasis, melfb2)


def _matmul_bias_relu_kernel(x_ref, w_ref, b_ref, o_ref):
    y = jnp.dot(x_ref[...], w_ref[...], preferred_element_type=jnp.float32) + b_ref[...]
    o_ref[...] = jnp.maximum(y, 0.0)


def conv_relu_pallas(patches2d, w, b):
    """Backbone Conv2d as im2col matmul + ReLU (single block)."""
    M = patches2d.shape[0]
    N = w.shape[1]
    return pl.pallas_call(
        _matmul_bias_relu_kernel,
        out_shape=jax.ShapeDtypeStruct((M, N), jnp.float32),
    )(patches2d, w, b)


def _layernorm(x, g, b, eps=1e-12):
    mu = jnp.mean(x, axis=-1, keepdims=True)
    xc = x - mu
    var = jnp.mean(xc * xc, axis=-1, keepdims=True)
    return xc * jax.lax.rsqrt(var + eps) * g + b


def _gelu(x):
    # tanh-approximation GELU (uses EUP tanh; avoids erf lowering)
    return 0.5 * x * (1.0 + jnp.tanh(0.7978845608028654 * (x + 0.044715 * x * x * x)))


def _encoder_head_kernel(num_layers, nheads,
                         feat_ref, base_ref, convw_ref, bias_ref, sel_ref,
                         wqkv_ref, bqkv_ref, wo_ref, bo_ref,
                         ln1g_ref, ln1b_ref, w1_ref, b1_ref, w2_ref, b2_ref,
                         ln2g_ref, ln2b_ref,
                         wp_ref, bp_ref, drop_ref, wc_ref, bc_ref,
                         out_ref):
    """Fused: Conv1d(1x1) projection + CLS prepend + BERT encoder stack +
    BertPooler + dropout + classifier.  Everything lives in VMEM."""
    D = base_ref.shape[1]
    dh = D // nheads
    scale = 1.0 / math.sqrt(dh)

    # 1x1 Conv1d projection fused with CLS prepend:
    # `feat` has zero rows at CLS positions; `base` carries the CLS vector at
    # those rows and the conv bias elsewhere.
    x = jnp.dot(feat_ref[...], convw_ref[...], preferred_element_type=jnp.float32)
    x = x + base_ref[...]                                             # (N, D)

    bias = bias_ref[...]                                              # (N, N) block-diag mask

    for l in range(num_layers):                                       # unrolled (static)
        # fused QKV projection: one (N, D) @ (D, 3D) matmul
        qkv = jnp.dot(x, wqkv_ref[l], preferred_element_type=jnp.float32) + bqkv_ref[l]
        wo = wo_ref[l]
        attn = bo_ref[l]                                              # (1, D), broadcasts
        for h in range(nheads):                                       # static lane slices
            qh = qkv[:, h * dh:(h + 1) * dh]
            kh = qkv[:, D + h * dh:D + (h + 1) * dh]
            vh = qkv[:, 2 * D + h * dh:2 * D + (h + 1) * dh]
            s = jax.lax.dot_general(qh, kh, (((1,), (1,)), ((), ())),
                                    preferred_element_type=jnp.float32)
            s = s * scale + bias                                      # mask cross-batch
            s = s - jnp.max(s, axis=-1, keepdims=True)
            p = jnp.exp(s)
            p = p / jnp.sum(p, axis=-1, keepdims=True)
            oh = jnp.dot(p, vh, preferred_element_type=jnp.float32)   # (N, dh)
            # concat-free output projection: sum_h oh @ Wo[h*dh:(h+1)*dh, :]
            attn = attn + jnp.dot(oh, wo[h * dh:(h + 1) * dh, :],
                                  preferred_element_type=jnp.float32)
        x = _layernorm(x + attn, ln1g_ref[l], ln1b_ref[l])
        ff = _gelu(jnp.dot(x, w1_ref[l], preferred_element_type=jnp.float32) + b1_ref[l])
        ff = jnp.dot(ff, w2_ref[l], preferred_element_type=jnp.float32) + b2_ref[l]
        x = _layernorm(x + ff, ln2g_ref[l], ln2b_ref[l])

    # BertPooler: pick token 0 of each sequence via a (B, N) selection matmul,
    # then Linear + tanh; dropout mask is precomputed (nn.Dropout(0.5), training).
    cls_tok = jnp.dot(sel_ref[...], x, preferred_element_type=jnp.float32)     # (B, D)
    pooled = jnp.tanh(jnp.dot(cls_tok, wp_ref[...],
                              preferred_element_type=jnp.float32) + bp_ref[...])
    pooled = pooled * drop_ref[...]
    out_ref[...] = (jnp.dot(pooled, wc_ref[...], preferred_element_type=jnp.float32)
                    + bc_ref[...])


def encoder_head_pallas(feat2d, base2d, conv_w, attn_bias, cls_sel,
                        enc, wp, bp, drop_mask, wc, bc, num_layers, nheads):
    B = cls_sel.shape[0]
    C = wc.shape[1]
    kernel = functools.partial(_encoder_head_kernel, num_layers, nheads)
    return pl.pallas_call(
        kernel,
        out_shape=jax.ShapeDtypeStruct((B, C), jnp.float32),
    )(feat2d, base2d, conv_w, attn_bias, cls_sel,
      enc['wqkv'], enc['bqkv'], enc['wo'], enc['bo'],
      enc['ln1_g'], enc['ln1_b'], enc['w1'], enc['b1'], enc['w2'], enc['b2'],
      enc['ln2_g'], enc['ln2_b'],
      wp, bp, drop_mask, wc, bc)


# ----------------------------------------------------------------------------
# Full forward (== CombinedModel_CLSv2.forward)
# ----------------------------------------------------------------------------

def combined_model_forward(waveform, params, cfg, rng_key):
    B = waveform.shape[0]
    n_fft, hop, n_mels = cfg['n_fft'], cfg['hop_length'], cfg['n_mels']
    D = cfg['hidden_dim']

    # --- MelSpectrogram (center=True, reflect pad, hann, power=2) + log(+eps) ---
    pad = n_fft // 2
    wav = jnp.pad(waveform, ((0, 0), (pad, pad)), mode='reflect')
    T = 1 + (wav.shape[1] - n_fft) // hop
    idx = jnp.arange(T)[:, None] * hop + jnp.arange(n_fft)[None, :]
    frames = wav[:, idx].reshape(B * T, n_fft)
    logmel = logmel_pallas(frames, params['wbasis'], params['melfb2'])
    spec = logmel.reshape(B, T, n_mels)[:, None]                       # (B,1,T,n_mels)

    # --- backbone: Conv2d(1, Cbb, 3, s=2, p=1) + ReLU via im2col + Pallas matmul ---
    Ho, Wo = (T + 1) // 2, (n_mels + 1) // 2
    xpad = jnp.pad(spec[:, 0], ((0, 0), (1, 1), (1, 1)))
    cols = [xpad[:, dy::2, dx::2][:, :Ho, :Wo] for dy in range(3) for dx in range(3)]
    patches = jnp.stack(cols, axis=-1).reshape(B * Ho * Wo, 9)
    feat = conv_relu_pallas(patches, params['backbone_w'], params['backbone_b'])
    feat_nhwc = feat.reshape(B, Ho, Wo, -1)
    backbone_feat = feat_nhwc.transpose(0, 3, 1, 2)                    # NCHW (B,Cbb,Ho,Wo)

    # --- x.transpose(2,3).flatten(1,2): per-time-step feature = c-major, f-minor ---
    Cbb = feat_nhwc.shape[-1]
    CF = Cbb * Wo                                                      # Conv1d in_channels
    tokens = feat_nhwc.transpose(0, 1, 3, 2).reshape(B, Ho, CF)        # (B, T', C*F)

    # --- fused-kernel inputs: zero CLS feature rows; base carries CLS vec / conv bias ---
    S = Ho + 1
    feat_seq = jnp.concatenate([jnp.zeros((B, 1, CF), jnp.float32), tokens], axis=1)
    base_seq = jnp.concatenate(
        [jnp.broadcast_to(params['cls_vec'], (B, 1, D)),
         jnp.broadcast_to(params['conv_b'], (B, Ho, D))], axis=1)
    feat2d = feat_seq.reshape(B * S, CF)
    base2d = base_seq.reshape(B * S, D)

    # block-diagonal (per-batch) additive attention bias + CLS-row selector
    bid = jnp.repeat(jnp.arange(B), S)
    attn_bias = jnp.where(bid[:, None] == bid[None, :], 0.0, -1e9).astype(jnp.float32)
    cls_sel = (jnp.arange(B * S)[None, :] == (jnp.arange(B) * S)[:, None]
               ).astype(jnp.float32)

    # nn.Dropout(0.5) after the pooler (module default: training mode), seeded mask.
    # TODO(synk): encoder-internal dropouts are treated as eval-mode identity.
    keep = jax.random.bernoulli(rng_key, 0.5, (B, D))
    drop_mask = keep.astype(jnp.float32) * 2.0

    pred_logits = encoder_head_pallas(
        feat2d, base2d, params['conv_w'], attn_bias, cls_sel,
        params['encoder'], params['pool_w'], params['pool_b'],
        drop_mask, params['cls_w'], params['cls_b'],
        cfg['num_layers'], cfg['nheads'])

    return {'pred_logits': pred_logits, 'spec': spec, 'backbone_feat': backbone_feat}


# ----------------------------------------------------------------------------
# Deterministic parameter / constant construction
# ----------------------------------------------------------------------------

def make_spec_consts(n_fft, n_mels, sr=8000.0):
    n = np.arange(n_fft)
    n_freqs = n_fft // 2 + 1
    k = np.arange(n_freqs)
    ang = 2.0 * np.pi * np.outer(n, k) / n_fft
    cos_b = np.cos(ang)
    sin_b = -np.sin(ang)
    window = 0.5 - 0.5 * np.cos(2.0 * np.pi * n / n_fft)               # periodic hann
    wbasis = (window[:, None] * np.concatenate([cos_b, sin_b], axis=1)).astype(np.float32)

    def hz_to_mel(f): return 2595.0 * np.log10(1.0 + f / 700.0)
    def mel_to_hz(m): return 700.0 * (10.0 ** (m / 2595.0) - 1.0)

    all_freqs = np.linspace(0.0, sr / 2.0, n_freqs)
    f_pts = mel_to_hz(np.linspace(hz_to_mel(0.0), hz_to_mel(sr / 2.0), n_mels + 2))
    fb = np.zeros((n_freqs, n_mels), dtype=np.float32)
    for i in range(n_mels):
        lo, ce, up = f_pts[i], f_pts[i + 1], f_pts[i + 2]
        rise = (all_freqs - lo) / max(ce - lo, 1e-6)
        fall = (up - all_freqs) / max(up - ce, 1e-6)
        fb[:, i] = np.maximum(0.0, np.minimum(rise, fall)).astype(np.float32)
    melfb2 = np.concatenate([fb, fb], axis=0).astype(np.float32)       # (2*n_freqs, n_mels)
    return jnp.asarray(wbasis), jnp.asarray(melfb2)


def init_params(key, cfg):
    D, Dff, Cbb = cfg['hidden_dim'], cfg['dff'], cfg['backbone_channels']
    L, C = cfg['num_layers'], cfg['num_classes']
    CF = Cbb * ((cfg['n_mels'] + 1) // 2)
    keys = iter(jax.random.split(key, 32))

    def w(shape, scale=0.02):
        return jax.random.normal(next(keys), shape, jnp.float32) * scale

    def zeros(shape): return jnp.zeros(shape, jnp.float32)
    def ones(shape): return jnp.ones(shape, jnp.float32)

    wbasis, melfb2 = make_spec_consts(cfg['n_fft'], cfg['n_mels'], cfg['sample_rate'])

    # get_cls(): np.random.seed(0); identical CLS row prepended to every batch element.
    np.random.seed(0)
    cls_vec = jnp.asarray(np.random.random((1, D)).astype(np.float32))

    encoder = dict(
        wqkv=w((L, D, 3 * D)), bqkv=zeros((L, 1, 3 * D)),
        wo=w((L, D, D)), bo=zeros((L, 1, D)),
        ln1_g=ones((L, 1, D)), ln1_b=zeros((L, 1, D)),
        w1=w((L, D, Dff)), b1=zeros((L, 1, Dff)),
        w2=w((L, Dff, D)), b2=zeros((L, 1, D)),
        ln2_g=ones((L, 1, D)), ln2_b=zeros((L, 1, D)),
    )

    return dict(
        wbasis=wbasis, melfb2=melfb2,
        backbone_w=w((9, Cbb)), backbone_b=zeros((1, Cbb)),
        conv_w=w((CF, D)), conv_b=zeros((1, D)),
        cls_vec=cls_vec,
        pool_w=w((D, D)), pool_b=zeros((1, D)),
        cls_w=w((D, C)), cls_b=zeros((1, C)),
        encoder=encoder,
    )


# ----------------------------------------------------------------------------
# Main
# ----------------------------------------------------------------------------

if __name__ == "__main__":
    cfg = dict(
        sample_rate=8000.0, n_fft=64, hop_length=32, n_mels=16,
        backbone_channels=16,
        hidden_dim=32, nheads=4, dff=128,
        num_layers=2,
        num_classes=8, feature_weight=1.0,   # feature_weight stored but unused (as in torch)
    )

    root = jax.random.PRNGKey(0)
    k_param, k_data, k_drop = jax.random.split(root, 3)

    params = init_params(k_param, cfg)

    B, Lwav = 2, 224          # center-padded STFT -> T = 1 + 224//32 = 8 frames
    waveform = jax.random.normal(k_data, (B, Lwav), jnp.float32)

    fwd = jax.jit(functools.partial(combined_model_forward, cfg=cfg))
    out = fwd(waveform, params, rng_key=k_drop)
    out = jax.block_until_ready(out)

    assert out['pred_logits'].shape == (B, cfg['num_classes'])
    assert out['spec'].shape == (B, 1, 8, cfg['n_mels'])
    assert out['backbone_feat'].shape == (B, cfg['backbone_channels'], 4, 8)
    assert np.all(np.isfinite(np.asarray(out['pred_logits'])))

    print("KERNEL_OK")
</pallas_src>

<mosaic_0001>
module attributes {stable_mosaic.version = 11 : i64} {
  func.func @_logmel_kernel(%arg0: memref<16x64xf32, #tpu.memory_space<vmem>>, %arg1: memref<64x66xf32, #tpu.memory_space<vmem>>, %arg2: memref<66x16xf32, #tpu.memory_space<vmem>>, %arg3: memref<16x16xf32, #tpu.memory_space<vmem>>) attributes {dimension_semantics = [], scalar_prefetch = 0 : i64, scratch_operands = 0 : i64, tpu.core_type = #tpu.core_type<tc>} {
    %c0 = arith.constant 0 : index
    %c0_0 = arith.constant 0 : index
    %0 = vector.load %arg0[%c0, %c0_0] : memref<16x64xf32, #tpu.memory_space<vmem>>, vector<16x64xf32>
    %c0_1 = arith.constant 0 : index
    %c0_2 = arith.constant 0 : index
    %1 = vector.load %arg1[%c0_1, %c0_2] : memref<64x66xf32, #tpu.memory_space<vmem>>, vector<64x66xf32>
    %cst = arith.constant dense<0.000000e+00> : vector<16x66xf32>
    %2 = tpu.matmul %0, %1, %cst {dimension_numbers = #tpu.dot_dimension_numbers<[1], [0], [0], [1], [0, 0, 1, 1], [], []>} : vector<16x64xf32>, vector<64x66xf32>, vector<16x66xf32> -> vector<16x66xf32>
    %3 = arith.mulf %2, %2 : vector<16x66xf32>
    %c0_3 = arith.constant 0 : index
    %c0_4 = arith.constant 0 : index
    %4 = vector.load %arg2[%c0_3, %c0_4] : memref<66x16xf32, #tpu.memory_space<vmem>>, vector<66x16xf32>
    %cst_5 = arith.constant dense<0.000000e+00> : vector<16x16xf32>
    %5 = tpu.matmul %3, %4, %cst_5 {dimension_numbers = #tpu.dot_dimension_numbers<[1], [0], [0], [1], [0, 0, 1, 1], [], []>} : vector<16x66xf32>, vector<66x16xf32>, vector<16x16xf32> -> vector<16x16xf32>
    %cst_6 = arith.constant 1.000000e-10 : f32
    %6 = vector.broadcast %cst_6 : f32 to vector<16x16xf32>
    %7 = arith.addf %5, %6 : vector<16x16xf32>
    %8 = math.log %7 : vector<16x16xf32>
    %c0_7 = arith.constant 0 : index
    %c0_8 = arith.constant 0 : index
    %9 = vector.load %arg3[%c0_7, %c0_8] : memref<16x16xf32, #tpu.memory_space<vmem>>, vector<16x16xf32>
    tpu.vector_store %arg3[%c0_7, %c0_8], %8 {strides = array<i32>} : memref<16x16xf32, #tpu.memory_space<vmem>>, vector<16x16xf32>,
    return
  }
}

module attributes {stable_mosaic.version = 11 : i64} {
  func.func @_matmul_bias_relu_kernel(%arg0: memref<64x9xf32, #tpu.memory_space<vmem>>, %arg1: memref<9x16xf32, #tpu.memory_space<vmem>>, %arg2: memref<1x16xf32, #tpu.memory_space<vmem>>, %arg3: memref<64x16xf32, #tpu.memory_space<vmem>>) attributes {dimension_semantics = [], scalar_prefetch = 0 : i64, scratch_operands = 0 : i64, tpu.core_type = #tpu.core_type<tc>} {
    %c0 = arith.constant 0 : index
    %c0_0 = arith.constant 0 : index
    %0 = vector.load %arg0[%c0, %c0_0] : memref<64x9xf32, #tpu.memory_space<vmem>>, vector<64x9xf32>
    %c0_1 = arith.constant 0 : index
    %c0_2 = arith.constant 0 : index
    %1 = vector.load %arg1[%c0_1, %c0_2] : memref<9x16xf32, #tpu.memory_space<vmem>>, vector<9x16xf32>
    %cst = arith.constant dense<0.000000e+00> : vector<64x16xf32>
    %2 = tpu.matmul %0, %1, %cst {dimension_numbers = #tpu.dot_dimension_numbers<[1], [0], [0], [1], [0, 0, 1, 1], [], []>} : vector<64x9xf32>, vector<9x16xf32>, vector<64x16xf32> -> vector<64x16xf32>
    %c0_3 = arith.constant 0 : index
    %c0_4 = arith.constant 0 : index
    %3 = vector.load %arg2[%c0_3, %c0_4] : memref<1x16xf32, #tpu.memory_space<vmem>>, vector<1x16xf32>
    %4 = vector.broadcast %3 : vector<1x16xf32> to vector<64x16xf32>
    %5 = arith.addf %2, %4 : vector<64x16xf32>
    %cst_5 = arith.constant 0.000000e+00 : f32
    %6 = vector.broadcast %cst_5 : f32 to vector<64x16xf32>
    %7 = arith.maximumf %5, %6 : vector<64x16xf32>
    %c0_6 = arith.constant 0 : index
    %c0_7 = arith.constant 0 : index
    %8 = vector.load %arg3[%c0_6, %c0_7] : memref<64x16xf32, #tpu.memory_space<vmem>>, vector<64x16xf32>
    tpu.vector_store %arg3[%c0_6, %c0_7], %7 {strides = array<i32>} : memref<64x16xf32, #tpu.memory_space<vmem>>, vector<64x16xf32>,
    return
  }
}

module attributes {stable_mosaic.version = 11 : i64} {
  func.func @_encoder_head_kernel(%arg0: memref<10x128xf32, #tpu.memory_space<vmem>>, %arg1: memref<10x32xf32, #tpu.memory_space<vmem>>, %arg2: memref<128x32xf32, #tpu.memory_space<vmem>>, %arg3: memref<10x10xf32, #tpu.memory_space<vmem>>, %arg4: memref<2x10xf32, #tpu.memory_space<vmem>>, %arg5: memref<2x32x96xf32, #tpu.memory_space<vmem>>, %arg6: memref<2x1x96xf32, #tpu.memory_space<vmem>>, %arg7: memref<2x32x32xf32, #tpu.memory_space<vmem>>, %arg8: memref<2x1x32xf32, #tpu.memory_space<vmem>>, %arg9: memref<2x1x32xf32, #tpu.memory_space<vmem>>, %arg10: memref<2x1x32xf32, #tpu.memory_space<vmem>>, %arg11: memref<2x32x128xf32, #tpu.memory_space<vmem>>, %arg12: memref<2x1x128xf32, #tpu.memory_space<vmem>>, %arg13: memref<2x128x32xf32, #tpu.memory_space<vmem>>, %arg14: memref<2x1x32xf32, #tpu.memory_space<vmem>>, %arg15: memref<2x1x32xf32, #tpu.memory_space<vmem>>, %arg16: memref<2x1x32xf32, #tpu.memory_space<vmem>>, %arg17: memref<32x32xf32, #tpu.memory_space<vmem>>, %arg18: memref<1x32xf32, #tpu.memory_space<vmem>>, %arg19: memref<2x32xf32, #tpu.memory_space<vmem>>, %arg20: memref<32x8xf32, #tpu.memory_space<vmem>>, %arg21: memref<1x8xf32, #tpu.memory_space<vmem>>, %arg22: memref<2x8xf32, #tpu.memory_space<vmem>>) attributes {dimension_semantics = [], scalar_prefetch = 0 : i64, scratch_operands = 0 : i64, tpu.core_type = #tpu.core_type<tc>} {
    %c0 = arith.constant 0 : index
    %c0_0 = arith.constant 0 : index
    %0 = vector.load %arg0[%c0, %c0_0] : memref<10x128xf32, #tpu.memory_space<vmem>>, vector<10x128xf32>
    %c0_1 = arith.constant 0 : index
    %c0_2 = arith.constant 0 : index
    %1 = vector.load %arg2[%c0_1, %c0_2] : memref<128x32xf32, #tpu.memory_space<vmem>>, vector<128x32xf32>
    %cst = arith.constant dense<0.000000e+00> : vector<10x32xf32>
    %2 = tpu.matmul %0, %1, %cst {dimension_numbers = #tpu.dot_dimension_numbers<[1], [0], [0], [1], [0, 0, 1, 1], [], []>} : vector<10x128xf32>, vector<128x32xf32>, vector<10x32xf32> -> vector<10x32xf32>
    %c0_3 = arith.constant 0 : index
    %c0_4 = arith.constant 0 : index
    %3 = vector.load %arg1[%c0_3, %c0_4] : memref<10x32xf32, #tpu.memory_space<vmem>>, vector<10x32xf32>
    %4 = arith.addf %2, %3 : vector<10x32xf32>
    %c0_5 = arith.constant 0 : index
    %c0_6 = arith.constant 0 : index
    %5 = vector.load %arg3[%c0_5, %c0_6] : memref<10x10xf32, #tpu.memory_space<vmem>>, vector<10x10xf32>
    %c0_7 = arith.constant 0 : index
    %c0_8 = arith.constant 0 : index
    %c0_9 = arith.constant 0 : index
    %6 = vector.load %arg5[%c0_7, %c0_8, %c0_9] : memref<2x32x96xf32, #tpu.memory_space<vmem>>, vector<1x32x96xf32>
    %7 = vector.shape_cast %6 : vector<1x32x96xf32> to vector<32x96xf32>
    %cst_10 = arith.constant dense<0.000000e+00> : vector<10x96xf32>
    %8 = tpu.matmul %4, %7, %cst_10 {dimension_numbers = #tpu.dot_dimension_numbers<[1], [0], [0], [1], [0, 0, 1, 1], [], []>} : vector<10x32xf32>, vector<32x96xf32>, vector<10x96xf32> -> vector<10x96xf32>
    %c0_11 = arith.constant 0 : index
    %c0_12 = arith.constant 0 : index
    %c0_13 = arith.constant 0 : index
    %9 = vector.load %arg6[%c0_11, %c0_12, %c0_13] : memref<2x1x96xf32, #tpu.memory_space<vmem>>, vector<1x1x96xf32>
    %10 = vector.shape_cast %9 : vector<1x1x96xf32> to vector<1x96xf32>
    %11 = vector.broadcast %10 : vector<1x96xf32> to vector<10x96xf32>
    %12 = arith.addf %8, %11 : vector<10x96xf32>
    %c0_14 = arith.constant 0 : index
    %c0_15 = arith.constant 0 : index
    %c0_16 = arith.constant 0 : index
    %13 = vector.load %arg7[%c0_14, %c0_15, %c0_16] : memref<2x32x32xf32, #tpu.memory_space<vmem>>, vector<1x32x32xf32>
    %14 = vector.shape_cast %13 : vector<1x32x32xf32> to vector<32x32xf32>
    %c0_17 = arith.constant 0 : index
    %c0_18 = arith.constant 0 : index
    %c0_19 = arith.constant 0 : index
    %15 = vector.load %arg8[%c0_17, %c0_18, %c0_19] : memref<2x1x32xf32, #tpu.memory_space<vmem>>, vector<1x1x32xf32>
    %16 = vector.shape_cast %15 : vector<1x1x32xf32> to vector<1x32xf32>
    %17 = vector.extract_strided_slice %12 {offsets = [0, 0], sizes = [10, 8], strides = [1, 1]} : vector<10x96xf32> to vector<10x8xf32>
    %18 = vector.extract_strided_slice %12 {offsets = [0, 32], sizes = [10, 8], strides = [1, 1]} : vector<10x96xf32> to vector<10x8xf32>
    %19 = vector.extract_strided_slice %12 {offsets = [0, 64], sizes = [10, 8], strides = [1, 1]} : vector<10x96xf32> to vector<10x8xf32>
    %cst_20 = arith.constant dense<0.000000e+00> : vector<10x10xf32>
    %20 = tpu.matmul %17, %18, %cst_20 {dimension_numbers = #tpu.dot_dimension_numbers<[1], [1], [0], [0], [0, 0, 1, 0], [], []>} : vector<10x8xf32>, vector<10x8xf32>, vector<10x10xf32> -> vector<10x10xf32>
    %cst_21 = arith.constant 0.353553385 : f32
    %21 = vector.broadcast %cst_21 : f32 to vector<10x10xf32>
    %22 = arith.mulf %20, %21 : vector<10x10xf32>
    %23 = arith.addf %22, %5 : vector<10x10xf32>
    %cst_22 = arith.constant dense<0xFF800000> : vector<10xf32>
    %24 = vector.multi_reduction <maximumf>, %23, %cst_22 [1] : vector<10x10xf32> to vector<10xf32>
    %25 = vector.shape_cast %24 : vector<10xf32> to vector<10x1xf32>
    %26 = vector.broadcast %25 : vector<10x1xf32> to vector<10x10xf32>
    %27 = arith.subf %23, %26 : vector<10x10xf32>
    %28 = math.exp %27 : vector<10x10xf32>
    %cst_23 = arith.constant dense<0.000000e+00> : vector<10xf32>
    %29 = vector.multi_reduction <add>, %28, %cst_23 [1] : vector<10x10xf32> to vector<10xf32>
    %30 = vector.shape_cast %29 : vector<10xf32> to vector<10x1xf32>
    %31 = vector.broadcast %30 : vector<10x1xf32> to vector<10x10xf32>
    %32 = arith.divf %28, %31 : vector<10x10xf32>
    %cst_24 = arith.constant dense<0.000000e+00> : vector<10x8xf32>
    %33 = tpu.matmul %32, %19, %cst_24 {dimension_numbers = #tpu.dot_dimension_numbers<[1], [0], [0], [1], [0, 0, 1, 1], [], []>} : vector<10x10xf32>, vector<10x8xf32>, vector<10x8xf32> -> vector<10x8xf32>
    %34 = vector.extract_strided_slice %14 {offsets = [0, 0], sizes = [8, 32], strides = [1, 1]} : vector<32x32xf32> to vector<8x32xf32>
    %cst_25 = arith.constant dense<0.000000e+00> : vector<10x32xf32>
    %35 = tpu.matmul %33, %34, %cst_25 {dimension_numbers = #tpu.dot_dimension_numbers<[1], [0], [0], [1], [0, 0, 1, 1], [], []>} : vector<10x8xf32>, vector<8x32xf32>, vector<10x32xf32> -> vector<10x32xf32>
    %36 = vector.broadcast %16 : vector<1x32xf32> to vector<10x32xf32>
    %37 = arith.addf %36, %35 : vector<10x32xf32>
    %38 = vector.extract_strided_slice %12 {offsets = [0, 8], sizes = [10, 8], strides = [1, 1]} : vector<10x96xf32> to vector<10x8xf32>
    %39 = vector.extract_strided_slice %12 {offsets = [0, 40], sizes = [10, 8], strides = [1, 1]} : vector<10x96xf32> to vector<10x8xf32>
    %40 = vector.extract_strided_slice %12 {offsets = [0, 72], sizes = [10, 8], strides = [1, 1]} : vector<10x96xf32> to vector<10x8xf32>
    %cst_26 = arith.constant dense<0.000000e+00> : vector<10x10xf32>
    %41 = tpu.matmul %38, %39, %cst_26 {dimension_numbers = #tpu.dot_dimension_numbers<[1], [1], [0], [0], [0, 0, 1, 0], [], []>} : vector<10x8xf32>, vector<10x8xf32>, vector<10x10xf32> -> vector<10x10xf32>
    %cst_27 = arith.constant 0.353553385 : f32
    %42 = vector.broadcast %cst_27 : f32 to vector<10x10xf32>
    %43 = arith.mulf %41, %42 : vector<10x10xf32>
    %44 = arith.addf %43, %5 : vector<10x10xf32>
    %cst_28 = arith.constant dense<0xFF800000> : vector<10xf32>
    %45 = vector.multi_reduction <maximumf>, %44, %cst_28 [1] : vector<10x10xf32> to vector<10xf32>
    %46 = vector.shape_cast %45 : vector<10xf32> to vector<10x1xf32>
    %47 = vector.broadcast %46 : vector<10x1xf32> to vector<10x10xf32>
    %48 = arith.subf %44, %47 : vector<10x10xf32>
    %49 = math.exp %48 : vector<10x10xf32>
    %cst_29 = arith.constant dense<0.000000e+00> : vector<10xf32>
    %50 = vector.multi_reduction <add>, %49, %cst_29 [1] : vector<10x10xf32> to vector<10xf32>
    %51 = vector.shape_cast %50 : vector<10xf32> to vector<10x1xf32>
    %52 = vector.broadcast %51 : vector<10x1xf32> to vector<10x10xf32>
    %53 = arith.divf %49, %52 : vector<10x10xf32>
    %cst_30 = arith.constant dense<0.000000e+00> : vector<10x8xf32>
    %54 = tpu.matmul %53, %40, %cst_30 {dimension_numbers = #tpu.dot_dimension_numbers<[1], [0], [0], [1], [0, 0, 1, 1], [], []>} : vector<10x10xf32>, vector<10x8xf32>, vector<10x8xf32> -> vector<10x8xf32>
    %55 = vector.extract_strided_slice %14 {offsets = [8, 0], sizes = [8, 32], strides = [1, 1]} : vector<32x32xf32> to vector<8x32xf32>
    %cst_31 = arith.constant dense<0.000000e+00> : vector<10x32xf32>
    %56 = tpu.matmul %54, %55, %cst_31 {dimension_numbers = #tpu.dot_dimension_numbers<[1], [0], [0], [1], [0, 0, 1, 1], [], []>} : vector<10x8xf32>, vector<8x32xf32>, vector<10x32xf32> -> vector<10x32xf32>
    %57 = arith.addf %37, %56 : vector<10x32xf32>
    %58 = vector.extract_strided_slice %12 {offsets = [0, 16], sizes = [10, 8], strides = [1, 1]} : vector<10x96xf32> to vector<10x8xf32>
    %59 = vector.extract_strided_slice %12 {offsets = [0, 48], sizes = [10, 8], strides = [1, 1]} : vector<10x96xf32> to vector<10x8xf32>
    %60 = vector.extract_strided_slice %12 {offsets = [0, 80], sizes = [10, 8], strides = [1, 1]} : vector<10x96xf32> to vector<10x8xf32>
    %cst_32 = arith.constant dense<0.000000e+00> : vector<10x10xf32>
    %61 = tpu.matmul %58, %59, %cst_32 {dimension_numbers = #tpu.dot_dimension_numbers<[1], [1], [0], [0], [0, 0, 1, 0], [], []>} : vector<10x8xf32>, vector<10x8xf32>, vector<10x10xf32> -> vector<10x10xf32>
    %cst_33 = arith.constant 0.353553385 : f32
    %62 = vector.broadcast %cst_33 : f32 to vector<10x10xf32>
    %63 = arith.mulf %61, %62 : vector<10x10xf32>
    %64 = arith.addf %63, %5 : vector<10x10xf32>
    %cst_34 = arith.constant dense<0xFF800000> : vector<10xf32>
    %65 = vector.multi_reduction <maximumf>, %64, %cst_34 [1] : vector<10x10xf32> to vector<10xf32>
    %66 = vector.shape_cast %65 : vector<10xf32> to vector<10x1xf32>
    %67 = vector.broadcast %66 : vector<10x1xf32> to vector<10x10xf32>
    %68 = arith.subf %64, %67 : vector<10x10xf32>
    %69 = math.exp %68 : vector<10x10xf32>
    %cst_35 = arith.constant dense<0.000000e+00> : vector<10xf32>
    %70 = vector.multi_reduction <add>, %69, %cst_35 [1] : vector<10x10xf32> to vector<10xf32>
    %71 = vector.shape_cast %70 : vector<10xf32> to vector<10x1xf32>
    %72 = vector.broadcast %71 : vector<10x1xf32> to vector<10x10xf32>
    %73 = arith.divf %69, %72 : vector<10x10xf32>
    %cst_36 = arith.constant dense<0.000000e+00> : vector<10x8xf32>
    %74 = tpu.matmul %73, %60, %cst_36 {dimension_numbers = #tpu.dot_dimension_numbers<[1], [0], [0], [1], [0, 0, 1, 1], [], []>} : vector<10x10xf32>, vector<10x8xf32>, vector<10x8xf32> -> vector<10x8xf32>
    %75 = vector.extract_strided_slice %14 {offsets = [16, 0], sizes = [8, 32], strides = [1, 1]} : vector<32x32xf32> to vector<8x32xf32>
    %cst_37 = arith.constant dense<0.000000e+00> : vector<10x32xf32>
    %76 = tpu.matmul %74, %75, %cst_37 {dimension_numbers = #tpu.dot_dimension_numbers<[1], [0], [0], [1], [0, 0, 1, 1], [], []>} : vector<10x8xf32>, vector<8x32xf32>, vector<10x32xf32> -> vector<10x32xf32>
    %77 = arith.addf %57, %76 : vector<10x32xf32>
    %78 = vector.extract_strided_slice %12 {offsets = [0, 24], sizes = [10, 8], strides = [1, 1]} : vector<10x96xf32> to vector<10x8xf32>
    %79 = vector.extract_strided_slice %12 {offsets = [0, 56], sizes = [10, 8], strides = [1, 1]} : vector<10x96xf32> to vector<10x8xf32>
    %80 = vector.extract_strided_slice %12 {offsets = [0, 88], sizes = [10, 8], strides = [1, 1]} : vector<10x96xf32> to vector<10x8xf32>
    %cst_38 = arith.constant dense<0.000000e+00> : vector<10x10xf32>
    %81 = tpu.matmul %78, %79, %cst_38 {dimension_numbers = #tpu.dot_dimension_numbers<[1], [1], [0], [0], [0, 0, 1, 0], [], []>} : vector<10x8xf32>, vector<10x8xf32>, vector<10x10xf32> -> vector<10x10xf32>
    %cst_39 = arith.constant 0.353553385 : f32
    %82 = vector.broadcast %cst_39 : f32 to vector<10x10xf32>
    %83 = arith.mulf %81, %82 : vector<10x10xf32>
    %84 = arith.addf %83, %5 : vector<10x10xf32>
    %cst_40 = arith.constant dense<0xFF800000> : vector<10xf32>
    %85 = vector.multi_reduction <maximumf>, %84, %cst_40 [1] : vector<10x10xf32> to vector<10xf32>
    %86 = vector.shape_cast %85 : vector<10xf32> to vector<10x1xf32>
    %87 = vector.broadcast %86 : vector<10x1xf32> to vector<10x10xf32>
    %88 = arith.subf %84, %87 : vector<10x10xf32>
    %89 = math.exp %88 : vector<10x10xf32>
    %cst_41 = arith.constant dense<0.000000e+00> : vector<10xf32>
    %90 = vector.multi_reduction <add>, %89, %cst_41 [1] : vector<10x10xf32> to vector<10xf32>
    %91 = vector.shape_cast %90 : vector<10xf32> to vector<10x1xf32>
    %92 = vector.broadcast %91 : vector<10x1xf32> to vector<10x10xf32>
    %93 = arith.divf %89, %92 : vector<10x10xf32>
    %cst_42 = arith.constant dense<0.000000e+00> : vector<10x8xf32>
    %94 = tpu.matmul %93, %80, %cst_42 {dimension_numbers = #tpu.dot_dimension_numbers<[1], [0], [0], [1], [0, 0, 1, 1], [], []>} : vector<10x10xf32>, vector<10x8xf32>, vector<10x8xf32> -> vector<10x8xf32>
    %95 = vector.extract_strided_slice %14 {offsets = [24, 0], sizes = [8, 32], strides = [1, 1]} : vector<32x32xf32> to vector<8x32xf32>
    %cst_43 = arith.constant dense<0.000000e+00> : vector<10x32xf32>
    %96 = tpu.matmul %94, %95, %cst_43 {dimension_numbers = #tpu.dot_dimension_numbers<[1], [0], [0], [1], [0, 0, 1, 1], [], []>} : vector<10x8xf32>, vector<8x32xf32>, vector<10x32xf32> -> vector<10x32xf32>
    %97 = arith.addf %77, %96 : vector<10x32xf32>
    %98 = arith.addf %4, %97 : vector<10x32xf32>
    %c0_44 = arith.constant 0 : index
    %c0_45 = arith.constant 0 : index
    %c0_46 = arith.constant 0 : index
    %99 = vector.load %arg9[%c0_44, %c0_45, %c0_46] : memref<2x1x32xf32, #tpu.memory_space<vmem>>, vector<1x1x32xf32>
    %100 = vector.shape_cast %99 : vector<1x1x32xf32> to vector<1x32xf32>
    %c0_47 = arith.constant 0 : index
    %c0_48 = arith.constant 0 : index
    %c0_49 = arith.constant 0 : index
    %101 = vector.load %arg10[%c0_47, %c0_48, %c0_49] : memref<2x1x32xf32, #tpu.memory_space<vmem>>, vector<1x1x32xf32>
    %102 = vector.shape_cast %101 : vector<1x1x32xf32> to vector<1x32xf32>
    %cst_50 = arith.constant dense<0.000000e+00> : vector<10xf32>
    %103 = vector.multi_reduction <add>, %98, %cst_50 [1] : vector<10x32xf32> to vector<10xf32>
    %104 = vector.shape_cast %103 : vector<10xf32> to vector<10x1xf32>
    %cst_51 = arith.constant 3.200000e+01 : f32
    %105 = vector.broadcast %cst_51 : f32 to vector<10x1xf32>
    %106 = arith.divf %104, %105 : vector<10x1xf32>
    %107 = vector.broadcast %106 : vector<10x1xf32> to vector<10x32xf32>
    %108 = arith.subf %98, %107 : vector<10x32xf32>
    %109 = arith.mulf %108, %108 : vector<10x32xf32>
    %cst_52 = arith.constant dense<0.000000e+00> : vector<10xf32>
    %110 = vector.multi_reduction <add>, %109, %cst_52 [1] : vector<10x32xf32> to vector<10xf32>
    %111 = vector.shape_cast %110 : vector<10xf32> to vector<10x1xf32>
    %cst_53 = arith.constant 3.200000e+01 : f32
    %112 = vector.broadcast %cst_53 : f32 to vector<10x1xf32>
    %113 = arith.divf %111, %112 : vector<10x1xf32>
    %cst_54 = arith.constant 9.99999996E-13 : f32
    %114 = vector.broadcast %cst_54 : f32 to vector<10x1xf32>
    %115 = arith.addf %113, %114 : vector<10x1xf32>
    %116 = math.rsqrt %115 : vector<10x1xf32>
    %117 = vector.broadcast %116 : vector<10x1xf32> to vector<10x32xf32>
    %118 = arith.mulf %108, %117 : vector<10x32xf32>
    %119 = vector.broadcast %100 : vector<1x32xf32> to vector<10x32xf32>
    %120 = arith.mulf %118, %119 : vector<10x32xf32>
    %121 = vector.broadcast %102 : vector<1x32xf32> to vector<10x32xf32>
    %122 = arith.addf %120, %121 : vector<10x32xf32>
    %c0_55 = arith.constant 0 : index
    %c0_56 = arith.constant 0 : index
    %c0_57 = arith.constant 0 : index
    %123 = vector.load %arg11[%c0_55, %c0_56, %c0_57] : memref<2x32x128xf32, #tpu.memory_space<vmem>>, vector<1x32x128xf32>
    %124 = vector.shape_cast %123 : vector<1x32x128xf32> to vector<32x128xf32>
    %cst_58 = arith.constant dense<0.000000e+00> : vector<10x128xf32>
    %125 = tpu.matmul %122, %124, %cst_58 {dimension_numbers = #tpu.dot_dimension_numbers<[1], [0], [0], [1], [0, 0, 1, 1], [], []>} : vector<10x32xf32>, vector<32x128xf32>, vector<10x128xf32> -> vector<10x128xf32>
    %c0_59 = arith.constant 0 : index
    %c0_60 = arith.constant 0 : index
    %c0_61 = arith.constant 0 : index
    %126 = vector.load %arg12[%c0_59, %c0_60, %c0_61] : memref<2x1x128xf32, #tpu.memory_space<vmem>>, vector<1x1x128xf32>
    %127 = vector.shape_cast %126 : vector<1x1x128xf32> to vector<1x128xf32>
    %128 = vector.broadcast %127 : vector<1x128xf32> to vector<10x128xf32>
    %129 = arith.addf %125, %128 : vector<10x128xf32>
    %cst_62 = arith.constant 5.000000e-01 : f32
    %130 = vector.broadcast %cst_62 : f32 to vector<10x128xf32>
    %131 = arith.mulf %130, %129 : vector<10x128xf32>
    %cst_63 = arith.constant 4.471500e-02 : f32
    %132 = vector.broadcast %cst_63 : f32 to vector<10x128xf32>
    %133 = arith.mulf %132, %129 : vector<10x128xf32>
    %134 = arith.mulf %133, %129 : vector<10x128xf32>
    %135 = arith.mulf %134, %129 : vector<10x128xf32>
    %136 = arith.addf %129, %135 : vector<10x128xf32>
    %cst_64 = arith.constant 0.797884583 : f32
    %137 = vector.broadcast %cst_64 : f32 to vector<10x128xf32>
    %138 = arith.mulf %137, %136 : vector<10x128xf32>
    %139 = math.tanh %138 : vector<10x128xf32>
    %cst_65 = arith.constant 1.000000e+00 : f32
    %140 = vector.broadcast %cst_65 : f32 to vector<10x128xf32>
    %141 = arith.addf %140, %139 : vector<10x128xf32>
    %142 = arith.mulf %131, %141 : vector<10x128xf32>
    %c0_66 = arith.constant 0 : index
    %c0_67 = arith.constant 0 : index
    %c0_68 = arith.constant 0 : index
    %143 = vector.load %arg13[%c0_66, %c0_67, %c0_68] : memref<2x128x32xf32, #tpu.memory_space<vmem>>, vector<1x128x32xf32>
    %144 = vector.shape_cast %143 : vector<1x128x32xf32> to vector<128x32xf32>
    %cst_69 = arith.constant dense<0.000000e+00> : vector<10x32xf32>
    %145 = tpu.matmul %142, %144, %cst_69 {dimension_numbers = #tpu.dot_dimension_numbers<[1], [0], [0], [1], [0, 0, 1, 1], [], []>} : vector<10x128xf32>, vector<128x32xf32>, vector<10x32xf32> -> vector<10x32xf32>
    %c0_70 = arith.constant 0 : index
    %c0_71 = arith.constant 0 : index
    %c0_72 = arith.constant 0 : index
    %146 = vector.load %arg14[%c0_70, %c0_71, %c0_72] : memref<2x1x32xf32, #tpu.memory_space<vmem>>, vector<1x1x32xf32>
    %147 = vector.shape_cast %146 : vector<1x1x32xf32> to vector<1x32xf32>
    %148 = vector.broadcast %147 : vector<1x32xf32> to vector<10x32xf32>
    %149 = arith.addf %145, %148 : vector<10x32xf32>
    %150 = arith.addf %122, %149 : vector<10x32xf32>
    %c0_73 = arith.constant 0 : index
    %c0_74 = arith.constant 0 : index
    %c0_75 = arith.constant 0 : index
    %151 = vector.load %arg15[%c0_73, %c0_74, %c0_75] : memref<2x1x32xf32, #tpu.memory_space<vmem>>, vector<1x1x32xf32>
    %152 = vector.shape_cast %151 : vector<1x1x32xf32> to vector<1x32xf32>
    %c0_76 = arith.constant 0 : index
    %c0_77 = arith.constant 0 : index
    %c0_78 = arith.constant 0 : index
    %153 = vector.load %arg16[%c0_76, %c0_77, %c0_78] : memref<2x1x32xf32, #tpu.memory_space<vmem>>, vector<1x1x32xf32>
    %154 = vector.shape_cast %153 : vector<1x1x32xf32> to vector<1x32xf32>
    %cst_79 = arith.constant dense<0.000000e+00> : vector<10xf32>
    %155 = vector.multi_reduction <add>, %150, %cst_79 [1] : vector<10x32xf32> to vector<10xf32>
    %156 = vector.shape_cast %155 : vector<10xf32> to vector<10x1xf32>
    %cst_80 = arith.constant 3.200000e+01 : f32
    %157 = vector.broadcast %cst_80 : f32 to vector<10x1xf32>
    %158 = arith.divf %156, %157 : vector<10x1xf32>
    %159 = vector.broadcast %158 : vector<10x1xf32> to vector<10x32xf32>
    %160 = arith.subf %150, %159 : vector<10x32xf32>
    %161 = arith.mulf %160, %160 : vector<10x32xf32>
    %cst_81 = arith.constant dense<0.000000e+00> : vector<10xf32>
    %162 = vector.multi_reduction <add>, %161, %cst_81 [1] : vector<10x32xf32> to vector<10xf32>
    %163 = vector.shape_cast %162 : vector<10xf32> to vector<10x1xf32>
    %cst_82 = arith.constant 3.200000e+01 : f32
    %164 = vector.broadcast %cst_82 : f32 to vector<10x1xf32>
    %165 = arith.divf %163, %164 : vector<10x1xf32>
    %cst_83 = arith.constant 9.99999996E-13 : f32
    %166 = vector.broadcast %cst_83 : f32 to vector<10x1xf32>
    %167 = arith.addf %165, %166 : vector<10x1xf32>
    %168 = math.rsqrt %167 : vector<10x1xf32>
    %169 = vector.broadcast %168 : vector<10x1xf32> to vector<10x32xf32>
    %170 = arith.mulf %160, %169 : vector<10x32xf32>
    %171 = vector.broadcast %152 : vector<1x32xf32> to vector<10x32xf32>
    %172 = arith.mulf %170, %171 : vector<10x32xf32>
    %173 = vector.broadcast %154 : vector<1x32xf32> to vector<10x32xf32>
    %174 = arith.addf %172, %173 : vector<10x32xf32>
    %c1 = arith.constant 1 : index
    %c0_84 = arith.constant 0 : index
    %c0_85 = arith.constant 0 : index
    %175 = vector.load %arg5[%c1, %c0_84, %c0_85] : memref<2x32x96xf32, #tpu.memory_space<vmem>>, vector<1x32x96xf32>
    %176 = vector.shape_cast %175 : vector<1x32x96xf32> to vector<32x96xf32>
    %cst_86 = arith.constant dense<0.000000e+00> : vector<10x96xf32>
    %177 = tpu.matmul %174, %176, %cst_86 {dimension_numbers = #tpu.dot_dimension_numbers<[1], [0], [0], [1], [0, 0, 1, 1], [], []>} : vector<10x32xf32>, vector<32x96xf32>, vector<10x96xf32> -> vector<10x96xf32>
    %c1_87 = arith.constant 1 : index
    %c0_88 = arith.constant 0 : index
    %c0_89 = arith.constant 0 : index
    %178 = vector.load %arg6[%c1_87, %c0_88, %c0_89] : memref<2x1x96xf32, #tpu.memory_space<vmem>>, vector<1x1x96xf32>
    %179 = vector.shape_cast %178 : vector<1x1x96xf32> to vector<1x96xf32>
    %180 = vector.broadcast %179 : vector<1x96xf32> to vector<10x96xf32>
    %181 = arith.addf %177, %180 : vector<10x96xf32>
    %c1_90 = arith.constant 1 : index
    %c0_91 = arith.constant 0 : index
    %c0_92 = arith.constant 0 : index
    %182 = vector.load %arg7[%c1_90, %c0_91, %c0_92] : memref<2x32x32xf32, #tpu.memory_space<vmem>>, vector<1x32x32xf32>
    %183 = vector.shape_cast %182 : vector<1x32x32xf32> to vector<32x32xf32>
    %c1_93 = arith.constant 1 : index
    %c0_94 = arith.constant 0 : index
    %c0_95 = arith.constant 0 : index
    %184 = vector.load %arg8[%c1_93, %c0_94, %c0_95] : memref<2x1x32xf32, #tpu.memory_space<vmem>>, vector<1x1x32xf32>
    %185 = vector.shape_cast %184 : vector<1x1x32xf32> to vector<1x32xf32>
    %186 = vector.extract_strided_slice %181 {offsets = [0, 0], sizes = [10, 8], strides = [1, 1]} : vector<10x96xf32> to vector<10x8xf32>
    %187 = vector.extract_strided_slice %181 {offsets = [0, 32], sizes = [10, 8], strides = [1, 1]} : vector<10x96xf32> to vector<10x8xf32>
    %188 = vector.extract_strided_slice %181 {offsets = [0, 64], sizes = [10, 8], strides = [1, 1]} : vector<10x96xf32> to vector<10x8xf32>
    %cst_96 = arith.constant dense<0.000000e+00> : vector<10x10xf32>
    %189 = tpu.matmul %186, %187, %cst_96 {dimension_numbers = #tpu.dot_dimension_numbers<[1], [1], [0], [0], [0, 0, 1, 0], [], []>} : vector<10x8xf32>, vector<10x8xf32>, vector<10x10xf32> -> vector<10x10xf32>
    %cst_97 = arith.constant 0.353553385 : f32
    %190 = vector.broadcast %cst_97 : f32 to vector<10x10xf32>
    %191 = arith.mulf %189, %190 : vector<10x10xf32>
    %192 = arith.addf %191, %5 : vector<10x10xf32>
    %cst_98 = arith.constant dense<0xFF800000> : vector<10xf32>
    %193 = vector.multi_reduction <maximumf>, %192, %cst_98 [1] : vector<10x10xf32> to vector<10xf32>
    %194 = vector.shape_cast %193 : vector<10xf32> to vector<10x1xf32>
    %195 = vector.broadcast %194 : vector<10x1xf32> to vector<10x10xf32>
    %196 = arith.subf %192, %195 : vector<10x10xf32>
    %197 = math.exp %196 : vector<10x10xf32>
    %cst_99 = arith.constant dense<0.000000e+00> : vector<10xf32>
    %198 = vector.multi_reduction <add>, %197, %cst_99 [1] : vector<10x10xf32> to vector<10xf32>
    %199 = vector.shape_cast %198 : vector<10xf32> to vector<10x1xf32>
    %200 = vector.broadcast %199 : vector<10x1xf32> to vector<10x10xf32>
    %201 = arith.divf %197, %200 : vector<10x10xf32>
    %cst_100 = arith.constant dense<0.000000e+00> : vector<10x8xf32>
    %202 = tpu.matmul %201, %188, %cst_100 {dimension_numbers = #tpu.dot_dimension_numbers<[1], [0], [0], [1], [0, 0, 1, 1], [], []>} : vector<10x10xf32>, vector<10x8xf32>, vector<10x8xf32> -> vector<10x8xf32>
    %203 = vector.extract_strided_slice %183 {offsets = [0, 0], sizes = [8, 32], strides = [1, 1]} : vector<32x32xf32> to vector<8x32xf32>
    %cst_101 = arith.constant dense<0.000000e+00> : vector<10x32xf32>
    %204 = tpu.matmul %202, %203, %cst_101 {dimension_numbers = #tpu.dot_dimension_numbers<[1], [0], [0], [1], [0, 0, 1, 1], [], []>} : vector<10x8xf32>, vector<8x32xf32>, vector<10x32xf32> -> vector<10x32xf32>
    %205 = vector.broadcast %185 : vector<1x32xf32> to vector<10x32xf32>
    %206 = arith.addf %205, %204 : vector<10x32xf32>
    %207 = vector.extract_strided_slice %181 {offsets = [0, 8], sizes = [10, 8], strides = [1, 1]} : vector<10x96xf32> to vector<10x8xf32>
    %208 = vector.extract_strided_slice %181 {offsets = [0, 40], sizes = [10, 8], strides = [1, 1]} : vector<10x96xf32> to vector<10x8xf32>
    %209 = vector.extract_strided_slice %181 {offsets = [0, 72], sizes = [10, 8], strides = [1, 1]} : vector<10x96xf32> to vector<10x8xf32>
    %cst_102 = arith.constant dense<0.000000e+00> : vector<10x10xf32>
    %210 = tpu.matmul %207, %208, %cst_102 {dimension_numbers = #tpu.dot_dimension_numbers<[1], [1], [0], [0], [0, 0, 1, 0], [], []>} : vector<10x8xf32>, vector<10x8xf32>, vector<10x10xf32> -> vector<10x10xf32>
    %cst_103 = arith.constant 0.353553385 : f32
    %211 = vector.broadcast %cst_103 : f32 to vector<10x10xf32>
    %212 = arith.mulf %210, %211 : vector<10x10xf32>
    %213 = arith.addf %212, %5 : vector<10x10xf32>
    %cst_104 = arith.constant dense<0xFF800000> : vector<10xf32>
    %214 = vector.multi_reduction <maximumf>, %213, %cst_104 [1] : vector<10x10xf32> to vector<10xf32>
    %215 = vector.shape_cast %214 : vector<10xf32> to vector<10x1xf32>
    %216 = vector.broadcast %215 : vector<10x1xf32> to vector<10x10xf32>
    %217 = arith.subf %213, %216 : vector<10x10xf32>
    %218 = math.exp %217 : vector<10x10xf32>
    %cst_105 = arith.constant dense<0.000000e+00> : vector<10xf32>
    %219 = vector.multi_reduction <add>, %218, %cst_105 [1] : vector<10x10xf32> to vector<10xf32>
    %220 = vector.shape_cast %219 : vector<10xf32> to vector<10x1xf32>
    %221 = vector.broadcast %220 : vector<10x1xf32> to vector<10x10xf32>
    %222 = arith.divf %218, %221 : vector<10x10xf32>
    %cst_106 = arith.constant dense<0.000000e+00> : vector<10x8xf32>
    %223 = tpu.matmul %222, %209, %cst_106 {dimension_numbers = #tpu.dot_dimension_numbers<[1], [0], [0], [1], [0, 0, 1, 1], [], []>} : vector<10x10xf32>, vector<10x8xf32>, vector<10x8xf32> -> vector<10x8xf32>
    %224 = vector.extract_strided_slice %183 {offsets = [8, 0], sizes = [8, 32], strides = [1, 1]} : vector<32x32xf32> to vector<8x32xf32>
    %cst_107 = arith.constant dense<0.000000e+00> : vector<10x32xf32>
    %225 = tpu.matmul %223, %224, %cst_107 {dimension_numbers = #tpu.dot_dimension_numbers<[1], [0], [0], [1], [0, 0, 1, 1], [], []>} : vector<10x8xf32>, vector<8x32xf32>, vector<10x32xf32> -> vector<10x32xf32>
    %226 = arith.addf %206, %225 : vector<10x32xf32>
    %227 = vector.extract_strided_slice %181 {offsets = [0, 16], sizes = [10, 8], strides = [1, 1]} : vector<10x96xf32> to vector<10x8xf32>
    %228 = vector.extract_strided_slice %181 {offsets = [0, 48], sizes = [10, 8], strides = [1, 1]} : vector<10x96xf32> to vector<10x8xf32>
    %229 = vector.extract_strided_slice %181 {offsets = [0, 80], sizes = [10, 8], strides = [1, 1]} : vector<10x96xf32> to vector<10x8xf32>
    %cst_108 = arith.constant dense<0.000000e+00> : vector<10x10xf32>
    %230 = tpu.matmul %227, %228, %cst_108 {dimension_numbers = #tpu.dot_dimension_numbers<[1], [1], [0], [0], [0, 0, 1, 0], [], []>} : vector<10x8xf32>, vector<10x8xf32>, vector<10x10xf32> -> vector<10x10xf32>
    %cst_109 = arith.constant 0.353553385 : f32
    %231 = vector.broadcast %cst_109 : f32 to vector<10x10xf32>
    %232 = arith.mulf %230, %231 : vector<10x10xf32>
    %233 = arith.addf %232, %5 : vector<10x10xf32>
    %cst_110 = arith.constant dense<0xFF800000> : vector<10xf32>
    %234 = vector.multi_reduction <maximumf>, %233, %cst_110 [1] : vector<10x10xf32> to vector<10xf32>
    %235 = vector.shape_cast %234 : vector<10xf32> to vector<10x1xf32>
    %236 = vector.broadcast %235 : vector<10x1xf32> to vector<10x10xf32>
    %237 = arith.subf %233, %236 : vector<10x10xf32>
    %238 = math.exp %237 : vector<10x10xf32>
    %cst_111 = arith.constant dense<0.000000e+00> : vector<10xf32>
    %239 = vector.multi_reduction <add>, %238, %cst_111 [1] : vector<10x10xf32> to vector<10xf32>
    %240 = vector.shape_cast %239 : vector<10xf32> to vector<10x1xf32>
    %241 = vector.broadcast %240 : vector<10x1xf32> to vector<10x10xf32>
    %242 = arith.divf %238, %241 : vector<10x10xf32>
    %cst_112 = arith.constant dense<0.000000e+00> : vector<10x8xf32>
    %243 = tpu.matmul %242, %229, %cst_112 {dimension_numbers = #tpu.dot_dimension_numbers<[1], [0], [0], [1], [0, 0, 1, 1], [], []>} : vector<10x10xf32>, vector<10x8xf32>, vector<10x8xf32> -> vector<10x8xf32>
    %244 = vector.extract_strided_slice %183 {offsets = [16, 0], sizes = [8, 32], strides = [1, 1]} : vector<32x32xf32> to vector<8x32xf32>
    %cst_113 = arith.constant dense<0.000000e+00> : vector<10x32xf32>
    %245 = tpu.matmul %243, %244, %cst_113 {dimension_numbers = #tpu.dot_dimension_numbers<[1], [0], [0], [1], [0, 0, 1, 1], [], []>} : vector<10x8xf32>, vector<8x32xf32>, vector<10x32xf32> -> vector<10x32xf32>
    %246 = arith.addf %226, %245 : vector<10x32xf32>
    %247 = vector.extract_strided_slice %181 {offsets = [0, 24], sizes = [10, 8], strides = [1, 1]} : vector<10x96xf32> to vector<10x8xf32>
    %248 = vector.extract_strided_slice %181 {offsets = [0, 56], sizes = [10, 8], strides = [1, 1]} : vector<10x96xf32> to vector<10x8xf32>
    %249 = vector.extract_strided_slice %181 {offsets = [0, 88], sizes = [10, 8], strides = [1, 1]} : vector<10x96xf32> to vector<10x8xf32>
    %cst_114 = arith.constant dense<0.000000e+00> : vector<10x10xf32>
    %250 = tpu.matmul %247, %248, %cst_114 {dimension_numbers = #tpu.dot_dimension_numbers<[1], [1], [0], [0], [0, 0, 1, 0], [], []>} : vector<10x8xf32>, vector<10x8xf32>, vector<10x10xf32> -> vector<10x10xf32>
    %cst_115 = arith.constant 0.353553385 : f32
    %251 = vector.broadcast %cst_115 : f32 to vector<10x10xf32>
    %252 = arith.mulf %250, %251 : vector<10x10xf32>
    %253 = arith.addf %252, %5 : vector<10x10xf32>
    %cst_116 = arith.constant dense<0xFF800000> : vector<10xf32>
    %254 = vector.multi_reduction <maximumf>, %253, %cst_116 [1] : vector<10x10xf32> to vector<10xf32>
    %255 = vector.shape_cast %254 : vector<10xf32> to vector<10x1xf32>
    %256 = vector.broadcast %255 : vector<10x1xf32> to vector<10x10xf32>
    %257 = arith.subf %253, %256 : vector<10x10xf32>
    %258 = math.exp %257 : vector<10x10xf32>
    %cst_117 = arith.constant dense<0.000000e+00> : vector<10xf32>
    %259 = vector.multi_reduction <add>, %258, %cst_117 [1] : vector<10x10xf32> to vector<10xf32>
    %260 = vector.shape_cast %259 : vector<10xf32> to vector<10x1xf32>
    %261 = vector.broadcast %260 : vector<10x1xf32> to vector<10x10xf32>
    %262 = arith.divf %258, %261 : vector<10x10xf32>
    %cst_118 = arith.constant dense<0.000000e+00> : vector<10x8xf32>
    %263 = tpu.matmul %262, %249, %cst_118 {dimension_numbers = #tpu.dot_dimension_numbers<[1], [0], [0], [1], [0, 0, 1, 1], [], []>} : vector<10x10xf32>, vector<10x8xf32>, vector<10x8xf32> -> vector<10x8xf32>
    %264 = vector.extract_strided_slice %183 {offsets = [24, 0], sizes = [8, 32], strides = [1, 1]} : vector<32x32xf32> to vector<8x32xf32>
    %cst_119 = arith.constant dense<0.000000e+00> : vector<10x32xf32>
    %265 = tpu.matmul %263, %264, %cst_119 {dimension_numbers = #tpu.dot_dimension_numbers<[1], [0], [0], [1], [0, 0, 1, 1], [], []>} : vector<10x8xf32>, vector<8x32xf32>, vector<10x32xf32> -> vector<10x32xf32>
    %266 = arith.addf %246, %265 : vector<10x32xf32>
    %267 = arith.addf %174, %266 : vector<10x32xf32>
    %c1_120 = arith.constant 1 : index
    %c0_121 = arith.constant 0 : index
    %c0_122 = arith.constant 0 : index
    %268 = vector.load %arg9[%c1_120, %c0_121, %c0_122] : memref<2x1x32xf32, #tpu.memory_space<vmem>>, vector<1x1x32xf32>
    %269 = vector.shape_cast %268 : vector<1x1x32xf32> to vector<1x32xf32>
    %c1_123 = arith.constant 1 : index
    %c0_124 = arith.constant 0 : index
    %c0_125 = arith.constant 0 : index
    %270 = vector.load %arg10[%c1_123, %c0_124, %c0_125] : memref<2x1x32xf32, #tpu.memory_space<vmem>>, vector<1x1x32xf32>
    %271 = vector.shape_cast %270 : vector<1x1x32xf32> to vector<1x32xf32>
    %cst_126 = arith.constant dense<0.000000e+00> : vector<10xf32>
    %272 = vector.multi_reduction <add>, %267, %cst_126 [1] : vector<10x32xf32> to vector<10xf32>
    %273 = vector.shape_cast %272 : vector<10xf32> to vector<10x1xf32>
    %cst_127 = arith.constant 3.200000e+01 : f32
    %274 = vector.broadcast %cst_127 : f32 to vector<10x1xf32>
    %275 = arith.divf %273, %274 : vector<10x1xf32>
    %276 = vector.broadcast %275 : vector<10x1xf32> to vector<10x32xf32>
    %277 = arith.subf %267, %276 : vector<10x32xf32>
    %278 = arith.mulf %277, %277 : vector<10x32xf32>
    %cst_128 = arith.constant dense<0.000000e+00> : vector<10xf32>
    %279 = vector.multi_reduction <add>, %278, %cst_128 [1] : vector<10x32xf32> to vector<10xf32>
    %280 = vector.shape_cast %279 : vector<10xf32> to vector<10x1xf32>
    %cst_129 = arith.constant 3.200000e+01 : f32
    %281 = vector.broadcast %cst_129 : f32 to vector<10x1xf32>
    %282 = arith.divf %280, %281 : vector<10x1xf32>
    %cst_130 = arith.constant 9.99999996E-13 : f32
    %283 = vector.broadcast %cst_130 : f32 to vector<10x1xf32>
    %284 = arith.addf %282, %283 : vector<10x1xf32>
    %285 = math.rsqrt %284 : vector<10x1xf32>
    %286 = vector.broadcast %285 : vector<10x1xf32> to vector<10x32xf32>
    %287 = arith.mulf %277, %286 : vector<10x32xf32>
    %288 = vector.broadcast %269 : vector<1x32xf32> to vector<10x32xf32>
    %289 = arith.mulf %287, %288 : vector<10x32xf32>
    %290 = vector.broadcast %271 : vector<1x32xf32> to vector<10x32xf32>
    %291 = arith.addf %289, %290 : vector<10x32xf32>
    %c1_131 = arith.constant 1 : index
    %c0_132 = arith.constant 0 : index
    %c0_133 = arith.constant 0 : index
    %292 = vector.load %arg11[%c1_131, %c0_132, %c0_133] : memref<2x32x128xf32, #tpu.memory_space<vmem>>, vector<1x32x128xf32>
    %293 = vector.shape_cast %292 : vector<1x32x128xf32> to vector<32x128xf32>
    %cst_134 = arith.constant dense<0.000000e+00> : vector<10x128xf32>
    %294 = tpu.matmul %291, %293, %cst_134 {dimension_numbers = #tpu.dot_dimension_numbers<[1], [0], [0], [1], [0, 0, 1, 1], [], []>} : vector<10x32xf32>, vector<32x128xf32>, vector<10x128xf32> -> vector<10x128xf32>
    %c1_135 = arith.constant 1 : index
    %c0_136 = arith.constant 0 : index
    %c0_137 = arith.constant 0 : index
    %295 = vector.load %arg12[%c1_135, %c0_136, %c0_137] : memref<2x1x128xf32, #tpu.memory_space<vmem>>, vector<1x1x128xf32>
    %296 = vector.shape_cast %295 : vector<1x1x128xf32> to vector<1x128xf32>
    %297 = vector.broadcast %296 : vector<1x128xf32> to vector<10x128xf32>
    %298 = arith.addf %294, %297 : vector<10x128xf32>
    %cst_138 = arith.constant 5.000000e-01 : f32
    %299 = vector.broadcast %cst_138 : f32 to vector<10x128xf32>
    %300 = arith.mulf %299, %298 : vector<10x128xf32>
    %cst_139 = arith.constant 4.471500e-02 : f32
    %301 = vector.broadcast %cst_139 : f32 to vector<10x128xf32>
    %302 = arith.mulf %301, %298 : vector<10x128xf32>
    %303 = arith.mulf %302, %298 : vector<10x128xf32>
    %304 = arith.mulf %303, %298 : vector<10x128xf32>
    %305 = arith.addf %298, %304 : vector<10x128xf32>
    %cst_140 = arith.constant 0.797884583 : f32
    %306 = vector.broadcast %cst_140 : f32 to vector<10x128xf32>
    %307 = arith.mulf %306, %305 : vector<10x128xf32>
    %308 = math.tanh %307 : vector<10x128xf32>
    %cst_141 = arith.constant 1.000000e+00 : f32
    %309 = vector.broadcast %cst_141 : f32 to vector<10x128xf32>
    %310 = arith.addf %309, %308 : vector<10x128xf32>
    %311 = arith.mulf %300, %310 : vector<10x128xf32>
    %c1_142 = arith.constant 1 : index
    %c0_143 = arith.constant 0 : index
    %c0_144 = arith.constant 0 : index
    %312 = vector.load %arg13[%c1_142, %c0_143, %c0_144] : memref<2x128x32xf32, #tpu.memory_space<vmem>>, vector<1x128x32xf32>
    %313 = vector.shape_cast %312 : vector<1x128x32xf32> to vector<128x32xf32>
    %cst_145 = arith.constant dense<0.000000e+00> : vector<10x32xf32>
    %314 = tpu.matmul %311, %313, %cst_145 {dimension_numbers = #tpu.dot_dimension_numbers<[1], [0], [0], [1], [0, 0, 1, 1], [], []>} : vector<10x128xf32>, vector<128x32xf32>, vector<10x32xf32> -> vector<10x32xf32>
    %c1_146 = arith.constant 1 : index
    %c0_147 = arith.constant 0 : index
    %c0_148 = arith.constant 0 : index
    %315 = vector.load %arg14[%c1_146, %c0_147, %c0_148] : memref<2x1x32xf32, #tpu.memory_space<vmem>>, vector<1x1x32xf32>
    %316 = vector.shape_cast %315 : vector<1x1x32xf32> to vector<1x32xf32>
    %317 = vector.broadcast %316 : vector<1x32xf32> to vector<10x32xf32>
    %318 = arith.addf %314, %317 : vector<10x32xf32>
    %319 = arith.addf %291, %318 : vector<10x32xf32>
    %c1_149 = arith.constant 1 : index
    %c0_150 = arith.constant 0 : index
    %c0_151 = arith.constant 0 : index
    %320 = vector.load %arg15[%c1_149, %c0_150, %c0_151] : memref<2x1x32xf32, #tpu.memory_space<vmem>>, vector<1x1x32xf32>
    %321 = vector.shape_cast %320 : vector<1x1x32xf32> to vector<1x32xf32>
    %c1_152 = arith.constant 1 : index
    %c0_153 = arith.constant 0 : index
    %c0_154 = arith.constant 0 : index
    %322 = vector.load %arg16[%c1_152, %c0_153, %c0_154] : memref<2x1x32xf32, #tpu.memory_space<vmem>>, vector<1x1x32xf32>
    %323 = vector.shape_cast %322 : vector<1x1x32xf32> to vector<1x32xf32>
    %cst_155 = arith.constant dense<0.000000e+00> : vector<10xf32>
    %324 = vector.multi_reduction <add>, %319, %cst_155 [1] : vector<10x32xf32> to vector<10xf32>
    %325 = vector.shape_cast %324 : vector<10xf32> to vector<10x1xf32>
    %cst_156 = arith.constant 3.200000e+01 : f32
    %326 = vector.broadcast %cst_156 : f32 to vector<10x1xf32>
    %327 = arith.divf %325, %326 : vector<10x1xf32>
    %328 = vector.broadcast %327 : vector<10x1xf32> to vector<10x32xf32>
    %329 = arith.subf %319, %328 : vector<10x32xf32>
    %330 = arith.mulf %329, %329 : vector<10x32xf32>
    %cst_157 = arith.constant dense<0.000000e+00> : vector<10xf32>
    %331 = vector.multi_reduction <add>, %330, %cst_157 [1] : vector<10x32xf32> to vector<10xf32>
    %332 = vector.shape_cast %331 : vector<10xf32> to vector<10x1xf32>
    %cst_158 = arith.constant 3.200000e+01 : f32
    %333 = vector.broadcast %cst_158 : f32 to vector<10x1xf32>
    %334 = arith.divf %332, %333 : vector<10x1xf32>
    %cst_159 = arith.constant 9.99999996E-13 : f32
    %335 = vector.broadcast %cst_159 : f32 to vector<10x1xf32>
    %336 = arith.addf %334, %335 : vector<10x1xf32>
    %337 = math.rsqrt %336 : vector<10x1xf32>
    %338 = vector.broadcast %337 : vector<10x1xf32> to vector<10x32xf32>
    %339 = arith.mulf %329, %338 : vector<10x32xf32>
    %340 = vector.broadcast %321 : vector<1x32xf32> to vector<10x32xf32>
    %341 = arith.mulf %339, %340 : vector<10x32xf32>
    %342 = vector.broadcast %323 : vector<1x32xf32> to vector<10x32xf32>
    %343 = arith.addf %341, %342 : vector<10x32xf32>
    %c0_160 = arith.constant 0 : index
    %c0_161 = arith.constant 0 : index
    %344 = vector.load %arg4[%c0_160, %c0_161] : memref<2x10xf32, #tpu.memory_space<vmem>>, vector<2x10xf32>
    %cst_162 = arith.constant dense<0.000000e+00> : vector<2x32xf32>
    %345 = tpu.matmul %344, %343, %cst_162 {dimension_numbers = #tpu.dot_dimension_numbers<[1], [0], [0], [1], [0, 0, 1, 1], [], []>} : vector<2x10xf32>, vector<10x32xf32>, vector<2x32xf32> -> vector<2x32xf32>
    %c0_163 = arith.constant 0 : index
    %c0_164 = arith.constant 0 : index
    %346 = vector.load %arg17[%c0_163, %c0_164] : memref<32x32xf32, #tpu.memory_space<vmem>>, vector<32x32xf32>
    %cst_165 = arith.constant dense<0.000000e+00> : vector<2x32xf32>
    %347 = tpu.matmul %345, %346, %cst_165 {dimension_numbers = #tpu.dot_dimension_numbers<[1], [0], [0], [1], [0, 0, 1, 1], [], []>} : vector<2x32xf32>, vector<32x32xf32>, vector<2x32xf32> -> vector<2x32xf32>
    %c0_166 = arith.constant 0 : index
    %c0_167 = arith.constant 0 : index
    %348 = vector.load %arg18[%c0_166, %c0_167] : memref<1x32xf32, #tpu.memory_space<vmem>>, vector<1x32xf32>
    %349 = vector.broadcast %348 : vector<1x32xf32> to vector<2x32xf32>
    %350 = arith.addf %347, %349 : vector<2x32xf32>
    %351 = math.tanh %350 : vector<2x32xf32>
    %c0_168 = arith.constant 0 : index
    %c0_169 = arith.constant 0 : index
    %352 = vector.load %arg19[%c0_168, %c0_169] : memref<2x32xf32, #tpu.memory_space<vmem>>, vector<2x32xf32>
    %353 = arith.mulf %351, %352 : vector<2x32xf32>
    %c0_170 = arith.constant 0 : index
    %c0_171 = arith.constant 0 : index
    %354 = vector.load %arg20[%c0_170, %c0_171] : memref<32x8xf32, #tpu.memory_space<vmem>>, vector<32x8xf32>
    %cst_172 = arith.constant dense<0.000000e+00> : vector<2x8xf32>
    %355 = tpu.matmul %353, %354, %cst_172 {dimension_numbers = #tpu.dot_dimension_numbers<[1], [0], [0], [1], [0, 0, 1, 1], [], []>} : vector<2x32xf32>, vector<32x8xf32>, vector<2x8xf32> -> vector<2x8xf32>
    %c0_173 = arith.constant 0 : index
    %c0_174 = arith.constant 0 : index
    %356 = vector.load %arg21[%c0_173, %c0_174] : memref<1x8xf32, #tpu.memory_space<vmem>>, vector<1x8xf32>
    %357 = vector.broadcast %356 : vector<1x8xf32> to vector<2x8xf32>
    %358 = arith.addf %355, %357 : vector<2x8xf32>
    %c0_175 = arith.constant 0 : index
    %c0_176 = arith.constant 0 : index
    %359 = vector.load %arg22[%c0_175, %c0_176] : memref<2x8xf32, #tpu.memory_space<vmem>>, vector<2x8xf32>
    tpu.vector_store %arg22[%c0_175, %c0_176], %358 {strides = array<i32>} : memref<2x8xf32, #tpu.memory_space<vmem>>, vector<2x8xf32>,
    return
  }
}

</mosaic_0001>

<bundles_post_ra>
// kernel: combined_model_forward.3
= control target key start
LH: loop header
LB: loop body
LE: loop exit
PB: predicated region body
PF: predicated region fallthrough
CT: control target
= control target key end

     0   :  { %vm72_vm0 = vcmask 1041408   ;;  %vm24_vm1 = vcmask 523264   ;;  %vm65_vm2 = vcmask 539648   ;;  %vm103_vm3 = vcmask 130048   ;;  %s219_s1 = inlined_call_operand.vmem [shape: f32[64,66], index: 1, kind: input, shape index: {}]   ;;  %s220_s2 = inlined_call_operand.vmem [shape: f32[66,16], index: 2, kind: input, shape index: {}]   ;;  %s221_s0 = inlined_call_operand.vmem [shape: f32[16,64], index: 0, kind: input, shape index: {}]   ;;  %s222_s3 = inlined_call_operand.vmem [shape: f32[16,16], index: 3, kind: output, shape index: {}]  }
   0x1   :  { %v23_v0 = vld [vmem:[%s219_s1 + $0x38] sm:$0xff]  ;;  %v22_v1 = vld [vmem:[%s219_s1 + $0x30] sm:$0xff]  ;;  %v21_v2 = vld [vmem:[%s219_s1 + $0x28] sm:$0xff] }
   0x2   :  { %115 = vmatpush.msra.mxu3 %v23_v0  ;;  %39 = vmatpush.msra.mxu0 %v23_v0  ;;  %v64_v3 = vld [vmem:[%s220_s2 + $0x40] sm:$0x3]  ;;  %v63_v4 = vld [vmem:[%s220_s2 + $0x38] sm:$0xff]  ;;  %v62_v6 = vld [vmem:[%s220_s2 + $0x30] sm:$0xff] }
   0x3   :  { %v20_v5 = vld [vmem:[%s219_s1 + $0x20] sm:$0xff]  ;;  %123 = vmatpush.msk.msra.mxu2 %vm72_vm0, %v64_v3  ;;  %112 = vmatpush.msk.msra.mxu1 %vm72_vm0, %v64_v3  ;;  %v19_v7 = vld [vmem:[%s219_s1 + $0x18] sm:$0xff]  ;;  %v61_v8 = vld [vmem:[%s220_s2 + $0x28] sm:$0xff] }
   0x4   :  { %116 = vmatpush.msra.mxu3 %v22_v1  ;;  %40 = vmatpush.msra.mxu0 %v22_v1  ;;  %v18_v9 = vld [vmem:[%s219_s1 + $0x10] sm:$0xff]  ;;  %v60_v10 = vld [vmem:[%s220_s2 + $0x20] sm:$0xff]  ;;  %v17_v11 = vld [vmem:[%s219_s1 + $0x8] sm:$0xff] }
   0x5   :  { %124 = vmatpush.msra.mxu2 %v63_v4  ;;  %84 = vmatpush.msra.mxu1 %v63_v4  ;;  %v59_v12 = vld [vmem:[%s220_s2 + $0x18] sm:$0xff]  ;;  %v16_v13 = vld [vmem:[%s219_s1] sm:$0xff]  ;;  %v15_v14 = vld [vmem:[%s221_s0 + $0x8] sm:$0xff] }
   0x6   :  { %117 = vmatpush.msra.mxu3 %v21_v2  ;;  %41 = vmatpush.msra.mxu0 %v21_v2  ;;  %v14_v15 = vld [vmem:[%s221_s0] sm:$0xff]  ;;  %v58_v16 = vld [vmem:[%s220_s2 + $0x10] sm:$0xff]  ;;  %v57_v17 = vld [vmem:[%s220_s2 + $0x8] sm:$0xff] }
   0x7   :  { %125 = vmatpush.msra.mxu2 %v62_v6  ;;  %85 = vmatpush.msra.mxu1 %v62_v6  ;;  %v56_v18 = vld [vmem:[%s220_s2] sm:$0xff] }
   0x8   :  { %118 = vmatpush.msra.mxu3 %v20_v5  ;;  %42 = vmatpush.msra.mxu0 %v20_v5 }
   0x9   :  { %126 = vmatpush.msra.mxu2 %v61_v8  ;;  %86 = vmatpush.msra.mxu1 %v61_v8 }
   0xa   :  { %119 = vmatpush.msra.mxu3 %v19_v7  ;;  %43 = vmatpush.msra.mxu0 %v19_v7 }
   0xb   :  { %127 = vmatpush.msra.mxu2 %v60_v10  ;;  %87 = vmatpush.msra.mxu1 %v60_v10 }
   0xc   :  { %120 = vmatpush.msra.mxu3 %v18_v9  ;;  %44 = vmatpush.msra.mxu0 %v18_v9 }
   0xd   :  { %128 = vmatpush.msra.mxu2 %v59_v12  ;;  %88 = vmatpush.msra.mxu1 %v59_v12 }
   0xe   :  { %121 = vmatpush.msra.mxu3 %v17_v11  ;;  %45 = vmatpush.msra.mxu0 %v17_v11 }
   0xf   :  { %129 = vmatpush.msra.mxu2 %v58_v16  ;;  %89 = vmatpush.msra.mxu1 %v58_v16 }
  0x10   :  { %122 = vmatpush.msra.mxu3 %v16_v13  ;;  %46 = vmatpush.msra.mxu0 %v16_v13 }
  0x11   :  { %111 = vmatmul.msk.f32.vlgmr.msra.gmra.mxu3 %vm24_vm1, %v15_v14  ;;  %110 = vmatmul.msk.f32.vlgmr.msra.gmra.mxu0 %vm24_vm1, %v14_v15 }
  0x12   :  { %130 = vmatpush.msra.mxu2 %v57_v17  ;;  %90 = vmatpush.msra.mxu1 %v57_v17 }
  0x14   :  { %131 = vmatpush.msra.mxu2 %v56_v18  ;;  %91 = vmatpush.msra.mxu1 %v56_v18 }
  0x8e   :  { %v48_v19 = vpop.f32.mrf.mxu0 }
  0x8f   :  { %v54_v20 = vmul.f32 %v48_v19, %v48_v19 }
  0x91   :  { %113 = vmatmul.msk.f32.vlgmr.msra.gmra.mxu1 %vm65_vm2, %v54_v20 }
  0x94   :  { %v51_v21 = vpop.f32.mrf.mxu3 }
  0x95   :  { %v55_v22 = vmul.f32 %v51_v21, %v51_v21 }
  0x97   :  { %114 = vmatmul.msk.f32.vlgmr.msra.gmra.mxu2 %vm65_vm2, %v55_v22 }
 0x10e   :  { %v93_v23 = vpop.f32.mrf.mxu1 }
 0x10f   :  { %v94_v24 = vadd.f32 1e-10, %v93_v23 }
 0x111   :  { %132 = vlog2.f32 %v94_v24 }
 0x117   :  { %v133_v25 = vpop.eup %132 }
 0x118   :  { %v100_v26 = vmul.f32 0.6931472, %v133_v25 }
 0x11a   :  { %104 = vst.msk [vmem:[%s222_s3] sm:$0xff] %vm103_vm3, %v100_v26  ;;  %v96_v27 = vpop.f32.mrf.mxu2 }
 0x11b   :  { %v97_v28 = vadd.f32 1e-10, %v96_v27 }
 0x11d   :  { %134 = vlog2.f32 %v97_v28 }
 0x123   :  { %v135_v29 = vpop.eup %134 }
 0x124   :  { %v102_v30 = vmul.f32 0.6931472, %v135_v29 }
 0x126   :  { %105 = vst.msk [vmem:[%s222_s3 + $0x8] sm:$0xff] %vm103_vm3, %v102_v30 }

// kernel: eq.15
= control target key start
LH: loop header
LB: loop body
LE: loop exit
PB: predicated region body
PF: predicated region fallthrough
CT: control target
= control target key end

     0   :  { %vm7_vm0 = vcmask 39936   ;;  %vm13_vm1 = vcmask 80936   ;;  %s39_s0 = inlined_call_operand.vmem [shape: s32[2,5], index: 0, kind: input, shape index: {}]   ;;  %s40_s1 = inlined_call_operand.vmem [shape: s32[10], index: 1, kind: output, shape index: {}]  }
   0x1   :  { %v4_v0 = vld [vmem:[%s39_s0] sm:$0x3]  ;;  %s22_s0 = smov 5  }
   0x2   :  { %5 = vst [vmem:[#allocation1] sm:$0x3] %v4_v0 }
   0x9   :  { %v10_v1 = vld [vmem:[#allocation1 + $0x1] sm:$0x1]   ;;  %v6_v2 = vld [vmem:[#allocation1] sm:$0x1]  }
   0xa   :  { %11 = vrot.lane.b32.xlu0 %v10_v1, %s22_s0  ;;  %8 = vst.msk [vmem:[#allocation0] sm:$0x1] %vm7_vm0, %v6_v2  }
  0x7c   :  { %v12_v3 = vpop.permute.xlu0 %11  }
  0x7d   :  { %14 = vst.msk [vmem:[#allocation0] sm:$0x1] %vm13_vm1, %v12_v3  }
  0x84   :  { %v17_v4 = vld [vmem:[#allocation0] sm:$0x1] }
  0x85   :  { %20 = vst [vmem:[%s40_s1] sm:$0x1] %v17_v4 }

// kernel: combined_model_forward.4
= control target key start
LH: loop header
LB: loop body
LE: loop exit
PB: predicated region body
PF: predicated region fallthrough
CT: control target
= control target key end

     0   :  { %vm53_vm0 = vcmask 1040384   ;;  %vm28_vm1 = vcmask 72704   ;;  %vm106_vm2 = vcmask 130048   ;;  %s228_s1 = inlined_call_operand.vmem [shape: f32[9,16], index: 1, kind: input, shape index: {}]   ;;  %s229_s0 = inlined_call_operand.vmem [shape: f32[64,9], index: 0, kind: input, shape index: {}]   ;;  %s230_s2 = inlined_call_operand.vmem [shape: f32[1,16], index: 2, kind: input, shape index: {}]   ;;  %s231_s3 = inlined_call_operand.vmem [shape: f32[64,16], index: 3, kind: output, shape index: {}]  }
   0x1   :  { %v23_v0 = vld [vmem:[%s228_s1 + $0x8] sm:$0x1]  ;;  %v22_v1 = vld [vmem:[%s228_s1] sm:$0xff]  ;;  %v20_v3 = vld [vmem:[%s229_s0 + $0x30] sm:$0xff] }
   0x2   :  { %129 = vmatpush.msk.msra.mxu2 %vm53_vm0, %v23_v0  ;;  %130 = vmatpush.msk.msra.mxu3 %vm53_vm0, %v23_v0  ;;  %v18_v2 = vld [vmem:[%s229_s0 + $0x20] sm:$0xff]  ;;  %v16_v5 = vld [vmem:[%s229_s0 + $0x10] sm:$0xff]  ;;  %v19_v6 = vld [vmem:[%s229_s0 + $0x28] sm:$0xff] }
   0x3   :  { %119 = vmatpush.msk.msra.mxu0 %vm53_vm0, %v23_v0  ;;  %128 = vmatpush.msk.msra.mxu1 %vm53_vm0, %v23_v0  ;;  %v14_v4 = vld [vmem:[%s229_s0] sm:$0xff]  ;;  %v21_v7 = vld [vmem:[%s229_s0 + $0x38] sm:$0xff]  ;;  %v15_v8 = vld [vmem:[%s229_s0 + $0x8] sm:$0xff] }
   0x4   :  { %132 = vmatpush.msra.mxu2 %v22_v1  ;;  %133 = vmatpush.msra.mxu3 %v22_v1  ;;  %v17_v9 = vld [vmem:[%s229_s0 + $0x18] sm:$0xff]  ;;  %v134_v10 = vld [vmem:[%s230_s2] ss:$0 sm:$0xff] }
   0x5   :  { %124 = vmatmul.msk.f32.vlgmr.msra.gmra.mxu2 %vm28_vm1, %v18_v2  ;;  %126 = vmatmul.msk.f32.vlgmr.msra.gmra.mxu3 %vm28_vm1, %v20_v3 }
   0x6   :  { %72 = vmatpush.msra.mxu0 %v22_v1  ;;  %131 = vmatpush.msra.mxu1 %v22_v1 }
   0x7   :  { %120 = vmatmul.msk.f32.vlgmr.msra.gmra.mxu0 %vm28_vm1, %v14_v4  ;;  %122 = vmatmul.msk.f32.vlgmr.msra.gmra.mxu1 %vm28_vm1, %v16_v5 }
   0xd   :  { %125 = vmatmul.msk.f32.gmra.mxu2 %vm28_vm1, %v19_v6  ;;  %127 = vmatmul.msk.f32.gmra.mxu3 %vm28_vm1, %v21_v7 }
   0xf   :  { %121 = vmatmul.msk.f32.gmra.mxu0 %vm28_vm1, %v15_v8  ;;  %123 = vmatmul.msk.f32.gmra.mxu1 %vm28_vm1, %v17_v9 }
  0x84   :  { %v74_v11 = vpop.f32.mrf.mxu0  ;;  %v80_v12 = vpop.f32.mrf.mxu1 }
  0x85   :  { %v75_v13 = vadd.f32 %v134_v10, %v74_v11  ;;  %v81_v14 = vadd.f32 %v134_v10, %v80_v12 }
  0x87   :  { %v98_v15 = vmax.f32 %v75_v13, 0.0  ;;  %v100_v16 = vmax.f32 %v81_v14, 0.0 }
  0x88   :  { %v86_v17 = vpop.f32.mrf.mxu2  ;;  %v92_v18 = vpop.f32.mrf.mxu3 }
  0x89   :  { %107 = vst.msk [vmem:[%s231_s3] sm:$0xff] %vm106_vm2, %v98_v15  ;;  %v87_v19 = vadd.f32 %v134_v10, %v86_v17  ;;  %v93_v20 = vadd.f32 %v134_v10, %v92_v18 }
  0x8a   :  { %109 = vst.msk [vmem:[%s231_s3 + $0x10] sm:$0xff] %vm106_vm2, %v100_v16 }
  0x8b   :  { %v102_v21 = vmax.f32 %v87_v19, 0.0  ;;  %v104_v22 = vmax.f32 %v93_v20, 0.0 }
  0x8c   :  { %v77_v23 = vpop.f32.mrf.mxu0  ;;  %v83_v24 = vpop.f32.mrf.mxu1 }
  0x8d   :  { %111 = vst.msk [vmem:[%s231_s3 + $0x20] sm:$0xff] %vm106_vm2, %v102_v21  ;;  %v78_v25 = vadd.f32 %v134_v10, %v77_v23  ;;  %v84_v26 = vadd.f32 %v134_v10, %v83_v24 }
  0x8e   :  { %113 = vst.msk [vmem:[%s231_s3 + $0x30] sm:$0xff] %vm106_vm2, %v104_v22 }
  0x8f   :  { %v99_v27 = vmax.f32 %v78_v25, 0.0  ;;  %v101_v28 = vmax.f32 %v84_v26, 0.0 }
  0x90   :  { %v89_v29 = vpop.f32.mrf.mxu2  ;;  %v95_v30 = vpop.f32.mrf.mxu3 }
  0x91   :  { %108 = vst.msk [vmem:[%s231_s3 + $0x8] sm:$0xff] %vm106_vm2, %v99_v27  ;;  %v90_v31 = vadd.f32 %v134_v10, %v89_v29  ;;  %v96_v32 = vadd.f32 %v134_v10, %v95_v30 }
  0x92   :  { %110 = vst.msk [vmem:[%s231_s3 + $0x18] sm:$0xff] %vm106_vm2, %v101_v28 }
  0x93   :  { %v103_v33 = vmax.f32 %v90_v31, 0.0  ;;  %v105_v34 = vmax.f32 %v96_v32, 0.0 }
  0x95   :  { %112 = vst.msk [vmem:[%s231_s3 + $0x28] sm:$0xff] %vm106_vm2, %v103_v33 }
  0x96   :  { %114 = vst.msk [vmem:[%s231_s3 + $0x38] sm:$0xff] %vm106_vm2, %v105_v34 }

// kernel: combined_model_forward.5
= control target key start
LH: loop header
LB: loop body
LE: loop exit
PB: predicated region body
PF: predicated region fallthrough
CT: control target
= control target key end

     0   :  { %s3115_s0 = inlined_call_operand.vmem [shape: f32[10,128], index: 0, kind: input, shape index: {}]   ;;  %s3116_s1 = inlined_call_operand.vmem [shape: f32[10,32], index: 1, kind: input, shape index: {}]   ;;  %s3117_s2 = inlined_call_operand.vmem [shape: f32[128,32], index: 2, kind: input, shape index: {}]   ;;  %s3118_s3 = inlined_call_operand.vmem [shape: f32[10,10], index: 3, kind: input, shape index: {}]   ;;  %s3119_s4 = inlined_call_operand.vmem [shape: f32[2,10], index: 4, kind: input, shape index: {}]   ;;  %s3120_s5 = inlined_call_operand.vmem [shape: f32[2,32,96], index: 5, kind: input, shape index: {}]   ;;  %s3121_s6 = inlined_call_operand.vmem [shape: f32[2,1,96], index: 6, kind: input, shape index: {}]   ;;  %s3122_s7 = inlined_call_operand.vmem [shape: f32[2,32,32], index: 7, kind: input, shape index: {}]   ;;  %s3123_s8 = inlined_call_operand.vmem [shape: f32[2,1,32], index: 8, kind: input, shape index: {}]   ;;  %s3124_s9 = inlined_call_operand.vmem [shape: f32[2,1,32], index: 9, kind: input, shape index: {}]   ;;  %s3125_s10 = inlined_call_operand.vmem [shape: f32[2,1,32], index: 10, kind: input, shape index: {}]   ;;  %s3126_s11 = inlined_call_operand.vmem [shape: f32[2,32,128], index: 11, kind: input, shape index: {}]   ;;  %s3127_s12 = inlined_call_operand.vmem [shape: f32[2,1,128], index: 12, kind: input, shape index: {}]   ;;  %s3128_s13 = inlined_call_operand.vmem [shape: f32[2,128,32], index: 13, kind: input, shape index: {}]   ;;  %s3129_s14 = inlined_call_operand.vmem [shape: f32[2,1,32], index: 14, kind: input, shape index: {}]   ;;  %s3130_s15 = inlined_call_operand.vmem [shape: f32[2,1,32], index: 15, kind: input, shape index: {}]   ;;  %s3131_s16 = inlined_call_operand.vmem [shape: f32[2,1,32], index: 16, kind: input, shape index: {}]   ;;  %s3132_s17 = inlined_call_operand.vmem [shape: f32[32,32], index: 17, kind: input, shape index: {}]   ;;  %s3133_s18 = inlined_call_operand.vmem [shape: f32[1,32], index: 18, kind: input, shape index: {}]   ;;  %s3134_s19 = inlined_call_operand.vmem [shape: f32[2,32], index: 19, kind: input, shape index: {}]   ;;  %s3135_s20 = inlined_call_operand.vmem [shape: f32[32,8], index: 20, kind: input, shape index: {}]   ;;  %s3136_s21 = inlined_call_operand.vmem [shape: f32[1,8], index: 21, kind: input, shape index: {}]   ;;  %s3137_s22 = inlined_call_operand.hbm [shape: f32[2,8], index: 22, kind: output, shape index: {}]  }
   0x1   :  { %3162 = sst [smem:[#allocation5_spill]] %s3115_s0 }
   0x2   :  { %3163 = sst [smem:[#allocation6_spill]] %s3116_s1 }
   0x3   :  { %3164 = sst [smem:[#allocation7_spill]] %s3117_s2 }
   0x4   :  { %3165 = sst [smem:[#allocation8_spill]] %s3118_s3 }
   0x5   :  { %3166 = sst [smem:[#allocation9_spill]] %s3119_s4 }
   0x6   :  { %3167 = sst [smem:[#allocation10_spill]] %s3120_s5 }
   0x7   :  { %3168 = sst [smem:[#allocation11_spill]] %s3121_s6 }
   0x8   :  { %s3169_s29 = sld [smem:[#allocation7_spill]] }
   0x9   :  { %s3170_s30 = sld [smem:[#allocation10_spill]] }
   0xe   :  { %v89_v0 = vld [vmem:[%s3169_s29 + $0x78] sm:$0xff]  ;;  %v88_v1 = vld [vmem:[%s3169_s29 + $0x70] sm:$0xff]  ;;  %v87_v2 = vld [vmem:[%s3169_s29 + $0x68] sm:$0xff] }
   0xf   :  { %92 = vmatpush.msra.mxu0 %v89_v0  ;;  %v86_v3 = vld [vmem:[%s3169_s29 + $0x60] sm:$0xff]  ;;  %v85_v4 = vld [vmem:[%s3169_s29 + $0x58] sm:$0xff]  ;;  %v84_v5 = vld [vmem:[%s3169_s29 + $0x50] sm:$0xff] }
  0x10   :  { %v83_v6 = vld [vmem:[%s3169_s29 + $0x48] sm:$0xff]  ;;  %v120_v7 = vld [vmem:[%s3170_s30 + $0x18] sm:$0xff]  ;;  %v119_v8 = vld [vmem:[%s3170_s30 + $0x10] sm:$0xff] }
  0x11   :  { %93 = vmatpush.msra.mxu0 %v88_v1  ;;  %144 = vmatpush.msra.mxu1 %v120_v7  ;;  %v82_v9 = vld [vmem:[%s3169_s29 + $0x40] sm:$0xff] }
  0x13   :  { %94 = vmatpush.msra.mxu0 %v87_v2  ;;  %145 = vmatpush.msra.mxu1 %v119_v8 }
  0x15   :  { %95 = vmatpush.msra.mxu0 %v86_v3 }
  0x17   :  { %96 = vmatpush.msra.mxu0 %v85_v4 }
  0x19   :  { %97 = vmatpush.msra.mxu0 %v84_v5 }
  0x1b   :  { %98 = vmatpush.msra.mxu0 %v83_v6 }
  0x1c   :  { %27 = vsyncpa [#allocation3], 0  ;;  %v81_v10 = vld [vmem:[%s3169_s29 + $0x38] sm:$0xff]  ;;  %v80_v11 = vld [vmem:[%s3169_s29 + $0x30] sm:$0xff]  ;;  %s3171_s2 = sld [smem:[#allocation5_spill]]  ;;  %vm125_vm0 = vcmask 261120  }
  0x1d   :  { %99 = vmatpush.msra.mxu0 %v82_v9  ;;  %v79_v12 = vld [vmem:[%s3169_s29 + $0x28] sm:$0xff]  ;;  %v78_v13 = vld [vmem:[%s3169_s29 + $0x20] sm:$0xff]  ;;  %v77_v14 = vld [vmem:[%s3169_s29 + $0x18] sm:$0xff]  ;;  %s3172_s5 = sld [smem:[#allocation6_spill]]  ;;  %s3158_s27 = smov 64   ;;  %vm263_vm1 = vcmask 1041408  }
  0x1e   :  { %v76_v15 = vld [vmem:[%s3169_s29 + $0x10] sm:$0xff]  ;;  %v75_v16 = vld [vmem:[%s3169_s29 + $0x8] sm:$0xff]  ;;  %v74_v17 = vld [vmem:[%s3169_s29] sm:$0xff]  ;;  %s2304_s3 = smov 96   ;;  %s2305_s28 = smov 120   ;;  %vm166_vm2 = vcmask 64512  }
  0x1f   :  { %100 = vmatpush.msra.mxu0 %v81_v10  ;;  %v118_v20 = vld [vmem:[%s3170_s30 + $0x8] sm:$0xff]  ;;  %v117_v21 = vld [vmem:[%s3170_s30] sm:$0xff]  ;;  %s3160_s4 = smov 88   ;;  %s3174_s29 = sld [smem:[#allocation8_spill]]  ;;  %vm202_vm3 = vcmask 80896   ;;  %vm206_vm4 = vcmask 74752  }
  0x20   :  { %146 = vmatpush.msra.mxu1 %v118_v20  ;;  %s3154_s25 = smov 72   ;;  %s3148_s26 = smov 104  }
  0x21   :  { %101 = vmatpush.msra.mxu0 %v80_v11  ;;  %s3156_s1 = smov 56   ;;  %s3150_s24 = smov 112  }
  0x22   :  { %v72_v18 = vld [vmem:[%s3171_s2] sm:$0xff]  ;;  %v73_v19 = vld [vmem:[%s3171_s2 + $0x8] sm:$0x3]  ;;  %147 = vmatpush.msra.mxu1 %v117_v21  ;;  %s3173_s2 = sld [smem:[#allocation11_spill]]  ;;  %s3144_s6 = smov 48  }
  0x23   :  { %102 = vmatpush.msra.mxu0 %v79_v12  ;;  %v90_v22 = vld [vmem:[%s3172_s5] sm:$0xff]  ;;  %v91_v25 = vld [vmem:[%s3172_s5 + $0x8] sm:$0x3]  ;;  %s3152_s5 = smov 80   ;;  %s3146_s0 = smov 40  }
  0x24   :  { %v155_v21 = vld [vmem:[%s3122_s7] sm:$0xff]  ;;  %s3179_s23 = smov 80  }
  0x25   :  { %103 = vmatpush.msra.mxu0 %v78_v13  ;;  %v2544_v39 = vld [vmem:[%s3174_s29] sm:$0xff]  ;;  %v2551_v44 = vld [vmem:[%s3174_s29 + $0x8] sm:$0x3]  ;;  %310 = vmatpush.msra.mxu3 %v155_v21 }
  0x27   :  { %104 = vmatpush.msra.mxu0 %v77_v14 }
  0x28   :  { %v2165_v29 = vld [vmem:[%s3173_s2] ss:$0 sm:$0xff] }
  0x29   :  { %105 = vmatpush.msra.mxu0 %v76_v15 }
  0x2b   :  { %106 = vmatpush.msra.mxu0 %v75_v16 }
  0x2d   :  { %107 = vmatpush.msra.mxu0 %v74_v17 }
  0x2e   :  { %108 = vmatmul.f32.vlgmr.msra.gmra.mxu0 %v72_v18 }
  0x36   :  { %111 = vmatmul.f32.gmra.mxu0 %v73_v19 }
  0xab   :  { %v109_v23 = vpop.f32.mrf.mxu0 }
  0xac   :  { %v2500_v24 = vadd.f32 %v109_v23, %v90_v22 }
  0xae   :  { %2030 = vmatmul.msk.f32.vlgmr.msra.gmra.mxu1 %vm125_vm0, %v2500_v24 }
  0xb3   :  { %v112_v26 = vpop.f32.mrf.mxu0 }
  0xb4   :  { %v2507_v27 = vadd.f32 %v112_v26, %v91_v25 }
  0xb6   :  { %2031 = vmatmul.msk.f32.gmra.mxu1 %vm125_vm0, %v2507_v27 }
 0x12b   :  { %v149_v28 = vpop.f32.mrf.mxu1 }
 0x12c   :  { %v2520_v32 = vadd.f32 %v2165_v29, %v149_v28 }
 0x133   :  { %v152_v30 = vpop.f32.mrf.mxu1 }
 0x134   :  { %v2514_v31 = vadd.f32 %v2165_v29, %v152_v30 }
 0x136   :  { %254 = vrot.lane.b32.xlu2 %v2514_v31, %s3158_s27  ;;  %164 = vrot.lane.b32.xlu0 %v2514_v31, %s2304_s3 }
 0x13e   :  { %252 = vrot.lane.b32.xlu2 %v2520_v32, %s3158_s27  ;;  %162 = vrot.lane.b32.xlu0 %v2520_v32, %s2304_s3 }
 0x146   :  { %323 = vrot.lane.b32.xlu2 %v2520_v32, %s2305_s28  ;;  %329 = vrot.lane.b32.xlu0 %v2514_v31, %s3160_s4 }
 0x14e   :  { %325 = vrot.lane.b32.xlu0 %v2514_v31, %s2305_s28 }
 0x190   :  { %v255_v33 = vpop.permute.xlu2 %254 }
 0x191   :  { %2036 = vmatpush.msk.msrb.mxu1 %vm263_vm1, %v255_v33 }
 0x198   :  { %v253_v34 = vpop.permute.xlu2 %252 }
 0x199   :  { %281 = vmatpush.msrb.mxu1 %v253_v34 }
 0x1a0   :  { %v324_v48 = vpop.permute.xlu2 %323 }
 0x1a8   :  { %v165_v35 = vpop.permute.xlu0 %164 }
 0x1a9   :  { %2032 = vmatpush.xpose.msk.msra.mxu2 %vm166_vm2, %v165_v35 }
 0x1b0   :  { %v163_v36 = vpop.permute.xlu0 %162 }
 0x1b1   :  { %2033 = vmatpush.xpose.msk.msra.mxu2 %vm166_vm2, %v163_v36  ;;  %v156_v36 = vld [vmem:[%s3122_s7 + $0x8] sm:$0xff] }
 0x1b2   :  { %471 = vmatpush.msrb.mxu3 %v156_v36 }
 0x1b4   :  { %2034 = vmatmul.msk.f32.vlgmr.msra.gmra.mxu2 %vm166_vm2, %v2520_v32 }
 0x1b5   :  { %2150 = vmatpush.msk.msrb.mxu2 %vm263_vm1, %v255_v33 }
 0x1b7   :  { %2151 = vmatpush.msrb.mxu2 %v253_v34 }
 0x1b8   :  { %v330_v37 = vpop.permute.xlu0 %329 }
 0x1b9   :  { %2041 = vmatpush.xpose.msk.msra.mxu1 %vm166_vm2, %v330_v37 }
 0x1bc   :  { %2035 = vmatmul.msk.f32.gmra.mxu2 %vm166_vm2, %v2514_v31 }
 0x1c0   :  { %v326_v20 = vpop.permute.xlu0 %325 }
 0x237   :  { %v192_v38 = vpop.f32.mrf.mxu2 }
 0x238   :  { %v198_v40 = vmul.f32 0.35355338, %v192_v38 }
 0x23a   :  { %v200_v41 = vadd.f32 %v198_v40, %v2544_v39 }
 0x23c   :  { %v203_v42 = vsel %vm202_vm3, %v200_v41, -inf }
 0x23d   :  { %204 = vmax.xlane.f32.xlu1 %v203_v42 }
 0x23f   :  { %v195_v43 = vpop.f32.mrf.mxu2 }
 0x240   :  { %v199_v45 = vmul.f32 0.35355338, %v195_v43 }
 0x242   :  { %v201_v46 = vadd.f32 %v199_v45, %v2551_v44 }
 0x244   :  { %v207_v47 = vsel %vm206_vm4, %v201_v46, -inf }
 0x245   :  { %208 = vmax.xlane.f32.xlu2 %v207_v47 }
 0x2b0   :  { %v205_v49 = vpop.xlane.xlu1 %204 }
 0x2b1   :  { %v210_v50 = vsub.f32 %v200_v41, %v205_v49 }
 0x2b3   :  { %v212_v51 = vmul.f32 1.442695, %v210_v50 }
 0x2b5   :  { %2183 = vpow2.f32 %v212_v51 }
 0x2b8   :  { %v209_v52 = vpop.xlane.xlu2 %208 }
 0x2b9   :  { %v211_v53 = vsub.f32 %v201_v46, %v209_v52 }
 0x2bb   :  { %v2184_v54 = vpop.eup %2183  ;;  %v214_v55 = vmul.f32 1.442695, %v211_v53 }
 0x2bc   :  { %v216_v56 = vsel %vm202_vm3, %v2184_v54, 0.0 }
 0x2bd   :  { %2185 = vpow2.f32 %v214_v55  ;;  %217 = vadd.xlane.f32.xlu1 %v216_v56 }
 0x2c3   :  { %v2186_v57 = vpop.eup %2185 }
 0x2c4   :  { %v219_v58 = vsel %vm206_vm4, %v2186_v57, 0.0 }
 0x2c5   :  { %220 = vadd.xlane.f32.xlu2 %v219_v58 }
 0x2d6   :  { %327 = vrot.lane.b32.xlu1 %v2520_v32, %s3160_s4 }
 0x330   :  { %v218_v59 = vpop.xlane.xlu1 %217 }
 0x331   :  { %2187 = vrcp.f32 %v218_v59  ;;  %v233_v0 = vand.u32 2147483648, %v218_v59  ;;  %v231_v2 = vand.u32 2147483647, %v218_v59  ;;  %vm227_vm6 = vweird.f32 %v218_v59 }
 0x333   :  { %v234_v5 = vor.u32 1.1754944e-38, %v233_v0  ;;  %vm232_vm8 = vcmp.eq.f32.partialorder %v231_v2, 8.507059e+37 }
 0x337   :  { %v2188_v60 = vpop.eup %2187 }
 0x338   :  { %v223_v61 = vmul.f32 %v2188_v60, %v218_v59  ;;  %v221_v62 = vpop.xlane.xlu2 %220  ;;  %vm228_vm5 = vweird.f32 %v2188_v60 }
 0x339   :  { %2189 = vrcp.f32 %v221_v62  ;;  %vm229_vm7 = vmor %vm227_vm6, %vm228_vm5  ;;  %v248_v11 = vand.u32 2147483648, %v221_v62  ;;  %v246_v13 = vand.u32 2147483647, %v221_v62  ;;  %vm242_vm10 = vweird.f32 %v221_v62 }
 0x33a   :  { %v224_v63 = vsub.f32 1.0, %v223_v61 }
 0x33b   :  { %v249_v15 = vor.u32 1.1754944e-38, %v248_v11  ;;  %vm247_vm12 = vcmp.eq.f32.partialorder %v246_v13, 8.507059e+37 }
 0x33c   :  { %v225_v1 = vmul.f32 %v2188_v60, %v224_v63 }
 0x33e   :  { %v226_v3 = vadd.f32 %v2188_v60, %v225_v1 }
 0x33f   :  { %v2190_v4 = vpop.eup %2189 }
 0x340   :  { %v238_v6 = vmul.f32 %v2190_v4, %v221_v62  ;;  %v230_v7 = vsel %vm229_vm7, %v2188_v60, %v226_v3  ;;  %vm243_vm9 = vweird.f32 %v2190_v4 }
 0x341   :  { %v235_v8 = vsel %vm232_vm8, %v234_v5, %v230_v7  ;;  %vm244_vm11 = vmor %vm242_vm10, %vm243_vm9 }
 0x342   :  { %v239_v9 = vsub.f32 1.0, %v238_v6  ;;  %v236_v10 = vmul.f32 %v2184_v54, %v235_v8 }
 0x344   :  { %v240_v12 = vmul.f32 %v2190_v4, %v239_v9  ;;  %2037 = vmatmul.msk.f32.vlgmr.msrb.gmra.mxu1 %vm202_vm3, %v236_v10 }
 0x346   :  { %v241_v14 = vadd.f32 %v2190_v4, %v240_v12 }
 0x348   :  { %v328_v16 = vpop.permute.xlu1 %327  ;;  %v245_v17 = vsel %vm244_vm11, %v2190_v4, %v241_v14 }
 0x349   :  { %2042 = vmatpush.xpose.msk.msra.mxu1 %vm166_vm2, %v328_v16  ;;  %v250_v18 = vsel %vm247_vm12, %v249_v15, %v245_v17 }
 0x34a   :  { %v251_v19 = vmul.f32 %v2186_v57, %v250_v18 }
 0x34c   :  { %2038 = vmatmul.msk.f32.vlgmr.msrb.gmra.mxu2 %vm202_vm3, %v251_v19  ;;  %2043 = vmatmul.msk.f32.vlgmr.msra.gmra.mxu1 %vm166_vm2, %v324_v48 }
 0x354   :  { %2044 = vmatmul.msk.f32.gmra.mxu1 %vm166_vm2, %v326_v20 }
 0x3c1   :  { %v283_v22 = vpop.f32.mrf.mxu1 }
 0x3c2   :  { %2039 = vmatmul.msk.f32.vlgmr.msra.gmra.mxu3 %vm166_vm2, %v283_v22 }
 0x3c9   :  { %v356_v23 = vpop.f32.mrf.mxu1 }
 0x3ca   :  { %v362_v25 = vmul.f32 0.35355338, %v356_v23 }
 0x3cc   :  { %v364_v26 = vadd.f32 %v362_v25, %v2544_v39 }
 0x3ce   :  { %v366_v28 = vsel %vm202_vm3, %v364_v26, -inf }
 0x3cf   :  { %v286_v29 = vpop.f32.mrf.mxu2  ;;  %367 = vmax.xlane.f32.xlu0 %v366_v28 }
 0x3d0   :  { %2040 = vmatmul.msk.f32.gmra.mxu3 %vm166_vm2, %v286_v29 }
 0x3d1   :  { %v359_v30 = vpop.f32.mrf.mxu1 }
 0x3d2   :  { %v363_v33 = vmul.f32 0.35355338, %v359_v30 }
 0x3d4   :  { %v365_v34 = vadd.f32 %v363_v33, %v2551_v44 }
 0x3d6   :  { %v369_v35 = vsel %vm206_vm4, %v365_v34, -inf }
 0x3d7   :  { %370 = vmax.xlane.f32.xlu1 %v369_v35  ;;  %v2622_v35 = vld [vmem:[%s3123_s8] ss:$0 sm:$0xff] }
 0x3f0   :  { %645 = vrot.lane.b32.xlu1 %v2514_v31, %s3154_s25 }
 0x3f8   :  { %639 = vrot.lane.b32.xlu1 %v2520_v32, %s3148_s26 }
 0x400   :  { %641 = vrot.lane.b32.xlu1 %v2514_v31, %s3148_s26  ;;  %s3181_s26 = smov 104  }
 0x442   :  { %v368_v37 = vpop.xlane.xlu0 %367 }
 0x443   :  { %v372_v38 = vsub.f32 %v364_v26, %v368_v37 }
 0x445   :  { %v374_v40 = vmul.f32 1.442695, %v372_v38  ;;  %v312_v33 = vpop.f32.mrf.mxu3 }
 0x446   :  { %v321_v36 = vadd.f32 %v2622_v35, %v312_v33 }
 0x447   :  { %2191 = vpow2.f32 %v374_v40 }
 0x44a   :  { %v371_v41 = vpop.xlane.xlu1 %370 }
 0x44b   :  { %v373_v42 = vsub.f32 %v365_v34, %v371_v41 }
 0x44d   :  { %v2192_v43 = vpop.eup %2191  ;;  %v376_v45 = vmul.f32 1.442695, %v373_v42 }
 0x44e   :  { %v378_v46 = vsel %vm202_vm3, %v2192_v43, 0.0 }
 0x44f   :  { %2193 = vpow2.f32 %v376_v45  ;;  %379 = vadd.xlane.f32.xlu2 %v378_v46 }
 0x453   :  { %v2617_v34 = vpop.f32.mrf.mxu3 }
 0x455   :  { %v2194_v47 = vpop.eup %2193 }
 0x456   :  { %v381_v48 = vsel %vm206_vm4, %v2194_v47, 0.0 }
 0x457   :  { %382 = vadd.xlane.f32.xlu0 %v381_v48 }
 0x462   :  { %v646_v49 = vpop.permute.xlu1 %645 }
 0x463   :  { %2059 = vmatpush.xpose.msk.msra.mxu3 %vm166_vm2, %v646_v49 }
 0x467   :  { %416 = vrot.lane.b32.xlu2 %v2514_v31, %s3156_s1 }
 0x46a   :  { %v640_v21 = vpop.permute.xlu1 %639 }
 0x46b   :  { %414 = vrot.lane.b32.xlu0 %v2520_v32, %s3156_s1  ;;  %s3177_s1 = smov 56  }
 0x46f   :  { %643 = vrot.lane.b32.xlu2 %v2520_v32, %s3154_s25 }
 0x472   :  { %v642_v29 = vpop.permute.xlu1 %641 }
 0x473   :  { %487 = vrot.lane.b32.xlu0 %v2514_v31, %s3152_s5 }
 0x477   :  { %481 = vrot.lane.b32.xlu2 %v2520_v32, %s3150_s24 }
 0x47b   :  { %485 = vrot.lane.b32.xlu0 %v2520_v32, %s3152_s5 }
 0x483   :  { %483 = vrot.lane.b32.xlu0 %v2514_v31, %s3150_s24  ;;  %s3175_s24 = smov 88  }
 0x4c2   :  { %v380_v50 = vpop.xlane.xlu2 %379 }
 0x4c3   :  { %2195 = vrcp.f32 %v380_v50  ;;  %v395_v61 = vand.u32 2147483648, %v380_v50  ;;  %vm389_vm14 = vweird.f32 %v380_v50  ;;  %v393_v63 = vand.u32 2147483647, %v380_v50 }
 0x4c5   :  { %v396_v2 = vor.u32 1.1754944e-38, %v395_v61  ;;  %vm394_vm5 = vcmp.eq.f32.partialorder %v393_v63, 8.507059e+37 }
 0x4c9   :  { %v2196_v51 = vpop.eup %2195 }
 0x4ca   :  { %v385_v52 = vmul.f32 %v2196_v51, %v380_v50  ;;  %v417_v53 = vpop.permute.xlu2 %416  ;;  %v383_v54 = vpop.xlane.xlu0 %382  ;;  %vm390_vm13 = vweird.f32 %v2196_v51 }
 0x4cb   :  { %2197 = vrcp.f32 %v383_v54  ;;  %2045 = vmatpush.msk.msra.mxu2 %vm263_vm1, %v417_v53  ;;  %vm391_vm15 = vmor %vm389_vm14, %vm390_vm13  ;;  %v410_v5 = vand.u32 2147483648, %v383_v54  ;;  %vm404_vm7 = vweird.f32 %v383_v54  ;;  %v408_v8 = vand.u32 2147483647, %v383_v54 }
 0x4cc   :  { %v386_v55 = vsub.f32 1.0, %v385_v52 }
 0x4cd   :  { %v411_v10 = vor.u32 1.1754944e-38, %v410_v5  ;;  %vm409_vm9 = vcmp.eq.f32.partialorder %v408_v8, 8.507059e+37 }
 0x4ce   :  { %v387_v56 = vmul.f32 %v2196_v51, %v386_v55 }
 0x4d0   :  { %v388_v60 = vadd.f32 %v2196_v51, %v387_v56 }
 0x4d1   :  { %v2198_v57 = vpop.eup %2197 }
 0x4d2   :  { %v400_v58 = vmul.f32 %v2198_v57, %v383_v54  ;;  %v644_v59 = vpop.permute.xlu2 %643  ;;  %v392_v0 = vsel %vm391_vm15, %v2196_v51, %v388_v60  ;;  %vm405_vm6 = vweird.f32 %v2198_v57 }
 0x4d3   :  { %2060 = vmatpush.xpose.msk.msra.mxu3 %vm166_vm2, %v644_v59  ;;  %v397_v3 = vsel %vm394_vm5, %v396_v2, %v392_v0  ;;  %vm406_vm8 = vmor %vm404_vm7, %vm405_vm6 }
 0x4d4   :  { %v401_v62 = vsub.f32 1.0, %v400_v58  ;;  %v398_v7 = vmul.f32 %v2192_v43, %v397_v3 }
 0x4d6   :  { %v402_v1 = vmul.f32 %v2198_v57, %v401_v62 }
 0x4d8   :  { %v403_v4 = vadd.f32 %v2198_v57, %v402_v1 }
 0x4da   :  { %v407_v9 = vsel %vm406_vm8, %v2198_v57, %v403_v4  ;;  %v482_v15 = vpop.permute.xlu2 %481 }
 0x4db   :  { %v412_v11 = vsel %vm409_vm9, %v411_v10, %v407_v9 }
 0x4dc   :  { %v413_v13 = vmul.f32 %v2194_v47, %v412_v11 }
 0x4dd   :  { %v415_v6 = vpop.permute.xlu0 %414 }
 0x4de   :  { %442 = vmatpush.msra.mxu2 %v415_v6 }
 0x4df   :  { %2046 = vmatmul.msk.f32.vlgmr.msra.gmra.mxu2 %vm202_vm3, %v398_v7 }
 0x4e5   :  { %v488_v12 = vpop.permute.xlu0 %487 }
 0x4e6   :  { %2050 = vmatpush.xpose.msk.msrb.mxu1 %vm166_vm2, %v488_v12 }
 0x4e7   :  { %2047 = vmatmul.msk.f32.gmra.mxu2 %vm202_vm3, %v413_v13 }
 0x4ed   :  { %v486_v14 = vpop.permute.xlu0 %485 }
 0x4ee   :  { %2051 = vmatpush.xpose.msk.msrb.mxu1 %vm166_vm2, %v486_v14 }
 0x4f1   :  { %2052 = vmatmul.msk.f32.vlgmr.msrb.gmra.mxu1 %vm166_vm2, %v482_v15 }
 0x4f5   :  { %v484_v16 = vpop.permute.xlu0 %483 }
 0x4f9   :  { %2053 = vmatmul.msk.f32.gmra.mxu1 %vm166_vm2, %v484_v16 }
 0x562   :  { %v444_v17 = vpop.f32.mrf.mxu2 }
 0x563   :  { %2048 = vmatmul.msk.f32.vlgmr.msrb.gmra.mxu3 %vm166_vm2, %v444_v17 }
 0x56a   :  { %v447_v18 = vpop.f32.mrf.mxu2 }
 0x56b   :  { %2049 = vmatmul.msk.f32.gmra.mxu3 %vm166_vm2, %v447_v18 }
 0x56e   :  { %v514_v19 = vpop.f32.mrf.mxu1 }
 0x56f   :  { %v520_v20 = vmul.f32 0.35355338, %v514_v19 }
 0x571   :  { %v522_v22 = vadd.f32 %v520_v20, %v2544_v39 }
 0x573   :  { %2061 = vmatmul.msk.f32.vlgmr.msra.gmra.mxu3 %vm166_vm2, %v640_v21  ;;  %v524_v23 = vsel %vm202_vm3, %v522_v22, -inf }
 0x574   :  { %525 = vmax.xlane.f32.xlu2 %v524_v23 }
 0x576   :  { %v517_v25 = vpop.f32.mrf.mxu1 }
 0x577   :  { %v521_v26 = vmul.f32 0.35355338, %v517_v25 }
 0x579   :  { %v523_v28 = vadd.f32 %v521_v26, %v2551_v44 }
 0x57b   :  { %2062 = vmatmul.msk.f32.gmra.mxu3 %vm166_vm2, %v642_v29  ;;  %v527_v30 = vsel %vm206_vm4, %v523_v28, -inf }
 0x57c   :  { %528 = vmax.xlane.f32.xlu0 %v527_v30 }
 0x590   :  { %574 = vrot.lane.b32.xlu0 %v2514_v31, %s3144_s6 }
 0x5e6   :  { %v473_v37 = vpop.f32.mrf.mxu3 }
 0x5e7   :  { %v2625_v38 = vadd.f32 %v473_v37, %v321_v36  ;;  %v526_v41 = vpop.xlane.xlu2 %525  ;;  %v157_v36 = vld [vmem:[%s3122_s7 + $0x10] sm:$0xff] }
 0x5e8   :  { %v530_v42 = vsub.f32 %v522_v22, %v526_v41  ;;  %629 = vmatpush.msrb.mxu0 %v157_v36  ;;  %v865_v36 = vld [vmem:[%s3126_s11 + $0x10] sm:$0xff] }
 0x5ea   :  { %v532_v43 = vmul.f32 1.442695, %v530_v42 }
 0x5ec   :  { %2199 = vpow2.f32 %v532_v43 }
 0x5ee   :  { %v2627_v40 = vpop.f32.mrf.mxu3 }
 0x5ef   :  { %v529_v46 = vpop.xlane.xlu0 %528 }
 0x5f0   :  { %v531_v49 = vsub.f32 %v523_v28, %v529_v46 }
 0x5f2   :  { %v534_v51 = vmul.f32 1.442695, %v531_v49  ;;  %v2200_v54 = vpop.eup %2199 }
 0x5f3   :  { %v536_v58 = vsel %vm202_vm3, %v2200_v54, 0.0 }
 0x5f4   :  { %2201 = vpow2.f32 %v534_v51 }
 0x5f6   :  { %v672_v45 = vpop.f32.mrf.mxu3 }
 0x5f7   :  { %v678_v47 = vmul.f32 0.35355338, %v672_v45 }
 0x5f9   :  { %v680_v48 = vadd.f32 %v678_v47, %v2544_v39 }
 0x5fa   :  { %v2202_v39 = vpop.eup %2201 }
 0x5fb   :  { %v682_v50 = vsel %vm202_vm3, %v680_v48, -inf  ;;  %v539_v59 = vsel %vm206_vm4, %v2202_v39, 0.0 }
 0x5fc   :  { %683 = vmax.xlane.f32.xlu1 %v682_v50 }
 0x5fe   :  { %v675_v52 = vpop.f32.mrf.mxu3 }
 0x5ff   :  { %v679_v53 = vmul.f32 0.35355338, %v675_v52 }
 0x601   :  { %v681_v55 = vadd.f32 %v679_v53, %v2551_v44 }
 0x602   :  { %v575_v56 = vpop.permute.xlu0 %574 }
 0x603   :  { %2054 = vmatpush.msk.msrb.mxu2 %vm263_vm1, %v575_v56  ;;  %v685_v57 = vsel %vm206_vm4, %v681_v55, -inf }
 0x604   :  { %686 = vmax.xlane.f32.xlu2 %v685_v57  ;;  %537 = vadd.xlane.f32.xlu1 %v536_v58 }
 0x60c   :  { %540 = vadd.xlane.f32.xlu2 %v539_v59 }
 0x624   :  { %572 = vrot.lane.b32.xlu2 %v2520_v32, %s3144_s6  ;;  %s3178_s6 = smov 72  }
 0x66f   :  { %v684_v60 = vpop.xlane.xlu1 %683 }
 0x670   :  { %v688_v61 = vsub.f32 %v680_v48, %v684_v60 }
 0x672   :  { %v690_v44 = vmul.f32 1.442695, %v688_v61 }
 0x674   :  { %2203 = vpow2.f32 %v690_v44 }
 0x677   :  { %v538_v62 = vpop.xlane.xlu1 %537  ;;  %v687_v63 = vpop.xlane.xlu2 %686 }
 0x678   :  { %2205 = vrcp.f32 %v538_v62  ;;  %v689_v0 = vsub.f32 %v681_v55, %v687_v63  ;;  %v553_v8 = vand.u32 2147483648, %v538_v62  ;;  %v551_v11 = vand.u32 2147483647, %v538_v62 }
 0x679   :  { %vm547_vm11 = vweird.f32 %v538_v62 }
 0x67a   :  { %v2638_v1 = vpop.eup %2203  ;;  %v692_v2 = vmul.f32 1.442695, %v689_v0  ;;  %v554_v15 = vor.u32 1.1754944e-38, %v553_v8  ;;  %vm552_vm13 = vcmp.eq.f32.partialorder %v551_v11, 8.507059e+37  ;;  %v322_v8 = vadd.f32 %v2622_v35, %v2617_v34 }
 0x67b   :  { %v694_v3 = vsel %vm202_vm3, %v2638_v1, 0.0 }
 0x67c   :  { %695 = vadd.xlane.f32.xlu0 %v694_v3  ;;  %2207 = vpow2.f32 %v692_v2  ;;  %v480_v11 = vadd.f32 %v2627_v40, %v322_v8  ;;  %v928_v8 = vld [vmem:[%s3128_s13 + $0x50] sm:$0xff] }
 0x67e   :  { %v2206_v4 = vpop.eup %2205 }
 0x67f   :  { %v543_v5 = vmul.f32 %v2206_v4, %v538_v62  ;;  %v541_v6 = vpop.xlane.xlu2 %540  ;;  %vm548_vm10 = vweird.f32 %v2206_v4 }
 0x680   :  { %2209 = vrcp.f32 %v541_v6  ;;  %vm549_vm12 = vmor %vm547_vm11, %vm548_vm10  ;;  %v568_v22 = vand.u32 2147483648, %v541_v6  ;;  %v566_v25 = vand.u32 2147483647, %v541_v6  ;;  %vm562_vm15 = vweird.f32 %v541_v6 }
 0x681   :  { %v544_v7 = vsub.f32 1.0, %v543_v5 }
 0x682   :  { %v2642_v9 = vpop.eup %2207  ;;  %v569_v28 = vor.u32 1.1754944e-38, %v568_v22  ;;  %vm567_vm6 = vcmp.eq.f32.partialorder %v566_v25, 8.507059e+37 }
 0x683   :  { %v545_v10 = vmul.f32 %v2206_v4, %v544_v7  ;;  %v697_v12 = vsel %vm206_vm4, %v2642_v9, 0.0 }
 0x684   :  { %698 = vadd.xlane.f32.xlu1 %v697_v12 }
 0x685   :  { %v546_v13 = vadd.f32 %v2206_v4, %v545_v10 }
 0x686   :  { %v2210_v14 = vpop.eup %2209 }
 0x687   :  { %v550_v16 = vsel %vm549_vm12, %v2206_v4, %v546_v13  ;;  %v558_v17 = vmul.f32 %v2210_v14, %v541_v6  ;;  %v573_v18 = vpop.permute.xlu2 %572  ;;  %vm563_vm14 = vweird.f32 %v2210_v14 }
 0x688   :  { %v555_v19 = vsel %vm552_vm13, %v554_v15, %v550_v16  ;;  %600 = vmatpush.msrb.mxu2 %v573_v18  ;;  %vm564_vm5 = vmor %vm562_vm15, %vm563_vm14  ;;  %vm804_vm15 = vcmask 254976  }
 0x689   :  { %v559_v20 = vsub.f32 1.0, %v558_v17  ;;  %v556_v21 = vmul.f32 %v2200_v54, %v555_v19  ;;  %v2314_v17 = vmov 32.0  }
 0x68b   :  { %v560_v23 = vmul.f32 %v2210_v14, %v559_v20  ;;  %2055 = vmatmul.msk.f32.vlgmr.msrb.gmra.mxu2 %vm202_vm3, %v556_v21 }
 0x68d   :  { %v561_v26 = vadd.f32 %v2210_v14, %v560_v23 }
 0x68f   :  { %v565_v29 = vsel %vm564_vm5, %v2210_v14, %v561_v26 }
 0x690   :  { %730 = vrot.lane.b32.xlu0 %v2520_v32, %s3146_s0  ;;  %v570_v30 = vsel %vm567_vm6, %v569_v28, %v565_v29 }
 0x691   :  { %v571_v33 = vmul.f32 %v2202_v39, %v570_v30 }
 0x693   :  { %2056 = vmatmul.msk.f32.gmra.mxu2 %vm202_vm3, %v571_v33  ;;  %v866_v33 = vld [vmem:[%s3126_s11 + $0x18] sm:$0xff] }
 0x694   :  { %889 = vmatpush.msra.mxu0 %v866_v33 }
 0x696   :  { %890 = vmatpush.msra.mxu0 %v865_v36 }
 0x69d   :  { %732 = vrot.lane.b32.xlu1 %v2514_v31, %s3146_s0 }
 0x6ef   :  { %v696_v37 = vpop.xlane.xlu0 %695 }
 0x6f0   :  { %2211 = vrcp.f32 %v696_v37  ;;  %v711_v50 = vand.u32 2147483648, %v696_v37  ;;  %vm705_vm8 = vweird.f32 %v696_v37  ;;  %v709_v31 = vand.u32 2147483647, %v696_v37 }
 0x6f2   :  { %v712_v53 = vor.u32 1.1754944e-38, %v711_v50  ;;  %vm710_vm10 = vcmp.eq.f32.partialorder %v709_v31, 8.507059e+37  ;;  %v930_v50 = vld [vmem:[%s3128_s13 + $0x60] sm:$0xff] }
 0x6f6   :  { %v2212_v42 = vpop.eup %2211 }
 0x6f7   :  { %v699_v41 = vpop.xlane.xlu1 %698  ;;  %v701_v43 = vmul.f32 %v2212_v42, %v696_v37  ;;  %vm706_vm7 = vweird.f32 %v2212_v42  ;;  %v864_v37 = vld [vmem:[%s3126_s11 + $0x8] sm:$0xff] }
 0x6f8   :  { %2213 = vrcp.f32 %v699_v41  ;;  %vm707_vm9 = vmor %vm705_vm8, %vm706_vm7  ;;  %v726_v58 = vand.u32 2147483648, %v699_v41  ;;  %vm720_vm12 = vweird.f32 %v699_v41  ;;  %v724_v60 = vand.u32 2147483647, %v699_v41  ;;  %891 = vmatpush.msra.mxu0 %v864_v37 }
 0x6f9   :  { %v702_v45 = vsub.f32 1.0, %v701_v43  ;;  %2215 = vrcp.f32 %v2314_v17  ;;  %v918_v17 = vld [vmem:[%s3128_s13] sm:$0xff] }
 0x6fa   :  { %v727_v44 = vor.u32 1.1754944e-38, %v726_v58  ;;  %vm725_vm14 = vcmp.eq.f32.partialorder %v724_v60, 8.507059e+37 }
 0x6fb   :  { %v703_v46 = vmul.f32 %v2212_v42, %v702_v45 }
 0x6fd   :  { %v704_v48 = vadd.f32 %v2212_v42, %v703_v46  ;;  %v932_v46 = vld [vmem:[%s3128_s13 + $0x70] sm:$0xff] }
 0x6fe   :  { %v2214_v32 = vpop.eup %2213 }
 0x6ff   :  { %v716_v47 = vmul.f32 %v2214_v32, %v699_v41  ;;  %v708_v51 = vsel %vm707_vm9, %v2212_v42, %v704_v48  ;;  %vm721_vm11 = vweird.f32 %v2214_v32  ;;  %v2216_v34 = vpop.eup %2215  ;;  %v863_v41 = vld [vmem:[%s3126_s11] sm:$0xff] }
 0x700   :  { %v713_v55 = vsel %vm710_vm10, %v712_v53, %v708_v51  ;;  %vm722_vm13 = vmor %vm720_vm12, %vm721_vm11  ;;  %v809_v35 = vmul.f32 32.0, %v2216_v34  ;;  %vm813_vm5 = vweird.f32 %v2216_v34  ;;  %892 = vmatpush.msra.mxu0 %v863_v41 }
 0x701   :  { %v717_v49 = vsub.f32 1.0, %v716_v47  ;;  %v714_v59 = vmul.f32 %v2638_v1, %v713_v55  ;;  %v158_v1 = vld [vmem:[%s3122_s7 + $0x18] sm:$0xff]  ;;  %v931_v47 = vld [vmem:[%s3128_s13 + $0x68] sm:$0xff] }
 0x702   :  { %v731_v39 = vpop.permute.xlu0 %730  ;;  %787 = vmatpush.msra.mxu2 %v158_v1 }
 0x703   :  { %v718_v52 = vmul.f32 %v2214_v32, %v717_v49 }
 0x705   :  { %v719_v57 = vadd.f32 %v2214_v32, %v718_v52 }
 0x707   :  { %v723_v61 = vsel %vm722_vm13, %v2214_v32, %v719_v57  ;;  %v933_v32 = vld [vmem:[%s3128_s13 + $0x78] sm:$0xff] }
 0x708   :  { %v728_v63 = vsel %vm725_vm14, %v727_v44, %v723_v61  ;;  %938 = vmatpush.msrb.mxu3 %v933_v32  ;;  %v2168_v44 = vld [vmem:[%s3125_s10] ss:$0 sm:$0xff] }
 0x709   :  { %v729_v0 = vmul.f32 %v2642_v9, %v728_v63 }
 0x70a   :  { %939 = vmatpush.msrb.mxu3 %v932_v46  ;;  %v2170_v46 = vld [vmem:[%s3129_s14] ss:$0 sm:$0xff] }
 0x70c   :  { %940 = vmatpush.msrb.mxu3 %v931_v47 }
 0x70e   :  { %v602_v54 = vpop.f32.mrf.mxu2  ;;  %941 = vmatpush.msrb.mxu3 %v930_v50 }
 0x70f   :  { %2057 = vmatmul.msk.f32.vlgmr.msrb.gmra.mxu0 %vm166_vm2, %v602_v54  ;;  %v733_v56 = vpop.permute.xlu1 %732 }
 0x710   :  { %2063 = vmatpush.msk.msra.mxu1 %vm263_vm1, %v733_v56 }
 0x712   :  { %758 = vmatpush.msra.mxu1 %v731_v39  ;;  %v2167_v39 = vld [vmem:[%s3124_s9] ss:$0 sm:$0xff] }
 0x713   :  { %2064 = vmatmul.msk.f32.vlgmr.msra.gmra.mxu1 %vm202_vm3, %v714_v59 }
 0x716   :  { %v605_v62 = vpop.f32.mrf.mxu2 }
 0x717   :  { %2058 = vmatmul.msk.f32.gmra.mxu0 %vm166_vm2, %v605_v62 }
 0x71b   :  { %2065 = vmatmul.msk.f32.gmra.mxu1 %vm202_vm3, %v729_v0 }
 0x78c   :  { %v631_v4 = vpop.f32.mrf.mxu0 }
 0x78d   :  { %v637_v5 = vadd.f32 %v631_v4, %v2625_v38 }
 0x790   :  { %v760_v2 = vpop.f32.mrf.mxu1 }
 0x791   :  { %2066 = vmatmul.msk.f32.vlgmr.msra.gmra.mxu2 %vm166_vm2, %v760_v2 }
 0x794   :  { %v634_v10 = vpop.f32.mrf.mxu0 }
 0x795   :  { %v638_v13 = vadd.f32 %v634_v10, %v480_v11  ;;  %v926_v10 = vld [vmem:[%s3128_s13 + $0x40] sm:$0xff]  ;;  %v925_v11 = vld [vmem:[%s3128_s13 + $0x38] sm:$0xff] }
 0x798   :  { %v763_v3 = vpop.f32.mrf.mxu1 }
 0x799   :  { %2067 = vmatmul.msk.f32.gmra.mxu2 %vm166_vm2, %v763_v3 }
 0x814   :  { %v789_v6 = vpop.f32.mrf.mxu2 }
 0x815   :  { %v795_v7 = vadd.f32 %v789_v6, %v637_v5 }
 0x817   :  { %v797_v9 = vadd.f32 %v795_v7, %v2500_v24  ;;  %v810_v24 = vsub.f32 1.0, %v809_v35  ;;  %v929_v7 = vld [vmem:[%s3128_s13 + $0x58] sm:$0xff] }
 0x818   :  { %942 = vmatpush.msrb.mxu3 %v929_v7 }
 0x819   :  { %v801_v12 = vsel %vm125_vm0, %v797_v9, 0.0  ;;  %v811_v18 = vmul.f32 %v2216_v34, %v810_v24 }
 0x81a   :  { %802 = vadd.xlane.f32.xlu2 %v801_v12  ;;  %943 = vmatpush.msrb.mxu3 %v928_v8  ;;  %v924_v12 = vld [vmem:[%s3128_s13 + $0x30] sm:$0xff] }
 0x81b   :  { %v812_v19 = vadd.f32 %v2216_v34, %v811_v18 }
 0x81c   :  { %v792_v14 = vpop.f32.mrf.mxu2 }
 0x81d   :  { %v796_v15 = vadd.f32 %v792_v14, %v638_v13  ;;  %v2675_v40 = vsel %vm813_vm5, %v2216_v34, %v812_v19  ;;  %v923_v13 = vld [vmem:[%s3128_s13 + $0x28] sm:$0xff]  ;;  %v922_v14 = vld [vmem:[%s3128_s13 + $0x20] sm:$0xff] }
 0x81e   :  { %v2169_v34 = vld [vmem:[%s3127_s12] ss:$0 sm:$0xff] }
 0x81f   :  { %v798_v16 = vadd.f32 %v796_v15, %v2507_v27  ;;  %v921_v15 = vld [vmem:[%s3128_s13 + $0x18] sm:$0xff] }
 0x821   :  { %v805_v38 = vsel %vm804_vm15, %v798_v16, 0.0 }
 0x822   :  { %806 = vadd.xlane.f32.xlu0 %v805_v38  ;;  %v919_v38 = vld [vmem:[%s3128_s13 + $0x8] sm:$0xff] }
 0x88d   :  { %v803_v20 = vpop.xlane.xlu2 %802 }
 0x88e   :  { %v815_v21 = vmul.f32 %v2675_v40, %v803_v20 }
 0x890   :  { %v817_v22 = vsub.f32 %v797_v9, %v815_v21  ;;  %v927_v9 = vld [vmem:[%s3128_s13 + $0x48] sm:$0xff] }
 0x891   :  { %944 = vmatpush.msrb.mxu3 %v927_v9 }
 0x892   :  { %v819_v23 = vmul.f32 %v817_v22, %v817_v22 }
 0x893   :  { %945 = vmatpush.msrb.mxu3 %v926_v10 }
 0x894   :  { %v821_v27 = vsel %vm125_vm0, %v819_v23, 0.0 }
 0x895   :  { %822 = vadd.xlane.f32.xlu1 %v821_v27  ;;  %v807_v25 = vpop.xlane.xlu0 %806  ;;  %946 = vmatpush.msrb.mxu3 %v925_v11 }
 0x896   :  { %v816_v26 = vmul.f32 %v2675_v40, %v807_v25 }
 0x897   :  { %947 = vmatpush.msrb.mxu3 %v924_v12 }
 0x898   :  { %v818_v28 = vsub.f32 %v798_v16, %v816_v26  ;;  %v920_v16 = vld [vmem:[%s3128_s13 + $0x10] sm:$0xff] }
 0x899   :  { %948 = vmatpush.msrb.mxu3 %v923_v13 }
 0x89a   :  { %v820_v29 = vmul.f32 %v818_v28, %v818_v28 }
 0x89b   :  { %949 = vmatpush.msrb.mxu3 %v922_v14 }
 0x89c   :  { %v824_v30 = vsel %vm804_vm15, %v820_v29, 0.0 }
 0x89d   :  { %825 = vadd.xlane.f32.xlu2 %v824_v30  ;;  %950 = vmatpush.msrb.mxu3 %v921_v15 }
 0x89f   :  { %951 = vmatpush.msrb.mxu3 %v920_v16  ;;  %v2171_v16 = vld [vmem:[%s3130_s15] ss:$0 sm:$0xff] }
 0x8a1   :  { %952 = vmatpush.msrb.mxu3 %v919_v38 }
 0x8a3   :  { %953 = vmatpush.msrb.mxu3 %v918_v17 }
 0x908   :  { %v823_v42 = vpop.xlane.xlu1 %822 }
 0x909   :  { %v827_v43 = vmul.f32 %v823_v42, %v2675_v40 }
 0x90b   :  { %v829_v45 = vadd.f32 1e-12, %v827_v43 }
 0x90d   :  { %2217 = vrsqrt.f32 %v829_v45  ;;  %vm837_vm7 = vweird.f32 %v829_v45 }
 0x910   :  { %v826_v48 = vpop.xlane.xlu2 %825 }
 0x911   :  { %v828_v49 = vmul.f32 %v826_v48, %v2675_v40 }
 0x913   :  { %v2218_v31 = vpop.eup %2217  ;;  %v830_v51 = vadd.f32 1e-12, %v828_v49 }
 0x914   :  { %v832_v52 = vmul.f32 %v2218_v31, %v829_v45  ;;  %vm838_vm6 = vweird.f32 %v2218_v31 }
 0x915   :  { %2219 = vrsqrt.f32 %v830_v51  ;;  %vm839_vm8 = vmor %vm837_vm7, %vm838_vm6  ;;  %vm847_vm10 = vweird.f32 %v830_v51 }
 0x916   :  { %v833_v53 = vmul.f32 %v2218_v31, %v832_v52 }
 0x918   :  { %v834_v54 = vmul.f32 0.5, %v833_v53 }
 0x91a   :  { %v835_v55 = vsub.f32 1.5, %v834_v54 }
 0x91b   :  { %v2220_v56 = vpop.eup %2219 }
 0x91c   :  { %v836_v57 = vmul.f32 %v2218_v31, %v835_v55  ;;  %v842_v58 = vmul.f32 %v2220_v56, %v830_v51  ;;  %vm848_vm9 = vweird.f32 %v2220_v56 }
 0x91d   :  { %vm849_vm11 = vmor %vm847_vm10, %vm848_vm9 }
 0x91e   :  { %v840_v59 = vsel %vm839_vm8, %v2218_v31, %v836_v57  ;;  %v843_v60 = vmul.f32 %v2220_v56, %v842_v58 }
 0x91f   :  { %v851_v61 = vmul.f32 %v840_v59, %v817_v22 }
 0x920   :  { %v844_v62 = vmul.f32 0.5, %v843_v60 }
 0x921   :  { %v856_v63 = vmul.f32 %v2167_v39, %v851_v61 }
 0x922   :  { %v845_v0 = vsub.f32 1.5, %v844_v62  ;;  %v2073_v62 = vld [vmem:[%s3170_s30 + $0x38] sm:$0xff] }
 0x923   :  { %v2713_v1 = vadd.f32 %v2168_v44, %v856_v63  ;;  %1047 = vmatpush.msrb.mxu1 %v2073_v62  ;;  %v2072_v63 = vld [vmem:[%s3170_s30 + $0x30] sm:$0xff] }
 0x924   :  { %v846_v2 = vmul.f32 %v2220_v56, %v845_v0  ;;  %v2071_v0 = vld [vmem:[%s3170_s30 + $0x28] sm:$0xff] }
 0x925   :  { %2068 = vmatmul.msk.f32.vlgmr.msra.gmra.mxu0 %vm125_vm0, %v2713_v1  ;;  %1048 = vmatpush.msrb.mxu1 %v2072_v63 }
 0x926   :  { %v850_v3 = vsel %vm849_vm11, %v2220_v56, %v846_v2 }
 0x927   :  { %v852_v4 = vmul.f32 %v850_v3, %v818_v28  ;;  %1049 = vmatpush.msrb.mxu1 %v2071_v0 }
 0x929   :  { %v857_v5 = vmul.f32 %v2167_v39, %v852_v4 }
 0x92b   :  { %v862_v6 = vadd.f32 %v2168_v44, %v857_v5 }
 0x92d   :  { %2069 = vmatmul.msk.f32.gmra.mxu0 %vm125_vm0, %v862_v6 }
 0x9a2   :  { %v894_v35 = vpop.f32.mrf.mxu0 }
 0x9a3   :  { %v895_v24 = vadd.f32 %v2169_v34, %v894_v35  ;;  %v2172_v35 = vld [vmem:[%s3131_s16] ss:$0 sm:$0xff] }
 0x9a5   :  { %v902_v18 = vmul.f32 0.044715, %v895_v24  ;;  %v900_v36 = vmul.f32 0.5, %v895_v24 }
 0x9a7   :  { %v904_v19 = vmul.f32 %v902_v18, %v895_v24 }
 0x9a9   :  { %v906_v20 = vmul.f32 %v904_v19, %v895_v24 }
 0x9aa   :  { %v897_v21 = vpop.f32.mrf.mxu0 }
 0x9ab   :  { %v898_v22 = vadd.f32 %v2169_v34, %v897_v21  ;;  %v908_v23 = vadd.f32 %v906_v20, %v895_v24 }
 0x9ad   :  { %v910_v27 = vmul.f32 0.7978846, %v908_v23  ;;  %v903_v25 = vmul.f32 0.044715, %v898_v22  ;;  %v901_v43 = vmul.f32 0.5, %v898_v22 }
 0x9af   :  { %2221 = vtanh.f32 %v910_v27  ;;  %v905_v26 = vmul.f32 %v903_v25, %v898_v22 }
 0x9b1   :  { %v907_v28 = vmul.f32 %v905_v26, %v898_v22  ;;  %v2173_v26 = vld [vmem:[%s3173_s2 + $0x1] ss:$0 sm:$0xff] }
 0x9b3   :  { %v909_v29 = vadd.f32 %v907_v28, %v898_v22 }
 0x9b5   :  { %v2222_v30 = vpop.eup %2221  ;;  %v911_v33 = vmul.f32 0.7978846, %v909_v29 }
 0x9b6   :  { %v914_v37 = vadd.f32 1.0, %v2222_v30 }
 0x9b7   :  { %2223 = vtanh.f32 %v911_v33 }
 0x9b8   :  { %v916_v41 = vmul.f32 %v914_v37, %v900_v36 }
 0x9ba   :  { %954 = vmatmul.f32.vlgmr.msrb.gmra.mxu3 %v916_v41 }
 0x9bd   :  { %v2224_v42 = vpop.eup %2223 }
 0x9be   :  { %v915_v45 = vadd.f32 1.0, %v2224_v42 }
 0x9c0   :  { %v917_v32 = vmul.f32 %v915_v45, %v901_v43 }
 0x9c2   :  { %957 = vmatmul.f32.gmra.mxu3 %v917_v32 }
 0xa3d   :  { %v955_v47 = vpop.f32.mrf.mxu3 }
 0xa3e   :  { %v956_v48 = vadd.f32 %v2170_v46, %v955_v47  ;;  %v2827_v47 = vld [vmem:[%s3174_s29] sm:$0xff] }
 0xa40   :  { %v961_v49 = vadd.f32 %v956_v48, %v2713_v1  ;;  %v2070_v1 = vld [vmem:[%s3170_s30 + $0x20] sm:$0xff]  ;;  %s3180_s30 = smov 112  }
 0xa41   :  { %1050 = vmatpush.msrb.mxu1 %v2070_v1 }
 0xa42   :  { %v965_v50 = vsel %vm125_vm0, %v961_v49, 0.0 }
 0xa43   :  { %966 = vadd.xlane.f32.xlu0 %v965_v50 }
 0xa45   :  { %v958_v31 = vpop.f32.mrf.mxu3 }
 0xa46   :  { %v959_v51 = vadd.f32 %v2170_v46, %v958_v31 }
 0xa48   :  { %v962_v52 = vadd.f32 %v959_v51, %v862_v6  ;;  %v2834_v51 = vld [vmem:[%s3174_s29 + $0x8] sm:$0x3]  ;;  %s3176_s29 = smov 64  }
 0xa4a   :  { %v968_v53 = vsel %vm804_vm15, %v962_v52, 0.0 }
 0xa4b   :  { %969 = vadd.xlane.f32.xlu1 %v968_v53 }
 0xab6   :  { %v967_v54 = vpop.xlane.xlu0 %966 }
 0xab7   :  { %v971_v55 = vmul.f32 %v967_v54, %v2675_v40 }
 0xab9   :  { %v973_v56 = vsub.f32 %v961_v49, %v971_v55 }
 0xabb   :  { %v975_v57 = vmul.f32 %v973_v56, %v973_v56 }
 0xabd   :  { %v977_v58 = vsel %vm125_vm0, %v975_v57, 0.0 }
 0xabe   :  { %v970_v39 = vpop.xlane.xlu1 %969  ;;  %978 = vadd.xlane.f32.xlu2 %v977_v58 }
 0xabf   :  { %v972_v59 = vmul.f32 %v970_v39, %v2675_v40 }
 0xac1   :  { %v974_v60 = vsub.f32 %v962_v52, %v972_v59 }
 0xac3   :  { %v976_v61 = vmul.f32 %v974_v60, %v974_v60 }
 0xac5   :  { %v980_v44 = vsel %vm804_vm15, %v976_v61, 0.0 }
 0xac6   :  { %981 = vadd.xlane.f32.xlu0 %v980_v44 }
 0xb31   :  { %v979_v2 = vpop.xlane.xlu2 %978 }
 0xb32   :  { %v983_v3 = vmul.f32 %v979_v2, %v2675_v40 }
 0xb34   :  { %v985_v4 = vadd.f32 1e-12, %v983_v3 }
 0xb36   :  { %2225 = vrsqrt.f32 %v985_v4  ;;  %vm993_vm13 = vweird.f32 %v985_v4 }
 0xb39   :  { %v982_v5 = vpop.xlane.xlu0 %981 }
 0xb3a   :  { %v984_v6 = vmul.f32 %v982_v5, %v2675_v40 }
 0xb3c   :  { %v2226_v7 = vpop.eup %2225  ;;  %v986_v8 = vadd.f32 1e-12, %v984_v6 }
 0xb3d   :  { %v988_v9 = vmul.f32 %v2226_v7, %v985_v4  ;;  %vm994_vm12 = vweird.f32 %v2226_v7 }
 0xb3e   :  { %2227 = vrsqrt.f32 %v986_v8  ;;  %vm995_vm14 = vmor %vm993_vm13, %vm994_vm12  ;;  %vm1003_vm6 = vweird.f32 %v986_v8 }
 0xb3f   :  { %v989_v10 = vmul.f32 %v2226_v7, %v988_v9 }
 0xb41   :  { %v990_v11 = vmul.f32 0.5, %v989_v10 }
 0xb43   :  { %v991_v12 = vsub.f32 1.5, %v990_v11 }
 0xb44   :  { %v2228_v13 = vpop.eup %2227 }
 0xb45   :  { %v992_v14 = vmul.f32 %v2226_v7, %v991_v12  ;;  %v998_v15 = vmul.f32 %v2228_v13, %v986_v8  ;;  %vm1004_vm5 = vweird.f32 %v2228_v13 }
 0xb46   :  { %vm1005_vm7 = vmor %vm1003_vm6, %vm1004_vm5 }
 0xb47   :  { %v996_v38 = vsel %vm995_vm14, %v2226_v7, %v992_v14  ;;  %v999_v17 = vmul.f32 %v2228_v13, %v998_v15 }
 0xb48   :  { %v1007_v34 = vmul.f32 %v996_v38, %v973_v56 }
 0xb49   :  { %v1000_v24 = vmul.f32 0.5, %v999_v17 }
 0xb4a   :  { %v1012_v18 = vmul.f32 %v2171_v16, %v1007_v34  ;;  %v2078_v34 = vld [vmem:[%s3122_s7 + $0x28] sm:$0xff] }
 0xb4b   :  { %v1001_v19 = vsub.f32 1.5, %v1000_v24  ;;  %1372 = vmatpush.msra.mxu3 %v2078_v34 }
 0xb4c   :  { %v2787_v20 = vadd.f32 %v2172_v35, %v1012_v18 }
 0xb4d   :  { %v1002_v21 = vmul.f32 %v2228_v13, %v1001_v19 }
 0xb4e   :  { %2075 = vmatmul.msk.f32.vlgmr.msrb.gmra.mxu1 %vm125_vm0, %v2787_v20 }
 0xb4f   :  { %v1006_v22 = vsel %vm1005_vm7, %v2228_v13, %v1002_v21 }
 0xb50   :  { %v1008_v23 = vmul.f32 %v1006_v22, %v974_v60 }
 0xb52   :  { %v1013_v27 = vmul.f32 %v2171_v16, %v1008_v23  ;;  %v2077_v16 = vld [vmem:[%s3122_s7 + $0x20] sm:$0xff] }
 0xb53   :  { %1211 = vmatpush.msra.mxu1 %v2077_v16 }
 0xb54   :  { %v2791_v25 = vadd.f32 %v2172_v35, %v1013_v27 }
 0xb56   :  { %2076 = vmatmul.msk.f32.gmra.mxu1 %vm125_vm0, %v2791_v25 }
 0xbcb   :  { %v1052_v28 = vpop.f32.mrf.mxu1 }
 0xbcc   :  { %v2798_v29 = vadd.f32 %v2173_v26, %v1052_v28 }
 0xbce   :  { %1067 = vrot.lane.b32.xlu2 %v2798_v29, %s2304_s3 }
 0xbd3   :  { %v1055_v30 = vpop.f32.mrf.mxu1 }
 0xbd4   :  { %v2802_v33 = vadd.f32 %v2173_v26, %v1055_v30 }
 0xbd6   :  { %1226 = vrot.lane.b32.xlu2 %v2802_v33, %s2305_s28  ;;  %1230 = vrot.lane.b32.xlu0 %v2802_v33, %s3175_s24 }
 0xbd7   :  { %1069 = vrot.lane.b32.xlu1 %v2802_v33, %s2304_s3  ;;  %s3183_s3 = smov 40  }
 0xbde   :  { %1228 = vrot.lane.b32.xlu0 %v2798_v29, %s3175_s24 }
 0xbdf   :  { %1224 = vrot.lane.b32.xlu1 %v2798_v29, %s2305_s28 }
 0xc28   :  { %v1068_v41 = vpop.permute.xlu2 %1067 }
 0xc30   :  { %v1227_v45 = vpop.permute.xlu2 %1226 }
 0xc48   :  { %v1231_v36 = vpop.permute.xlu0 %1230 }
 0xc49   :  { %v1070_v37 = vpop.permute.xlu1 %1069 }
 0xc4a   :  { %2082 = vmatpush.xpose.msk.msrb.mxu2 %vm166_vm2, %v1070_v37 }
 0xc4e   :  { %2083 = vmatpush.xpose.msk.msrb.mxu2 %vm166_vm2, %v1068_v41 }
 0xc50   :  { %v1229_v42 = vpop.permute.xlu0 %1228 }
 0xc51   :  { %2084 = vmatmul.msk.f32.vlgmr.msrb.gmra.mxu2 %vm166_vm2, %v2798_v29  ;;  %v1225_v43 = vpop.permute.xlu1 %1224 }
 0xc52   :  { %2091 = vmatpush.xpose.msk.msra.mxu2 %vm166_vm2, %v1231_v36 }
 0xc56   :  { %2092 = vmatpush.xpose.msk.msra.mxu2 %vm166_vm2, %v1229_v42 }
 0xc59   :  { %2085 = vmatmul.msk.f32.gmra.mxu2 %vm166_vm2, %v2802_v33 }
 0xc61   :  { %2093 = vmatmul.msk.f32.vlgmr.msra.gmra.mxu2 %vm166_vm2, %v1225_v43 }
 0xc69   :  { %2094 = vmatmul.msk.f32.gmra.mxu2 %vm166_vm2, %v1227_v45 }
 0xcd4   :  { %v1096_v32 = vpop.f32.mrf.mxu2 }
 0xcd5   :  { %v1102_v46 = vmul.f32 0.35355338, %v1096_v32 }
 0xcd7   :  { %v1104_v48 = vadd.f32 %v2827_v47, %v1102_v46 }
 0xcd9   :  { %v1106_v49 = vsel %vm202_vm3, %v1104_v48, -inf }
 0xcda   :  { %1107 = vmax.xlane.f32.xlu0 %v1106_v49 }
 0xcdc   :  { %v1099_v50 = vpop.f32.mrf.mxu2 }
 0xcdd   :  { %v1103_v31 = vmul.f32 0.35355338, %v1099_v50 }
 0xcdf   :  { %v1105_v52 = vadd.f32 %v2834_v51, %v1103_v31 }
 0xce1   :  { %v1109_v53 = vsel %vm206_vm4, %v1105_v52, -inf }
 0xce2   :  { %1110 = vmax.xlane.f32.xlu1 %v1109_v53 }
 0xce4   :  { %v1257_v54 = vpop.f32.mrf.mxu2 }
 0xce5   :  { %v1263_v55 = vmul.f32 0.35355338, %v1257_v54 }
 0xce7   :  { %v1265_v56 = vadd.f32 %v2827_v47, %v1263_v55 }
 0xce9   :  { %v1267_v57 = vsel %vm202_vm3, %v1265_v56, -inf }
 0xcea   :  { %1268 = vmax.xlane.f32.xlu2 %v1267_v57 }
 0xcec   :  { %v1260_v58 = vpop.f32.mrf.mxu2 }
 0xced   :  { %v1264_v39 = vmul.f32 0.35355338, %v1260_v58 }
 0xcef   :  { %v1266_v59 = vadd.f32 %v2834_v51, %v1264_v39 }
 0xcf1   :  { %v1270_v60 = vsel %vm206_vm4, %v1266_v59, -inf }
 0xcf2   :  { %1271 = vmax.xlane.f32.xlu0 %v1270_v60 }
 0xd02   :  { %1154 = vrot.lane.b32.xlu2 %v2798_v29, %s3176_s29 }
 0xd4d   :  { %v1108_v61 = vpop.xlane.xlu0 %1107 }
 0xd4e   :  { %v1112_v44 = vsub.f32 %v1104_v48, %v1108_v61 }
 0xd50   :  { %v1114_v62 = vmul.f32 1.442695, %v1112_v44 }
 0xd52   :  { %2229 = vpow2.f32 %v1114_v62 }
 0xd55   :  { %v1111_v63 = vpop.xlane.xlu1 %1110 }
 0xd56   :  { %v1113_v0 = vsub.f32 %v1105_v52, %v1111_v63 }
 0xd58   :  { %v2844_v1 = vpop.eup %2229  ;;  %v1116_v2 = vmul.f32 1.442695, %v1113_v0 }
 0xd59   :  { %v1118_v3 = vsel %vm202_vm3, %v2844_v1, 0.0 }
 0xd5a   :  { %2231 = vpow2.f32 %v1116_v2  ;;  %1119 = vadd.xlane.f32.xlu1 %v1118_v3 }
 0xd5d   :  { %v1269_v4 = vpop.xlane.xlu2 %1268 }
 0xd5e   :  { %v1273_v5 = vsub.f32 %v1265_v56, %v1269_v4 }
 0xd60   :  { %v2848_v6 = vpop.eup %2231  ;;  %v1275_v7 = vmul.f32 1.442695, %v1273_v5 }
 0xd61   :  { %v1121_v8 = vsel %vm206_vm4, %v2848_v6, 0.0 }
 0xd62   :  { %2233 = vpow2.f32 %v1275_v7  ;;  %1122 = vadd.xlane.f32.xlu2 %v1121_v8 }
 0xd65   :  { %v1272_v9 = vpop.xlane.xlu0 %1271  ;;  %v1155_v38 = vpop.permute.xlu2 %1154 }
 0xd66   :  { %v1274_v10 = vsub.f32 %v1266_v59, %v1272_v9 }
 0xd68   :  { %v2852_v11 = vpop.eup %2233  ;;  %v1277_v12 = vmul.f32 1.442695, %v1274_v10 }
 0xd69   :  { %v1279_v13 = vsel %vm202_vm3, %v2852_v11, 0.0 }
 0xd6a   :  { %2235 = vpow2.f32 %v1277_v12  ;;  %1280 = vadd.xlane.f32.xlu0 %v1279_v13 }
 0xd70   :  { %v2856_v14 = vpop.eup %2235 }
 0xd71   :  { %v1282_v15 = vsel %vm206_vm4, %v2856_v14, 0.0 }
 0xd72   :  { %1283 = vadd.xlane.f32.xlu0 %v1282_v15 }
 0xd73   :  { %1156 = vrot.lane.b32.xlu1 %v2802_v33, %s3176_s29 }
 0xd7a   :  { %1315 = vrot.lane.b32.xlu2 %v2798_v29, %s3177_s1 }
 0xd7b   :  { %1546 = vrot.lane.b32.xlu1 %v2802_v33, %s3178_s6 }
 0xd82   :  { %1388 = vrot.lane.b32.xlu2 %v2802_v33, %s3179_s23 }
 0xd83   :  { %1544 = vrot.lane.b32.xlu1 %v2798_v29, %s3178_s6 }
 0xd86   :  { %1317 = vrot.lane.b32.xlu0 %v2802_v33, %s3177_s1 }
 0xd8a   :  { %1386 = vrot.lane.b32.xlu2 %v2798_v29, %s3179_s23 }
 0xd8b   :  { %1382 = vrot.lane.b32.xlu1 %v2798_v29, %s3180_s30 }
 0xd8e   :  { %1540 = vrot.lane.b32.xlu0 %v2798_v29, %s3181_s26 }
 0xd92   :  { %1384 = vrot.lane.b32.xlu2 %v2802_v33, %s3180_s30 }
 0xd96   :  { %1542 = vrot.lane.b32.xlu0 %v2802_v33, %s3181_s26 }
 0xdcd   :  { %v1120_v17 = vpop.xlane.xlu1 %1119 }
 0xdce   :  { %2237 = vrcp.f32 %v1120_v17  ;;  %v1135_v30 = vand.u32 2147483648, %v1120_v17  ;;  %vm1129_vm9 = vweird.f32 %v1120_v17  ;;  %v1133_v37 = vand.u32 2147483647, %v1120_v17 }
 0xdd0   :  { %v1136_v43 = vor.u32 1.1754944e-38, %v1135_v30  ;;  %vm1134_vm11 = vcmp.eq.f32.partialorder %v1133_v37, 8.507059e+37 }
 0xdd4   :  { %v2238_v35 = vpop.eup %2237 }
 0xdd5   :  { %v1125_v24 = vmul.f32 %v2238_v35, %v1120_v17  ;;  %v1123_v18 = vpop.xlane.xlu2 %1122  ;;  %vm1130_vm8 = vweird.f32 %v2238_v35 }
 0xdd6   :  { %2239 = vrcp.f32 %v1123_v18  ;;  %vm1131_vm10 = vmor %vm1129_vm9, %vm1130_vm8  ;;  %v1150_v52 = vand.u32 2147483648, %v1123_v18  ;;  %vm1144_vm13 = vweird.f32 %v1123_v18  ;;  %v1148_v55 = vand.u32 2147483647, %v1123_v18 }
 0xdd7   :  { %v1126_v19 = vsub.f32 1.0, %v1125_v24 }
 0xdd8   :  { %v1151_v57 = vor.u32 1.1754944e-38, %v1150_v52  ;;  %vm1149_vm5 = vcmp.eq.f32.partialorder %v1148_v55, 8.507059e+37 }
 0xdd9   :  { %v1127_v21 = vmul.f32 %v2238_v35, %v1126_v19 }
 0xddb   :  { %v1128_v28 = vadd.f32 %v2238_v35, %v1127_v21 }
 0xddc   :  { %v2240_v22 = vpop.eup %2239 }
 0xddd   :  { %v1140_v23 = vmul.f32 %v2240_v22, %v1123_v18  ;;  %v1281_v27 = vpop.xlane.xlu0 %1280  ;;  %v2888_v26 = vpop.permute.xlu2 %1315  ;;  %v1132_v41 = vsel %vm1131_vm10, %v2238_v35, %v1128_v28  ;;  %vm1145_vm12 = vweird.f32 %v2240_v22  ;;  %v2174_v28 = vld [vmem:[%s3123_s8 + $0x1] ss:$0 sm:$0xff]  ;;  %s3182_s8 = smov 48  }
 0xdde   :  { %2241 = vrcp.f32 %v1281_v27  ;;  %v1137_v32 = vsel %vm1134_vm11, %v1136_v43, %v1132_v41  ;;  %vm1146_vm14 = vmor %vm1144_vm13, %vm1145_vm12  ;;  %vm1290_vm7 = vweird.f32 %v1281_v27  ;;  %v1294_v2 = vand.u32 2147483647, %v1281_v27 }
 0xddf   :  { %v1141_v36 = vsub.f32 1.0, %v1140_v23  ;;  %v1138_v54 = vmul.f32 %v2844_v1, %v1137_v32  ;;  %v1296_v1 = vand.u32 2147483648, %v1281_v27 }
 0xde0   :  { %vm1295_vm9 = vcmp.eq.f32.partialorder %v1294_v2, 8.507059e+37 }
 0xde1   :  { %v1142_v42 = vmul.f32 %v2240_v22, %v1141_v36  ;;  %v1297_v5 = vor.u32 1.1754944e-38, %v1296_v1 }
 0xde3   :  { %v1143_v31 = vadd.f32 %v2240_v22, %v1142_v42 }
 0xde4   :  { %v2242_v45 = vpop.eup %2241 }
 0xde5   :  { %v1286_v46 = vmul.f32 %v2242_v45, %v1281_v27  ;;  %v1284_v48 = vpop.xlane.xlu0 %1283  ;;  %v1389_v49 = vpop.permute.xlu2 %1388  ;;  %v1147_v56 = vsel %vm1146_vm14, %v2240_v22, %v1143_v31  ;;  %vm1291_vm6 = vweird.f32 %v2242_v45 }
 0xde6   :  { %2243 = vrcp.f32 %v1284_v48  ;;  %v1157_v50 = vpop.permute.xlu1 %1156  ;;  %2100 = vmatpush.xpose.msk.msrb.mxu1 %vm166_vm2, %v1389_v49  ;;  %v1152_v61 = vsel %vm1149_vm5, %v1151_v57, %v1147_v56  ;;  %vm1292_vm8 = vmor %vm1290_vm7, %vm1291_vm6  ;;  %v1311_v12 = vand.u32 2147483648, %v1284_v48  ;;  %vm1305_vm11 = vweird.f32 %v1284_v48 }
 0xde7   :  { %2086 = vmatpush.msk.msrb.mxu0 %vm263_vm1, %v1157_v50  ;;  %v1287_v53 = vsub.f32 1.0, %v1286_v46  ;;  %v1153_v0 = vmul.f32 %v2848_v6, %v1152_v61  ;;  %v1309_v13 = vand.u32 2147483647, %v1284_v48 }
 0xde8   :  { %v1312_v16 = vor.u32 1.1754944e-38, %v1311_v12 }
 0xde9   :  { %1182 = vmatpush.msrb.mxu0 %v1155_v38  ;;  %v1288_v39 = vmul.f32 %v2242_v45, %v1287_v53  ;;  %vm1310_vm13 = vcmp.eq.f32.partialorder %v1309_v13, 8.507059e+37 }
 0xdea   :  { %2087 = vmatmul.msk.f32.vlgmr.msrb.gmra.mxu0 %vm202_vm3, %v1138_v54 }
 0xdeb   :  { %v1289_v62 = vadd.f32 %v2242_v45, %v1288_v39 }
 0xdec   :  { %v2244_v58 = vpop.eup %2243 }
 0xded   :  { %v1301_v59 = vmul.f32 %v2244_v58, %v1284_v48  ;;  %v1387_v60 = vpop.permute.xlu2 %1386  ;;  %v1293_v3 = vsel %vm1292_vm8, %v2242_v45, %v1289_v62  ;;  %vm1306_vm10 = vweird.f32 %v2244_v58 }
 0xdee   :  { %v1547_v44 = vpop.permute.xlu1 %1546  ;;  %2101 = vmatpush.xpose.msk.msrb.mxu1 %vm166_vm2, %v1387_v60  ;;  %v1298_v8 = vsel %vm1295_vm9, %v1297_v5, %v1293_v3  ;;  %vm1307_vm12 = vmor %vm1305_vm11, %vm1306_vm10 }
 0xdef   :  { %2109 = vmatpush.xpose.msk.msrb.mxu3 %vm166_vm2, %v1547_v44  ;;  %v1302_v63 = vsub.f32 1.0, %v1301_v59  ;;  %v1299_v6 = vmul.f32 %v2852_v11, %v1298_v8 }
 0xdf1   :  { %v1303_v4 = vmul.f32 %v2244_v58, %v1302_v63 }
 0xdf2   :  { %2088 = vmatmul.msk.f32.gmra.mxu0 %vm202_vm3, %v1153_v0 }
 0xdf3   :  { %v1304_v10 = vadd.f32 %v2244_v58, %v1303_v4 }
 0xdf5   :  { %v1308_v15 = vsel %vm1307_vm12, %v2244_v58, %v1304_v10  ;;  %v1385_v18 = vpop.permute.xlu2 %1384 }
 0xdf6   :  { %v1545_v7 = vpop.permute.xlu1 %1544  ;;  %v1313_v38 = vsel %vm1310_vm13, %v1312_v16, %v1308_v15 }
 0xdf7   :  { %2110 = vmatpush.xpose.msk.msrb.mxu3 %vm166_vm2, %v1545_v7  ;;  %v1314_v17 = vmul.f32 %v2856_v14, %v1313_v38 }
 0xdf8   :  { %v1318_v9 = vpop.permute.xlu0 %1317 }
 0xdf9   :  { %2095 = vmatpush.msk.msra.mxu0 %vm263_vm1, %v1318_v9 }
 0xdfb   :  { %1343 = vmatpush.msra.mxu0 %v2888_v26 }
 0xdfc   :  { %2096 = vmatmul.msk.f32.vlgmr.msra.gmra.mxu0 %vm202_vm3, %v1299_v6 }
 0xdfe   :  { %v1383_v11 = vpop.permute.xlu1 %1382 }
 0xe00   :  { %v1541_v14 = vpop.permute.xlu0 %1540 }
 0xe04   :  { %2097 = vmatmul.msk.f32.gmra.mxu0 %vm202_vm3, %v1314_v17 }
 0xe08   :  { %v1543_v21 = vpop.permute.xlu0 %1542 }
 0xe67   :  { %v1184_v34 = vpop.f32.mrf.mxu0 }
 0xe68   :  { %2089 = vmatmul.msk.f32.vlgmr.msra.gmra.mxu1 %vm166_vm2, %v1184_v34 }
 0xe6f   :  { %v1187_v35 = vpop.f32.mrf.mxu0 }
 0xe70   :  { %2090 = vmatmul.msk.f32.gmra.mxu1 %vm166_vm2, %v1187_v35 }
 0xe78   :  { %2102 = vmatmul.msk.f32.vlgmr.msrb.gmra.mxu1 %vm166_vm2, %v1383_v11 }
 0xe79   :  { %v1345_v24 = vpop.f32.mrf.mxu0 }
 0xe7a   :  { %2098 = vmatmul.msk.f32.vlgmr.msra.gmra.mxu3 %vm166_vm2, %v1345_v24 }
 0xe80   :  { %2103 = vmatmul.msk.f32.gmra.mxu1 %vm166_vm2, %v1385_v18 }
 0xe81   :  { %v1348_v19 = vpop.f32.mrf.mxu0 }
 0xe82   :  { %2099 = vmatmul.msk.f32.gmra.mxu3 %vm166_vm2, %v1348_v19 }
 0xe8a   :  { %2111 = vmatmul.msk.f32.vlgmr.msrb.gmra.mxu3 %vm166_vm2, %v1541_v14 }
 0xe92   :  { %2112 = vmatmul.msk.f32.gmra.mxu3 %vm166_vm2, %v1543_v21 }
 0xee5   :  { %v1213_v22 = vpop.f32.mrf.mxu1 }
 0xee6   :  { %v1222_v37 = vadd.f32 %v2174_v28, %v1213_v22 }
 0xeed   :  { %v1216_v23 = vpop.f32.mrf.mxu1 }
 0xeee   :  { %v1223_v48 = vadd.f32 %v2174_v28, %v1216_v23 }
 0xef5   :  { %v1415_v27 = vpop.f32.mrf.mxu1 }
 0xef6   :  { %v1421_v26 = vmul.f32 0.35355338, %v1415_v27 }
 0xef8   :  { %v1423_v30 = vadd.f32 %v2827_v47, %v1421_v26 }
 0xefa   :  { %v1425_v36 = vsel %vm202_vm3, %v1423_v30, -inf }
 0xefb   :  { %1426 = vmax.xlane.f32.xlu1 %v1425_v36 }
 0xefd   :  { %v1418_v41 = vpop.f32.mrf.mxu1  ;;  %v1374_v42 = vpop.f32.mrf.mxu3 }
 0xefe   :  { %v1422_v43 = vmul.f32 0.35355338, %v1418_v41  ;;  %v2918_v45 = vadd.f32 %v1374_v42, %v1222_v37 }
 0xf00   :  { %v1424_v32 = vadd.f32 %v2834_v51, %v1422_v43 }
 0xf02   :  { %v1428_v46 = vsel %vm206_vm4, %v1424_v32, -inf }
 0xf03   :  { %1429 = vmax.xlane.f32.xlu2 %v1428_v46 }
 0xf05   :  { %v1377_v49 = vpop.f32.mrf.mxu3 }
 0xf06   :  { %v2922_v50 = vadd.f32 %v1377_v49, %v1223_v48 }
 0xf0d   :  { %v1573_v31 = vpop.f32.mrf.mxu3 }
 0xf0e   :  { %v1579_v52 = vmul.f32 0.35355338, %v1573_v31 }
 0xf10   :  { %v1581_v53 = vadd.f32 %v2827_v47, %v1579_v52 }
 0xf12   :  { %v1583_v54 = vsel %vm202_vm3, %v1581_v53, -inf }
 0xf13   :  { %1584 = vmax.xlane.f32.xlu0 %v1583_v54 }
 0xf15   :  { %v1576_v55 = vpop.f32.mrf.mxu3 }
 0xf16   :  { %v1580_v56 = vmul.f32 0.35355338, %v1576_v55 }
 0xf18   :  { %v1582_v57 = vadd.f32 %v2834_v51, %v1580_v56 }
 0xf1a   :  { %v1586_v58 = vsel %vm206_vm4, %v1582_v57, -inf }
 0xf1b   :  { %1475 = vrot.lane.b32.xlu2 %v2802_v33, %s3182_s8  ;;  %1587 = vmax.xlane.f32.xlu1 %v1586_v58 }
 0xf6e   :  { %v1427_v39 = vpop.xlane.xlu1 %1426 }
 0xf6f   :  { %v1431_v59 = vsub.f32 %v1423_v30, %v1427_v39 }
 0xf71   :  { %v1433_v60 = vmul.f32 1.442695, %v1431_v59 }
 0xf73   :  { %2245 = vpow2.f32 %v1433_v60 }
 0xf76   :  { %v1430_v61 = vpop.xlane.xlu2 %1429 }
 0xf77   :  { %v1432_v44 = vsub.f32 %v1424_v32, %v1430_v61 }
 0xf79   :  { %v2246_v47 = vpop.eup %2245  ;;  %v1435_v62 = vmul.f32 1.442695, %v1432_v44 }
 0xf7a   :  { %v1437_v63 = vsel %vm202_vm3, %v2246_v47, 0.0 }
 0xf7b   :  { %2247 = vpow2.f32 %v1435_v62  ;;  %1438 = vadd.xlane.f32.xlu0 %v1437_v63 }
 0xf7e   :  { %v1476_v0 = vpop.permute.xlu2 %1475 }
 0xf7f   :  { %2104 = vmatpush.msk.msrb.mxu2 %vm263_vm1, %v1476_v0 }
 0xf81   :  { %v2932_v51 = vpop.eup %2247 }
 0xf82   :  { %v1440_v1 = vsel %vm206_vm4, %v2932_v51, 0.0 }
 0xf83   :  { %1441 = vadd.xlane.f32.xlu1 %v1440_v1 }
 0xf86   :  { %v1585_v2 = vpop.xlane.xlu0 %1584 }
 0xf87   :  { %v1589_v3 = vsub.f32 %v1581_v53, %v1585_v2 }
 0xf89   :  { %v1591_v4 = vmul.f32 1.442695, %v1589_v3 }
 0xf8b   :  { %2249 = vpow2.f32 %v1591_v4  ;;  %v2079_v4 = vld [vmem:[%s3122_s7 + $0x30] sm:$0xff] }
 0xf8c   :  { %1530 = vmatpush.msrb.mxu0 %v2079_v4 }
 0xf8e   :  { %v1588_v5 = vpop.xlane.xlu1 %1587 }
 0xf8f   :  { %v1590_v7 = vsub.f32 %v1582_v57, %v1588_v5  ;;  %v2080_v5 = vld [vmem:[%s3122_s7 + $0x38] sm:$0xff]  ;;  %s3184_s7 = sld [smem:[#allocation9_spill]] }
 0xf91   :  { %v2936_v8 = vpop.eup %2249  ;;  %v1593_v9 = vmul.f32 1.442695, %v1590_v7 }
 0xf92   :  { %v1595_v10 = vsel %vm202_vm3, %v2936_v8, 0.0 }
 0xf93   :  { %2251 = vpow2.f32 %v1593_v9  ;;  %1596 = vadd.xlane.f32.xlu2 %v1595_v10 }
 0xf99   :  { %v2940_v12 = vpop.eup %2251 }
 0xf9a   :  { %v1598_v6 = vsel %vm206_vm4, %v2940_v12, 0.0 }
 0xf9b   :  { %1599 = vadd.xlane.f32.xlu0 %v1598_v6 }
 0xf9c   :  { %1473 = vrot.lane.b32.xlu1 %v2798_v29, %s3182_s8 }
 0xfab   :  { %1631 = vrot.lane.b32.xlu2 %v2798_v29, %s3183_s3 }
 0xfaf   :  { %1633 = vrot.lane.b32.xlu0 %v2802_v33, %s3183_s3 }
 0xfee   :  { %v1439_v13 = vpop.xlane.xlu0 %1438 }
 0xfef   :  { %2253 = vrcp.f32 %v1439_v13  ;;  %v1454_v19 = vand.u32 2147483648, %v1439_v13  ;;  %vm1448_vm14 = vweird.f32 %v1439_v13  ;;  %v1452_v14 = vand.u32 2147483647, %v1439_v13 }
 0xff1   :  { %v1455_v22 = vor.u32 1.1754944e-38, %v1454_v19  ;;  %vm1453_vm6 = vcmp.eq.f32.partialorder %v1452_v14, 8.507059e+37 }
 0xff5   :  { %v2254_v15 = vpop.eup %2253 }
 0xff6   :  { %v1442_v16 = vpop.xlane.xlu1 %1441  ;;  %v1444_v38 = vmul.f32 %v2254_v15, %v1439_v13  ;;  %vm1449_vm4 = vweird.f32 %v2254_v15 }
 0xff7   :  { %2255 = vrcp.f32 %v1442_v16  ;;  %vm1450_vm5 = vmor %vm1448_vm14, %vm1449_vm4  ;;  %v1469_v28 = vand.u32 2147483648, %v1442_v16  ;;  %vm1463_vm8 = vweird.f32 %v1442_v16  ;;  %v1467_v42 = vand.u32 2147483647, %v1442_v16 }
 0xff8   :  { %v1445_v17 = vsub.f32 1.0, %v1444_v38 }
 0xff9   :  { %v1470_v32 = vor.u32 1.1754944e-38, %v1469_v28  ;;  %vm1468_vm10 = vcmp.eq.f32.partialorder %v1467_v42, 8.507059e+37  ;;  %v2120_v28 = vld [vmem:[%s3126_s11 + $0x20] sm:$0xff]  ;;  %v2141_v42 = vld [vmem:[%s3128_s13 + $0xf0] sm:$0xff] }
 0xffa   :  { %v1446_v35 = vmul.f32 %v2254_v15, %v1445_v17 }
 0xffc   :  { %v1447_v24 = vadd.f32 %v2254_v15, %v1446_v35 }
 0xffd   :  { %v2256_v34 = vpop.eup %2255 }
 0xffe   :  { %v1459_v11 = vmul.f32 %v2256_v34, %v1442_v16  ;;  %v1451_v33 = vsel %vm1450_vm5, %v2254_v15, %v1447_v24  ;;  %vm1464_vm7 = vweird.f32 %v2256_v34 }
 0xfff   :  { %v1456_v23 = vsel %vm1453_vm6, %v1455_v22, %v1451_v33  ;;  %vm1465_vm9 = vmor %vm1463_vm8, %vm1464_vm7 }
0x1000   :  { %v1460_v18 = vsub.f32 1.0, %v1459_v11  ;;  %v1457_v41 = vmul.f32 %v2246_v47, %v1456_v23 }
0x1002   :  { %v1461_v21 = vmul.f32 %v2256_v34, %v1460_v18 }
0x1004   :  { %v1462_v27 = vadd.f32 %v2256_v34, %v1461_v21 }
0x1006   :  { %v1597_v29 = vpop.xlane.xlu2 %1596  ;;  %v1466_v43 = vsel %vm1465_vm9, %v2256_v34, %v1462_v27  ;;  %v2122_v27 = vld [vmem:[%s3126_s11 + $0x30] sm:$0xff] }
0x1007   :  { %2257 = vrcp.f32 %v1597_v29  ;;  %v1471_v48 = vsel %vm1468_vm10, %v1470_v32, %v1466_v43  ;;  %v1612_v56 = vand.u32 2147483648, %v1597_v29  ;;  %vm1606_vm12 = vweird.f32 %v1597_v29  ;;  %v2140_v43 = vld [vmem:[%s3128_s13 + $0xe8] sm:$0xff] }
0x1008   :  { %v1472_v53 = vmul.f32 %v2932_v51, %v1471_v48  ;;  %v1610_v57 = vand.u32 2147483647, %v1597_v29  ;;  %v2139_v48 = vld [vmem:[%s3128_s13 + $0xe0] sm:$0xff] }
0x1009   :  { %v1613_v59 = vor.u32 1.1754944e-38, %v1612_v56 }
0x100a   :  { %vm1611_vm4 = vcmp.eq.f32.partialorder %v1610_v57, 8.507059e+37 }
0x100d   :  { %v2258_v26 = vpop.eup %2257 }
0x100e   :  { %v1602_v30 = vmul.f32 %v2258_v26, %v1597_v29  ;;  %v1474_v36 = vpop.permute.xlu1 %1473  ;;  %v1600_v37 = vpop.xlane.xlu0 %1599  ;;  %vm1607_vm11 = vweird.f32 %v2258_v26 }
0x100f   :  { %2259 = vrcp.f32 %v1600_v37  ;;  %1501 = vmatpush.msrb.mxu2 %v1474_v36  ;;  %vm1608_vm13 = vmor %vm1606_vm12, %vm1607_vm11  ;;  %v1627_v47 = vand.u32 2147483648, %v1600_v37  ;;  %vm1621_vm5 = vweird.f32 %v1600_v37  ;;  %v1632_v62 = vpop.permute.xlu2 %1631  ;;  %v1625_v0 = vand.u32 2147483647, %v1600_v37 }
0x1010   :  { %2105 = vmatmul.msk.f32.vlgmr.msrb.gmra.mxu2 %vm202_vm3, %v1457_v41  ;;  %v1603_v46 = vsub.f32 1.0, %v1602_v30  ;;  %v2142_v41 = vld [vmem:[%s3128_s13 + $0xf8] sm:$0xff] }
0x1011   :  { %v1628_v1 = vor.u32 1.1754944e-38, %v1627_v47  ;;  %vm1626_vm7 = vcmp.eq.f32.partialorder %v1625_v0, 8.507059e+37  ;;  %1688 = vmatpush.msra.mxu2 %v2080_v5  ;;  %1837 = vmatpush.msra.mxu3 %v2142_v41  ;;  %v2138_v5 = vld [vmem:[%s3128_s13 + $0xd8] sm:$0xff] }
0x1012   :  { %v1604_v31 = vmul.f32 %v2258_v26, %v1603_v46 }
0x1013   :  { %1838 = vmatpush.msra.mxu3 %v2141_v42  ;;  %v2178_v42 = vld [vmem:[%s3129_s14 + $0x1] ss:$0 sm:$0xff] }
0x1014   :  { %v1605_v54 = vadd.f32 %v2258_v26, %v1604_v31 }
0x1015   :  { %v2260_v49 = vpop.eup %2259  ;;  %1839 = vmatpush.msra.mxu3 %v2140_v43 }
0x1016   :  { %v1617_v52 = vmul.f32 %v2260_v49, %v1600_v37  ;;  %v1609_v58 = vsel %vm1608_vm13, %v2258_v26, %v1605_v54  ;;  %vm1622_vm14 = vweird.f32 %v2260_v49  ;;  %v2121_v26 = vld [vmem:[%s3126_s11 + $0x28] sm:$0xff] }
0x1017   :  { %v1614_v60 = vsel %vm1611_vm4, %v1613_v59, %v1609_v58  ;;  %vm1623_vm6 = vmor %vm1621_vm5, %vm1622_vm14  ;;  %1840 = vmatpush.msra.mxu3 %v2139_v48 }
0x1018   :  { %2106 = vmatmul.msk.f32.gmra.mxu2 %vm202_vm3, %v1472_v53  ;;  %v1618_v55 = vsub.f32 1.0, %v1617_v52  ;;  %v1615_v63 = vmul.f32 %v2936_v8, %v1614_v60 }
0x1019   :  { %1841 = vmatpush.msra.mxu3 %v2138_v5 }
0x101a   :  { %v1619_v39 = vmul.f32 %v2260_v49, %v1618_v55 }
0x101c   :  { %v1620_v44 = vadd.f32 %v2260_v49, %v1619_v39  ;;  %v2175_v39 = vld [vmem:[%s3124_s9 + $0x1] ss:$0 sm:$0xff] }
0x101e   :  { %v1624_v51 = vsel %vm1623_vm6, %v2260_v49, %v1620_v44  ;;  %v2176_v44 = vld [vmem:[%s3125_s10 + $0x1] ss:$0 sm:$0xff] }
0x101f   :  { %v1629_v2 = vsel %vm1626_vm7, %v1628_v1, %v1624_v51 }
0x1020   :  { %v1630_v3 = vmul.f32 %v2940_v12, %v1629_v2 }
0x1021   :  { %v1634_v61 = vpop.permute.xlu0 %1633 }
0x1022   :  { %2113 = vmatpush.msk.msra.mxu1 %vm263_vm1, %v1634_v61 }
0x1024   :  { %1659 = vmatpush.msra.mxu1 %v1632_v62 }
0x1025   :  { %2114 = vmatmul.msk.f32.vlgmr.msra.gmra.mxu1 %vm202_vm3, %v1615_v63 }
0x102d   :  { %2115 = vmatmul.msk.f32.gmra.mxu1 %vm202_vm3, %v1630_v3 }
0x1093   :  { %v1503_v7 = vpop.f32.mrf.mxu2 }
0x1094   :  { %2107 = vmatmul.msk.f32.vlgmr.msrb.gmra.mxu0 %vm166_vm2, %v1503_v7  ;;  %v2137_v7 = vld [vmem:[%s3128_s13 + $0xd0] sm:$0xff] }
0x1095   :  { %1842 = vmatpush.msra.mxu3 %v2137_v7 }
0x109b   :  { %v1506_v8 = vpop.f32.mrf.mxu2 }
0x109c   :  { %2108 = vmatmul.msk.f32.gmra.mxu0 %vm166_vm2, %v1506_v8  ;;  %v2136_v8 = vld [vmem:[%s3128_s13 + $0xc8] sm:$0xff] }
0x109d   :  { %1843 = vmatpush.msra.mxu3 %v2136_v8  ;;  %v1947_v8 = vld [vmem:[%s3132_s17] sm:$0xff] }
0x10a2   :  { %v1661_v9 = vpop.f32.mrf.mxu1 }
0x10a3   :  { %2116 = vmatmul.msk.f32.vlgmr.msra.gmra.mxu2 %vm166_vm2, %v1661_v9  ;;  %v2135_v9 = vld [vmem:[%s3128_s13 + $0xc0] sm:$0xff] }
0x10a4   :  { %1844 = vmatpush.msra.mxu3 %v2135_v9 }
0x10aa   :  { %v1664_v10 = vpop.f32.mrf.mxu1 }
0x10ab   :  { %2117 = vmatmul.msk.f32.gmra.mxu2 %vm166_vm2, %v1664_v10  ;;  %v2134_v10 = vld [vmem:[%s3128_s13 + $0xb8] sm:$0xff] }
0x10ac   :  { %1845 = vmatpush.msra.mxu3 %v2134_v10 }
0x1111   :  { %v1532_v12 = vpop.f32.mrf.mxu0 }
0x1112   :  { %v1538_v6 = vadd.f32 %v1532_v12, %v2918_v45  ;;  %v2133_v12 = vld [vmem:[%s3128_s13 + $0xb0] sm:$0xff] }
0x1113   :  { %1846 = vmatpush.msra.mxu3 %v2133_v12 }
0x1119   :  { %v1535_v38 = vpop.f32.mrf.mxu0 }
0x111a   :  { %v1539_v34 = vadd.f32 %v1535_v38, %v2922_v50  ;;  %v2128_v38 = vld [vmem:[%s3128_s13 + $0x88] sm:$0xff] }
0x1126   :  { %v1690_v13 = vpop.f32.mrf.mxu2 }
0x1127   :  { %v1696_v15 = vadd.f32 %v1690_v13, %v1538_v6  ;;  %v2132_v6 = vld [vmem:[%s3128_s13 + $0xa8] sm:$0xff]  ;;  %v2131_v13 = vld [vmem:[%s3128_s13 + $0xa0] sm:$0xff] }
0x1128   :  { %1847 = vmatpush.msra.mxu3 %v2132_v6 }
0x1129   :  { %v1698_v16 = vadd.f32 %v1696_v15, %v2787_v20  ;;  %v2130_v15 = vld [vmem:[%s3128_s13 + $0x98] sm:$0xff] }
0x112a   :  { %1848 = vmatpush.msra.mxu3 %v2131_v13 }
0x112b   :  { %v1704_v17 = vsel %vm125_vm0, %v1698_v16, 0.0 }
0x112c   :  { %1705 = vadd.xlane.f32.xlu0 %v1704_v17  ;;  %1849 = vmatpush.msra.mxu3 %v2130_v15  ;;  %v2127_v17 = vld [vmem:[%s3128_s13 + $0x80] sm:$0xff] }
0x112e   :  { %v1693_v35 = vpop.f32.mrf.mxu2 }
0x112f   :  { %v1697_v11 = vadd.f32 %v1693_v35, %v1539_v34  ;;  %v2177_v34 = vld [vmem:[%s3127_s12 + $0x1] ss:$0 sm:$0xff] }
0x1131   :  { %v1699_v24 = vadd.f32 %v1697_v11, %v2791_v25  ;;  %v2123_v25 = vld [vmem:[%s3126_s11 + $0x38] sm:$0xff] }
0x1132   :  { %1786 = vmatpush.msra.mxu0 %v2123_v25 }
0x1133   :  { %v1707_v18 = vsel %vm804_vm15, %v1699_v24, 0.0 }
0x1134   :  { %1708 = vadd.xlane.f32.xlu1 %v1707_v18  ;;  %1787 = vmatpush.msra.mxu0 %v2122_v27 }
0x1136   :  { %1788 = vmatpush.msra.mxu0 %v2121_v26 }
0x1138   :  { %1789 = vmatpush.msra.mxu0 %v2120_v28 }
0x119f   :  { %v1706_v19 = vpop.xlane.xlu0 %1705 }
0x11a0   :  { %v1710_v45 = vmul.f32 %v1706_v19, %v2675_v40 }
0x11a2   :  { %v1712_v14 = vsub.f32 %v1698_v16, %v1710_v45  ;;  %v2129_v16 = vld [vmem:[%s3128_s13 + $0x90] sm:$0xff] }
0x11a3   :  { %1850 = vmatpush.msra.mxu3 %v2129_v16 }
0x11a4   :  { %v1714_v29 = vmul.f32 %v1712_v14, %v1712_v14 }
0x11a5   :  { %1851 = vmatpush.msra.mxu3 %v2128_v38 }
0x11a6   :  { %v1716_v20 = vsel %vm125_vm0, %v1714_v29, 0.0 }
0x11a7   :  { %1717 = vadd.xlane.f32.xlu2 %v1716_v20  ;;  %v1709_v33 = vpop.xlane.xlu1 %1708  ;;  %1852 = vmatpush.msra.mxu3 %v2127_v17 }
0x11a8   :  { %v1711_v21 = vmul.f32 %v1709_v33, %v2675_v40 }
0x11aa   :  { %v1713_v22 = vsub.f32 %v1699_v24, %v1711_v21 }
0x11ac   :  { %v1715_v50 = vmul.f32 %v1713_v22, %v1713_v22 }
0x11ae   :  { %v1719_v23 = vsel %vm804_vm15, %v1715_v50, 0.0 }
0x11af   :  { %1720 = vadd.xlane.f32.xlu0 %v1719_v23 }
0x121a   :  { %v1718_v30 = vpop.xlane.xlu2 %1717 }
0x121b   :  { %v1722_v36 = vmul.f32 %v1718_v30, %v2675_v40 }
0x121d   :  { %v1724_v37 = vadd.f32 1e-12, %v1722_v36 }
0x121f   :  { %2261 = vrsqrt.f32 %v1724_v37  ;;  %vm1732_vm8 = vweird.f32 %v1724_v37 }
0x1222   :  { %v1721_v32 = vpop.xlane.xlu0 %1720 }
0x1223   :  { %v1723_v46 = vmul.f32 %v1721_v32, %v2675_v40 }
0x1225   :  { %v2262_v49 = vpop.eup %2261  ;;  %v1725_v31 = vadd.f32 1e-12, %v1723_v46 }
0x1226   :  { %v1727_v52 = vmul.f32 %v2262_v49, %v1724_v37  ;;  %vm1733_vm2 = vweird.f32 %v2262_v49 }
0x1227   :  { %2263 = vrsqrt.f32 %v1725_v31  ;;  %vm1734_vm9 = vmor %vm1732_vm8, %vm1733_vm2  ;;  %vm1742_vm11 = vweird.f32 %v1725_v31 }
0x1228   :  { %v1728_v53 = vmul.f32 %v2262_v49, %v1727_v52 }
0x122a   :  { %v1729_v54 = vmul.f32 0.5, %v1728_v53 }
0x122c   :  { %v1730_v55 = vsub.f32 1.5, %v1729_v54 }
0x122d   :  { %v2264_v56 = vpop.eup %2263 }
0x122e   :  { %v1731_v57 = vmul.f32 %v2262_v49, %v1730_v55  ;;  %v1737_v58 = vmul.f32 %v2264_v56, %v1725_v31  ;;  %vm1743_vm10 = vweird.f32 %v2264_v56 }
0x122f   :  { %vm1744_vm12 = vmor %vm1742_vm11, %vm1743_vm10 }
0x1230   :  { %v1735_v59 = vsel %vm1734_vm9, %v2262_v49, %v1731_v57  ;;  %v1738_v60 = vmul.f32 %v2264_v56, %v1737_v58 }
0x1231   :  { %v1746_v61 = vmul.f32 %v1735_v59, %v1712_v14 }
0x1232   :  { %v1739_v47 = vmul.f32 0.5, %v1738_v60 }
0x1233   :  { %v1751_v62 = vmul.f32 %v2175_v39, %v1746_v61 }
0x1234   :  { %v1740_v63 = vsub.f32 1.5, %v1739_v47 }
0x1235   :  { %v3010_v0 = vadd.f32 %v2176_v44, %v1751_v62 }
0x1236   :  { %v1741_v51 = vmul.f32 %v2264_v56, %v1740_v63 }
0x1237   :  { %2125 = vmatmul.msk.f32.vlgmr.msra.gmra.mxu0 %vm125_vm0, %v3010_v0 }
0x1238   :  { %v1745_v1 = vsel %vm1744_vm12, %v2264_v56, %v1741_v51  ;;  %v1950_v51 = vld [vmem:[%s3132_s17 + $0x18] sm:$0xff] }
0x1239   :  { %v1747_v2 = vmul.f32 %v1745_v1, %v1713_v22  ;;  %v1949_v1 = vld [vmem:[%s3132_s17 + $0x10] sm:$0xff]  ;;  %1970 = vmatpush.msrb.mxu2 %v1950_v51 }
0x123b   :  { %v1752_v3 = vmul.f32 %v2175_v39, %v1747_v2  ;;  %1971 = vmatpush.msrb.mxu2 %v1949_v1 }
0x123d   :  { %v1757_v4 = vadd.f32 %v2176_v44, %v1752_v3  ;;  %v1948_v3 = vld [vmem:[%s3132_s17 + $0x8] sm:$0xff] }
0x123e   :  { %1972 = vmatpush.msrb.mxu2 %v1948_v3 }
0x123f   :  { %2126 = vmatmul.msk.f32.gmra.mxu0 %vm125_vm0, %v1757_v4 }
0x1240   :  { %1973 = vmatpush.msrb.mxu2 %v1947_v8 }
0x12b4   :  { %v1791_v35 = vpop.f32.mrf.mxu0 }
0x12b5   :  { %v1792_v11 = vadd.f32 %v2177_v34, %v1791_v35  ;;  %v2179_v35 = vld [vmem:[%s3130_s15 + $0x1] ss:$0 sm:$0xff] }
0x12b7   :  { %v1799_v24 = vmul.f32 0.044715, %v1792_v11  ;;  %v1797_v27 = vmul.f32 0.5, %v1792_v11 }
0x12b9   :  { %v1801_v18 = vmul.f32 %v1799_v24, %v1792_v11 }
0x12bb   :  { %v1803_v19 = vmul.f32 %v1801_v18, %v1792_v11 }
0x12bc   :  { %v1794_v45 = vpop.f32.mrf.mxu0 }
0x12bd   :  { %v1795_v14 = vadd.f32 %v2177_v34, %v1794_v45  ;;  %v1805_v29 = vadd.f32 %v1803_v19, %v1792_v11  ;;  %v2180_v45 = vld [vmem:[%s3131_s16 + $0x1] ss:$0 sm:$0xff] }
0x12bf   :  { %v1807_v20 = vmul.f32 0.7978846, %v1805_v29  ;;  %v1800_v33 = vmul.f32 0.044715, %v1795_v14  ;;  %v1798_v36 = vmul.f32 0.5, %v1795_v14 }
0x12c1   :  { %2265 = vtanh.f32 %v1807_v20  ;;  %v1802_v21 = vmul.f32 %v1800_v33, %v1795_v14  ;;  %v1920_v33 = vld [vmem:[%s3184_s7] sm:$0x3] }
0x12c3   :  { %v1804_v22 = vmul.f32 %v1802_v21, %v1795_v14  ;;  %v1984_v21 = vld [vmem:[%s3135_s20 + $0x18] sm:$0xff] }
0x12c4   :  { %2004 = vmatpush.msrb.mxu0 %v1984_v21 }
0x12c5   :  { %v1806_v50 = vadd.f32 %v1804_v22, %v1795_v14 }
0x12c7   :  { %v2266_v23 = vpop.eup %2265  ;;  %v1808_v25 = vmul.f32 0.7978846, %v1806_v50  ;;  %v1983_v50 = vld [vmem:[%s3135_s20 + $0x10] sm:$0xff] }
0x12c8   :  { %v1811_v26 = vadd.f32 1.0, %v2266_v23  ;;  %2005 = vmatpush.msrb.mxu0 %v1983_v50  ;;  %v1982_v23 = vld [vmem:[%s3135_s20 + $0x8] sm:$0xff] }
0x12c9   :  { %2267 = vtanh.f32 %v1808_v25  ;;  %v1981_v25 = vld [vmem:[%s3135_s20] sm:$0xff]  ;;  %s2315_s20 = smov [#allocation2]  }
0x12ca   :  { %v1813_v28 = vmul.f32 %v1811_v26, %v1797_v27  ;;  %2006 = vmatpush.msrb.mxu0 %v1982_v23  ;;  %v2181_v27 = vld [vmem:[%s3133_s18] ss:$0 sm:$0xff]  ;;  %s2019_s5 = sshll.u32 %s2315_s20, 4  ;;  %s2021_s18 = sshll.u32 %s3137_s22, 4  ;;  %s2020_s5 = int_to_ptr.vmem [resolvable:$true] %s2019_s5  ;;  %s2022_s18 = int_to_ptr.hbm [resolvable:$true] %s2021_s18 }
0x12cc   :  { %1853 = vmatmul.f32.vlgmr.msra.gmra.mxu3 %v1813_v28  ;;  %2007 = vmatpush.msrb.mxu0 %v1981_v25 }
0x12cf   :  { %v2268_v30 = vpop.eup %2267 }
0x12d0   :  { %v1812_v37 = vadd.f32 1.0, %v2268_v30  ;;  %v1979_v30 = vld [vmem:[%s3134_s19] sm:$0x3] }
0x12d2   :  { %v1814_v41 = vmul.f32 %v1812_v37, %v1798_v36 }
0x12d4   :  { %1856 = vmatmul.f32.gmra.mxu3 %v1814_v41  ;;  %v2182_v41 = vld [vmem:[%s3136_s21] ss:$0 sm:$0xff] }
0x134f   :  { %v1854_v43 = vpop.f32.mrf.mxu3 }
0x1350   :  { %v1855_v32 = vadd.f32 %v2178_v42, %v1854_v43 }
0x1352   :  { %v1860_v46 = vadd.f32 %v1855_v32, %v3010_v0 }
0x1354   :  { %v1866_v48 = vsel %vm125_vm0, %v1860_v46, 0.0 }
0x1355   :  { %1867 = vadd.xlane.f32.xlu2 %v1866_v48 }
0x1357   :  { %v1857_v49 = vpop.f32.mrf.mxu3 }
0x1358   :  { %v1858_v31 = vadd.f32 %v2178_v42, %v1857_v49 }
0x135a   :  { %v1861_v52 = vadd.f32 %v1858_v31, %v1757_v4 }
0x135c   :  { %v1869_v53 = vsel %vm804_vm15, %v1861_v52, 0.0 }
0x135d   :  { %1870 = vadd.xlane.f32.xlu1 %v1869_v53 }
0x13c8   :  { %v1868_v54 = vpop.xlane.xlu2 %1867 }
0x13c9   :  { %v1872_v55 = vmul.f32 %v1868_v54, %v2675_v40 }
0x13cb   :  { %v1874_v56 = vsub.f32 %v1860_v46, %v1872_v55 }
0x13cd   :  { %v1876_v57 = vmul.f32 %v1874_v56, %v1874_v56 }
0x13cf   :  { %v1878_v58 = vsel %vm125_vm0, %v1876_v57, 0.0 }
0x13d0   :  { %1879 = vadd.xlane.f32.xlu1 %v1878_v58  ;;  %v1871_v39 = vpop.xlane.xlu1 %1870 }
0x13d1   :  { %v1873_v59 = vmul.f32 %v1871_v39, %v2675_v40 }
0x13d3   :  { %v1875_v60 = vsub.f32 %v1861_v52, %v1873_v59 }
0x13d5   :  { %v1877_v61 = vmul.f32 %v1875_v60, %v1875_v60 }
0x13d7   :  { %v1881_v44 = vsel %vm804_vm15, %v1877_v61, 0.0 }
0x13d8   :  { %1882 = vadd.xlane.f32.xlu0 %v1881_v44 }
0x1443   :  { %v1880_v47 = vpop.xlane.xlu1 %1879 }
0x1444   :  { %v1884_v62 = vmul.f32 %v1880_v47, %v2675_v40 }
0x1446   :  { %v1886_v63 = vadd.f32 1e-12, %v1884_v62 }
0x1448   :  { %2269 = vrsqrt.f32 %v1886_v63  ;;  %vm1894_vm13 = vweird.f32 %v1886_v63 }
0x144b   :  { %v1883_v0 = vpop.xlane.xlu0 %1882 }
0x144c   :  { %v1885_v2 = vmul.f32 %v1883_v0, %v2675_v40 }
0x144e   :  { %v2270_v4 = vpop.eup %2269  ;;  %v1887_v5 = vadd.f32 1e-12, %v1885_v2 }
0x144f   :  { %v1889_v7 = vmul.f32 %v2270_v4, %v1886_v63  ;;  %vm1895_vm15 = vweird.f32 %v2270_v4 }
0x1450   :  { %2271 = vrsqrt.f32 %v1887_v5  ;;  %vm1896_vm4 = vmor %vm1894_vm13, %vm1895_vm15  ;;  %vm1904_vm5 = vweird.f32 %v1887_v5 }
0x1451   :  { %v1890_v9 = vmul.f32 %v2270_v4, %v1889_v7 }
0x1453   :  { %v1891_v10 = vmul.f32 0.5, %v1890_v9 }
0x1455   :  { %v1892_v12 = vsub.f32 1.5, %v1891_v10 }
0x1456   :  { %v2272_v40 = vpop.eup %2271 }
0x1457   :  { %v1899_v6 = vmul.f32 %v2272_v40, %v1887_v5  ;;  %v1893_v13 = vmul.f32 %v2270_v4, %v1892_v12  ;;  %vm1905_vm14 = vweird.f32 %v2272_v40 }
0x1458   :  { %vm1906_vm6 = vmor %vm1904_vm5, %vm1905_vm14 }
0x1459   :  { %v1900_v15 = vmul.f32 %v2272_v40, %v1899_v6  ;;  %v1897_v38 = vsel %vm1896_vm4, %v2270_v4, %v1893_v13 }
0x145a   :  { %v1908_v11 = vmul.f32 %v1897_v38, %v1874_v56 }
0x145b   :  { %v1901_v16 = vmul.f32 0.5, %v1900_v15 }
0x145c   :  { %v1913_v14 = vmul.f32 %v2179_v35, %v1908_v11 }
0x145d   :  { %v1902_v17 = vsub.f32 1.5, %v1901_v16 }
0x145e   :  { %v1918_v20 = vadd.f32 %v2180_v45, %v1913_v14 }
0x145f   :  { %v1903_v34 = vmul.f32 %v2272_v40, %v1902_v17 }
0x1461   :  { %v1907_v24 = vsel %vm1906_vm6, %v2272_v40, %v1903_v34 }
0x1462   :  { %v1909_v18 = vmul.f32 %v1907_v24, %v1875_v60 }
0x1464   :  { %v1914_v19 = vmul.f32 %v2179_v35, %v1909_v18 }
0x1466   :  { %v1919_v29 = vadd.f32 %v2180_v45, %v1914_v19 }
0x1468   :  { %2146 = vmatpush.msk.msrb.mxu1 %vm263_vm1, %v1919_v29  ;;  %vm2012_vm1 = vcmask 58368  }
0x146a   :  { %1942 = vmatpush.msrb.mxu1 %v1918_v20 }
0x146b   :  { %2147 = vmatmul.msk.f32.vlgmr.msrb.gmra.mxu1 %vm202_vm3, %v1920_v33 }
0x14e8   :  { %v1944_v22 = vpop.f32.mrf.mxu1 }
0x14e9   :  { %2148 = vmatmul.msk.f32.vlgmr.msrb.gmra.mxu2 %vm125_vm0, %v1944_v22 }
0x156c   :  { %v1975_v26 = vpop.f32.mrf.mxu2 }
0x156d   :  { %v1976_v28 = vadd.f32 %v2181_v27, %v1975_v26 }
0x156f   :  { %2273 = vtanh.f32 %v1976_v28 }
0x1575   :  { %v2274_v36 = vpop.eup %2273 }
0x1576   :  { %v1980_v37 = vmul.f32 %v2274_v36, %v1979_v30 }
0x1578   :  { %2149 = vmatmul.msk.f32.vlgmr.msrb.gmra.mxu0 %vm125_vm0, %v1980_v37 }
0x15f5   :  { %v2009_v42 = vpop.f32.mrf.mxu0 }
0x15f6   :  { %v2010_v43 = vadd.f32 %v2182_v41, %v2009_v42 }
0x15f8   :  { %2013 = vst.msk [vmem:[#allocation2] sm:$0x3] %vm2012_vm1, %v2010_v43 }
0x15f9   :  { %2024 = dma.vmem_to_hbm [thread:$0]  %s2020_s5, 32, %s2022_s18, [#allocation3]  }
0x15fa   :  { %2301 = dma.done.wait [#allocation3], 32  }
0x15fb   :  { %2302 = vsyncadd [#allocation3], 4294967264 }
0x15fc   :  { %2029 = vsyncpa [#allocation3], 1 }

</bundles_post_ra>
